<compile_context>
chip_gen: v7x
topology: tpu7x:2x2x1
jax: 0.10.0
libtpu: 0.0.40
codegen_flags: <defaults>
</compile_context>

<pallas_src>
import jax
import jax.numpy as jnp
import numpy as np
from jax.experimental import pallas as pl
from jax.experimental.pallas import tpu as pltpu

NEG_BIG = -1e30
NORM_EPS2 = 1e-24   # (F.normalize eps=1e-12)^2, applied to the squared norm


# ---------------------------------------------------------------------------
# Kernels
# ---------------------------------------------------------------------------

def _linear_relu_norm_kernel(x_ref, w_ref, b_ref, h_ref, xn_ref):
    """h = relu(x @ w + b); xn = row-L2-normalize(h) in bf16 (for the next layer)."""
    acc = jnp.dot(x_ref[...].astype(jnp.bfloat16),
                  w_ref[...].astype(jnp.bfloat16),
                  preferred_element_type=jnp.float32)
    h = jnp.maximum(acc + b_ref[...], 0.0)
    h_ref[...] = h
    inv_n = jax.lax.rsqrt(
        jnp.maximum(jnp.sum(h * h, axis=-1, keepdims=True), NORM_EPS2))
    xn_ref[...] = (h * inv_n).astype(jnp.bfloat16)


def _agnn_prop_kernel(beta_ref, xnr_ref, xnc_ref, hc_ref, mask_ref,
                      ho_ref, xno_ref, qr_sc, m_sc, l_sc, acc_sc):
    """One (row-tile, col-tile) step of AGNN propagation with online softmax.

    Inputs are pre-normalized bf16 features (row & column tiles), the raw f32
    feature column tile (values), and the additive bf16 edge mask tile.
    Outputs (written at the last column step): f32 propagated features and their
    bf16 row-normalized form for the next layer.
    """
    c = pl.program_id(1)

    @pl.when(c == 0)
    def _():
        m_sc[...] = jnp.full(m_sc.shape, -jnp.inf, jnp.float32)
        l_sc[...] = jnp.zeros(l_sc.shape, jnp.float32)
        acc_sc[...] = jnp.zeros(acc_sc.shape, jnp.float32)
        # beta folded into the row operand once per row tile (N*H mults, not N*N).
        qr_sc[...] = (beta_ref[0] * xnr_ref[...].astype(jnp.float32)
                      ).astype(jnp.bfloat16)

    # Scores: contract feature dims directly (no transpose of the column tile).
    s = jax.lax.dot_general(qr_sc[...], xnc_ref[...],
                            (((1,), (1,)), ((), ())),
                            preferred_element_type=jnp.float32)        # [TR, TC]
    s = s + mask_ref[...].astype(jnp.float32)            # additive -1e30 edge mask

    # Online softmax update (flash-attention style).
    m_new = jnp.maximum(m_sc[...], jnp.max(s, axis=-1, keepdims=True))
    alpha = jnp.exp(m_sc[...] - m_new)
    p = jnp.exp(s - m_new)
    l_sc[...] = alpha * l_sc[...] + jnp.sum(p, axis=-1, keepdims=True)
    acc_sc[...] = alpha * acc_sc[...] + jnp.dot(p.astype(jnp.bfloat16),
                                                hc_ref[...].astype(jnp.bfloat16),
                                                preferred_element_type=jnp.float32)
    m_sc[...] = m_new

    @pl.when(c == pl.num_programs(1) - 1)
    def _():
        h_out = acc_sc[...] * pl.reciprocal(l_sc[...], approx=True)
        ho_ref[...] = h_out
        inv_n = jax.lax.rsqrt(
            jnp.maximum(jnp.sum(h_out * h_out, axis=-1, keepdims=True), NORM_EPS2))
        xno_ref[...] = (h_out * inv_n).astype(jnp.bfloat16)


def _linear_logsoftmax_kernel(h_ref, w_ref, b_ref, o_ref):
    """o = log_softmax(h @ w + b); padded classes carry -1e30 bias so they vanish."""
    logits = jnp.dot(h_ref[...].astype(jnp.bfloat16),
                     w_ref[...].astype(jnp.bfloat16),
                     preferred_element_type=jnp.float32) + b_ref[...]
    m = jnp.max(logits, axis=-1, keepdims=True)
    z = logits - m
    lse = jnp.log(jnp.sum(jnp.exp(z), axis=-1, keepdims=True))
    o_ref[...] = z - lse


# ---------------------------------------------------------------------------
# pallas_call wrappers
# ---------------------------------------------------------------------------

def _row_tile(n):
    return 128 if n % 128 == 0 else n


def _linear_relu_norm(x, w, b, *, tr):
    N, Fp = x.shape
    Hp = w.shape[1]
    return pl.pallas_call(
        _linear_relu_norm_kernel,
        out_shape=(jax.ShapeDtypeStruct((N, Hp), jnp.float32),
                   jax.ShapeDtypeStruct((N, Hp), jnp.bfloat16)),
        grid=(N // tr,),
        in_specs=[pl.BlockSpec((tr, Fp), lambda i: (i, 0)),
                  pl.BlockSpec((Fp, Hp), lambda i: (0, 0)),
                  pl.BlockSpec((1, Hp), lambda i: (0, 0))],
        out_specs=(pl.BlockSpec((tr, Hp), lambda i: (i, 0)),
                   pl.BlockSpec((tr, Hp), lambda i: (i, 0))),
        compiler_params=pltpu.CompilerParams(dimension_semantics=("parallel",)),
    )(x, w, b)


def _agnn_propagate(h, xn, mask_add, beta, *, tr, tc):
    N, Hp = h.shape
    return pl.pallas_call(
        _agnn_prop_kernel,
        out_shape=(jax.ShapeDtypeStruct((N, Hp), jnp.float32),
                   jax.ShapeDtypeStruct((N, Hp), jnp.bfloat16)),
        grid=(N // tr, N // tc),
        in_specs=[
            pl.BlockSpec(memory_space=pltpu.MemorySpace.SMEM),   # beta scalar
            pl.BlockSpec((tr, Hp), lambda r, c: (r, 0)),         # xn row tile (bf16)
            pl.BlockSpec((tc, Hp), lambda r, c: (c, 0)),         # xn col tile (bf16)
            pl.BlockSpec((tc, Hp), lambda r, c: (c, 0)),         # h col tile (f32, values)
            pl.BlockSpec((tr, tc), lambda r, c: (r, c)),         # additive mask tile
        ],
        out_specs=(pl.BlockSpec((tr, Hp), lambda r, c: (r, 0)),  # resident over c
                   pl.BlockSpec((tr, Hp), lambda r, c: (r, 0))),
        scratch_shapes=[pltpu.VMEM((tr, Hp), jnp.bfloat16),      # beta-scaled row op
                        pltpu.VMEM((tr, 1), jnp.float32),        # running max
                        pltpu.VMEM((tr, 1), jnp.float32),        # running denom
                        pltpu.VMEM((tr, Hp), jnp.float32)],      # f32 accumulator
        compiler_params=pltpu.CompilerParams(
            dimension_semantics=("parallel", "arbitrary"),
            vmem_limit_bytes=64 * 1024 * 1024),
    )(beta, xn, xn, h, mask_add)


def _linear_logsoftmax(h, w, b, *, tr):
    N, Hp = h.shape
    Cp = w.shape[1]
    return pl.pallas_call(
        _linear_logsoftmax_kernel,
        out_shape=jax.ShapeDtypeStruct((N, Cp), jnp.float32),
        grid=(N // tr,),
        in_specs=[pl.BlockSpec((tr, Hp), lambda i: (i, 0)),
                  pl.BlockSpec((Hp, Cp), lambda i: (0, 0)),
                  pl.BlockSpec((1, Cp), lambda i: (0, 0))],
        out_specs=pl.BlockSpec((tr, Cp), lambda i: (i, 0)),
        compiler_params=pltpu.CompilerParams(dimension_semantics=("parallel",)),
    )(h, w, b)


def agnnet_forward(x, mask_add, w1, b1, betas, w4, b4):
    """Full AGNNet forward (eval): relu-linear -> 2x AGNN prop -> linear -> log_softmax."""
    N = x.shape[0]
    tr = _row_tile(N)
    tc = _row_tile(N)
    h, xn = _linear_relu_norm(x, w1, b1, tr=tr)        # dropout == identity (eval)
    for layer in range(2):
        h, xn = _agnn_propagate(h, xn, mask_add, betas[layer:layer + 1], tr=tr, tc=tc)
    return _linear_logsoftmax(h, w4, b4, tr=tr)        # dropout == identity (eval)


# ---------------------------------------------------------------------------
# Pure-JAX reference (same bf16 matmul operand casts) & helpers
# ---------------------------------------------------------------------------

def reference_forward(x, mask_add, w1, b1, betas, w4, b4):
    bf, f32 = jnp.bfloat16, jnp.float32
    h = jnp.dot(x.astype(bf), w1.astype(bf), preferred_element_type=f32) + b1
    h = jnp.maximum(h, 0.0)
    madd = mask_add.astype(f32)
    for layer in range(2):
        beta = betas[layer]
        xn = h * jax.lax.rsqrt(
            jnp.maximum(jnp.sum(h * h, axis=-1, keepdims=True), NORM_EPS2))
        s = jnp.dot((beta * xn).astype(bf), xn.astype(bf).T,
                    preferred_element_type=f32) + madd
        s = s - jnp.max(s, axis=-1, keepdims=True)
        e = jnp.exp(s)
        p = e / jnp.sum(e, axis=-1, keepdims=True)
        h = jnp.dot(p.astype(bf), h.astype(bf), preferred_element_type=f32)
    logits = jnp.dot(h.astype(bf), w4.astype(bf), preferred_element_type=f32) + b4
    return jax.nn.log_softmax(logits, axis=-1)


def pad_to(a, shape, fill=0.0):
    out = np.full(shape, fill, dtype=np.float32)
    out[tuple(slice(0, s) for s in a.shape)] = np.asarray(a)
    return jnp.asarray(out)


def build_additive_mask(num_nodes, edge_index):
    """bf16 additive mask: 0 where node i receives from node j (incl. self-loops), else -1e30."""
    m = np.full((num_nodes, num_nodes), NEG_BIG, dtype=np.float32)
    src, dst = edge_index
    m[dst, src] = 0.0
    m[np.arange(num_nodes), np.arange(num_nodes)] = 0.0
    return jnp.asarray(m, dtype=jnp.bfloat16)


# ---------------------------------------------------------------------------
# Demo
# ---------------------------------------------------------------------------

if __name__ == "__main__":
    # Small graph: N nodes, F input features, nhidden hidden units, C classes.
    N, F_IN, H, C = 256, 32, 16, 4
    Fp, Hp, Cp = 128, 128, 128      # lane-dense padded dims

    key = jax.random.PRNGKey(0)
    k_x, k_w1, k_b1, k_w4, k_b4 = jax.random.split(key, 5)

    x_raw = jax.random.normal(k_x, (N, F_IN), dtype=jnp.float32)
    w1_raw = jax.random.normal(k_w1, (F_IN, H), dtype=jnp.float32) / np.sqrt(F_IN)
    b1_raw = jax.random.normal(k_b1, (H,), dtype=jnp.float32) * 0.01
    w4_raw = jax.random.normal(k_w4, (H, C), dtype=jnp.float32) / np.sqrt(H)
    b4_raw = jax.random.normal(k_b4, (C,), dtype=jnp.float32) * 0.01
    betas = jnp.ones((2,), dtype=jnp.float32)   # conv2 (fixed) and conv3 (learnable) init to 1

    # deterministic bidirectional ring graph (data.edge_index) + self loops
    src = np.concatenate([np.arange(N), np.arange(N)])
    dst = np.concatenate([(np.arange(N) + 1) % N, (np.arange(N) - 1) % N])
    edge_index = np.stack([src, dst])
    mask_add = build_additive_mask(N, edge_index)

    # Zero-pad features / weights to lane-dense 128; padded class biases = -1e30
    # so the padded lanes never contribute to the log_softmax.
    x = pad_to(x_raw, (N, Fp))
    w1 = pad_to(w1_raw, (Fp, Hp))
    b1 = pad_to(np.asarray(b1_raw)[None, :], (1, Hp))
    w4 = pad_to(w4_raw, (Hp, Cp))
    b4 = pad_to(np.asarray(b4_raw)[None, :], (1, Cp), fill=NEG_BIG)

    fwd = jax.jit(agnnet_forward)
    out = jax.block_until_ready(fwd(x, mask_add, w1, b1, betas, w4, b4))
    ref = jax.block_until_ready(
        reference_forward(x, mask_add, w1, b1, betas, w4, b4))

    out_np = np.asarray(out[:, :C])
    ref_np = np.asarray(ref[:, :C])

    assert out.shape == (N, Cp)
    assert np.all(np.isfinite(out_np))
    row_sums = np.exp(out_np).sum(axis=1)
    assert np.allclose(row_sums, 1.0, atol=1e-3), row_sums
    max_diff = float(np.abs(out_np - ref_np).max())
    assert np.allclose(out_np, ref_np, atol=1e-1), f"max |diff| = {max_diff}"

    print("KERNEL_OK")
</pallas_src>

<mosaic_0001>
module attributes {stable_mosaic.version = 11 : i64} {
  func.func @_linear_relu_norm_kernel(%arg0: i32, %arg1: memref<128x128xf32, #tpu.memory_space<vmem>>, %arg2: memref<128x128xf32, #tpu.memory_space<vmem>>, %arg3: memref<1x128xf32, #tpu.memory_space<vmem>>, %arg4: memref<128x128xf32, #tpu.memory_space<vmem>>, %arg5: memref<128x128xbf16, #tpu.memory_space<vmem>>) attributes {dimension_semantics = [#tpu.dimension_semantics<parallel>], iteration_bounds = array<i64: 2>, scalar_prefetch = 0 : i64, scratch_operands = 0 : i64, tpu.core_type = #tpu.core_type<tc>, window_params = [{transform_indices = @transform_0, window_bounds = array<i64: 128, 128>}, {pipeline_mode = #tpu.pipeline_mode<synchronous>, transform_indices = @transform_1, window_bounds = array<i64: 128, 128>}, {pipeline_mode = #tpu.pipeline_mode<synchronous>, transform_indices = @transform_2, window_bounds = array<i64: 1, 128>}, {transform_indices = @transform_3, window_bounds = array<i64: 128, 128>}, {transform_indices = @transform_4, window_bounds = array<i64: 128, 128>}]} {
    %c0 = arith.constant 0 : index
    %c0_0 = arith.constant 0 : index
    %0 = vector.load %arg1[%c0, %c0_0] : memref<128x128xf32, #tpu.memory_space<vmem>>, vector<128x128xf32>
    %1 = arith.truncf %0 : vector<128x128xf32> to vector<128x128xbf16>
    %c0_1 = arith.constant 0 : index
    %c0_2 = arith.constant 0 : index
    %2 = vector.load %arg2[%c0_1, %c0_2] : memref<128x128xf32, #tpu.memory_space<vmem>>, vector<128x128xf32>
    %3 = arith.truncf %2 : vector<128x128xf32> to vector<128x128xbf16>
    %cst = arith.constant dense<0.000000e+00> : vector<128x128xf32>
    %4 = tpu.matmul %1, %3, %cst {dimension_numbers = #tpu.dot_dimension_numbers<[1], [0], [0], [1], [0, 0, 1, 1], [], []>} : vector<128x128xbf16>, vector<128x128xbf16>, vector<128x128xf32> -> vector<128x128xf32>
    %c0_3 = arith.constant 0 : index
    %c0_4 = arith.constant 0 : index
    %5 = vector.load %arg3[%c0_3, %c0_4] : memref<1x128xf32, #tpu.memory_space<vmem>>, vector<1x128xf32>
    %6 = vector.broadcast %5 : vector<1x128xf32> to vector<128x128xf32>
    %7 = arith.addf %4, %6 : vector<128x128xf32>
    %cst_5 = arith.constant 0.000000e+00 : f32
    %8 = vector.broadcast %cst_5 : f32 to vector<128x128xf32>
    %9 = arith.maximumf %7, %8 : vector<128x128xf32>
    %c0_6 = arith.constant 0 : index
    %c0_7 = arith.constant 0 : index
    %10 = vector.load %arg4[%c0_6, %c0_7] : memref<128x128xf32, #tpu.memory_space<vmem>>, vector<128x128xf32>
    tpu.vector_store %arg4[%c0_6, %c0_7], %9 {strides = array<i32>} : memref<128x128xf32, #tpu.memory_space<vmem>>, vector<128x128xf32>,
    %11 = arith.mulf %9, %9 : vector<128x128xf32>
    %cst_8 = arith.constant dense<0.000000e+00> : vector<128xf32>
    %12 = vector.multi_reduction <add>, %11, %cst_8 [1] : vector<128x128xf32> to vector<128xf32>
    %13 = vector.shape_cast %12 : vector<128xf32> to vector<128x1xf32>
    %cst_9 = arith.constant 1.000000e-24 : f32
    %14 = vector.broadcast %cst_9 : f32 to vector<128x1xf32>
    %15 = arith.maximumf %13, %14 : vector<128x1xf32>
    %16 = math.rsqrt %15 : vector<128x1xf32>
    %17 = vector.broadcast %16 : vector<128x1xf32> to vector<128x128xf32>
    %18 = arith.mulf %9, %17 : vector<128x128xf32>
    %19 = arith.truncf %18 : vector<128x128xf32> to vector<128x128xbf16>
    %c0_10 = arith.constant 0 : index
    %c0_11 = arith.constant 0 : index
    %20 = vector.load %arg5[%c0_10, %c0_11] : memref<128x128xbf16, #tpu.memory_space<vmem>>, vector<128x128xbf16>
    tpu.vector_store %arg5[%c0_10, %c0_11], %19 {strides = array<i32>} : memref<128x128xbf16, #tpu.memory_space<vmem>>, vector<128x128xbf16>,
    return
  }
  func.func @transform_0(%arg0: i32) -> (i32, i32) {
    %c0_i32 = arith.constant 0 : i32
    %c0_i32_0 = arith.constant 0 : i32
    return %arg0, %c0_i32 : i32, i32
  }
  func.func @transform_1(%arg0: i32) -> (i32, i32) {
    %c0_i32 = arith.constant 0 : i32
    %c0_i32_0 = arith.constant 0 : i32
    %c0_i32_1 = arith.constant 0 : i32
    return %c0_i32, %c0_i32_0 : i32, i32
  }
  func.func @transform_2(%arg0: i32) -> (i32, i32) {
    %c0_i32 = arith.constant 0 : i32
    %c0_i32_0 = arith.constant 0 : i32
    %c0_i32_1 = arith.constant 0 : i32
    return %c0_i32, %c0_i32_0 : i32, i32
  }
  func.func @transform_3(%arg0: i32) -> (i32, i32) {
    %c0_i32 = arith.constant 0 : i32
    %c0_i32_0 = arith.constant 0 : i32
    return %arg0, %c0_i32 : i32, i32
  }
  func.func @transform_4(%arg0: i32) -> (i32, i32) {
    %c0_i32 = arith.constant 0 : i32
    %c0_i32_0 = arith.constant 0 : i32
    return %arg0, %c0_i32 : i32, i32
  }
}

module attributes {stable_mosaic.version = 11 : i64} {
  func.func @_linear_logsoftmax_kernel(%arg0: i32, %arg1: memref<128x128xf32, #tpu.memory_space<vmem>>, %arg2: memref<128x128xf32, #tpu.memory_space<vmem>>, %arg3: memref<1x128xf32, #tpu.memory_space<vmem>>, %arg4: memref<128x128xf32, #tpu.memory_space<vmem>>) attributes {dimension_semantics = [#tpu.dimension_semantics<parallel>], iteration_bounds = array<i64: 2>, scalar_prefetch = 0 : i64, scratch_operands = 0 : i64, tpu.core_type = #tpu.core_type<tc>, window_params = [{transform_indices = @transform_0, window_bounds = array<i64: 128, 128>}, {pipeline_mode = #tpu.pipeline_mode<synchronous>, transform_indices = @transform_1, window_bounds = array<i64: 128, 128>}, {pipeline_mode = #tpu.pipeline_mode<synchronous>, transform_indices = @transform_2, window_bounds = array<i64: 1, 128>}, {transform_indices = @transform_3, window_bounds = array<i64: 128, 128>}]} {
    %c0 = arith.constant 0 : index
    %c0_0 = arith.constant 0 : index
    %0 = vector.load %arg1[%c0, %c0_0] : memref<128x128xf32, #tpu.memory_space<vmem>>, vector<128x128xf32>
    %1 = arith.truncf %0 : vector<128x128xf32> to vector<128x128xbf16>
    %c0_1 = arith.constant 0 : index
    %c0_2 = arith.constant 0 : index
    %2 = vector.load %arg2[%c0_1, %c0_2] : memref<128x128xf32, #tpu.memory_space<vmem>>, vector<128x128xf32>
    %3 = arith.truncf %2 : vector<128x128xf32> to vector<128x128xbf16>
    %cst = arith.constant dense<0.000000e+00> : vector<128x128xf32>
    %4 = tpu.matmul %1, %3, %cst {dimension_numbers = #tpu.dot_dimension_numbers<[1], [0], [0], [1], [0, 0, 1, 1], [], []>} : vector<128x128xbf16>, vector<128x128xbf16>, vector<128x128xf32> -> vector<128x128xf32>
    %c0_3 = arith.constant 0 : index
    %c0_4 = arith.constant 0 : index
    %5 = vector.load %arg3[%c0_3, %c0_4] : memref<1x128xf32, #tpu.memory_space<vmem>>, vector<1x128xf32>
    %6 = vector.broadcast %5 : vector<1x128xf32> to vector<128x128xf32>
    %7 = arith.addf %4, %6 : vector<128x128xf32>
    %cst_5 = arith.constant dense<0xFF800000> : vector<128xf32>
    %8 = vector.multi_reduction <maximumf>, %7, %cst_5 [1] : vector<128x128xf32> to vector<128xf32>
    %9 = vector.shape_cast %8 : vector<128xf32> to vector<128x1xf32>
    %10 = vector.broadcast %9 : vector<128x1xf32> to vector<128x128xf32>
    %11 = arith.subf %7, %10 : vector<128x128xf32>
    %12 = math.exp %11 : vector<128x128xf32>
    %cst_6 = arith.constant dense<0.000000e+00> : vector<128xf32>
    %13 = vector.multi_reduction <add>, %12, %cst_6 [1] : vector<128x128xf32> to vector<128xf32>
    %14 = vector.shape_cast %13 : vector<128xf32> to vector<128x1xf32>
    %15 = math.log %14 : vector<128x1xf32>
    %16 = vector.broadcast %15 : vector<128x1xf32> to vector<128x128xf32>
    %17 = arith.subf %11, %16 : vector<128x128xf32>
    %c0_7 = arith.constant 0 : index
    %c0_8 = arith.constant 0 : index
    %18 = vector.load %arg4[%c0_7, %c0_8] : memref<128x128xf32, #tpu.memory_space<vmem>>, vector<128x128xf32>
    tpu.vector_store %arg4[%c0_7, %c0_8], %17 {strides = array<i32>} : memref<128x128xf32, #tpu.memory_space<vmem>>, vector<128x128xf32>,
    return
  }
  func.func @transform_0(%arg0: i32) -> (i32, i32) {
    %c0_i32 = arith.constant 0 : i32
    %c0_i32_0 = arith.constant 0 : i32
    return %arg0, %c0_i32 : i32, i32
  }
  func.func @transform_1(%arg0: i32) -> (i32, i32) {
    %c0_i32 = arith.constant 0 : i32
    %c0_i32_0 = arith.constant 0 : i32
    %c0_i32_1 = arith.constant 0 : i32
    return %c0_i32, %c0_i32_0 : i32, i32
  }
  func.func @transform_2(%arg0: i32) -> (i32, i32) {
    %c0_i32 = arith.constant 0 : i32
    %c0_i32_0 = arith.constant 0 : i32
    %c0_i32_1 = arith.constant 0 : i32
    return %c0_i32, %c0_i32_0 : i32, i32
  }
  func.func @transform_3(%arg0: i32) -> (i32, i32) {
    %c0_i32 = arith.constant 0 : i32
    %c0_i32_0 = arith.constant 0 : i32
    return %arg0, %c0_i32 : i32, i32
  }
}

module attributes {stable_mosaic.version = 11 : i64} {
  func.func @_agnn_prop_kernel(%arg0: i32, %arg1: i32, %arg2: memref<1xf32, #tpu.memory_space<smem>>, %arg3: memref<128x128xbf16, #tpu.memory_space<vmem>>, %arg4: memref<128x128xbf16, #tpu.memory_space<vmem>>, %arg5: memref<128x128xf32, #tpu.memory_space<vmem>>, %arg6: memref<128x128xbf16, #tpu.memory_space<vmem>>, %arg7: memref<128x128xf32, #tpu.memory_space<vmem>>, %arg8: memref<128x128xbf16, #tpu.memory_space<vmem>>, %arg9: memref<128x128xbf16, #tpu.memory_space<vmem>>, %arg10: memref<128x1xf32, #tpu.memory_space<vmem>>, %arg11: memref<128x1xf32, #tpu.memory_space<vmem>>, %arg12: memref<128x128xf32, #tpu.memory_space<vmem>>) attributes {dimension_semantics = [#tpu.dimension_semantics<parallel>, #tpu.dimension_semantics<arbitrary>], iteration_bounds = array<i64: 2, 2>, scalar_prefetch = 0 : i64, scratch_operands = 4 : i64, tpu.core_type = #tpu.core_type<tc>, window_params = [{transform_indices = @transform_0, window_bounds = array<i64: 1>}, {transform_indices = @transform_1, window_bounds = array<i64: 128, 128>}, {transform_indices = @transform_2, window_bounds = array<i64: 128, 128>}, {transform_indices = @transform_3, window_bounds = array<i64: 128, 128>}, {transform_indices = @transform_4, window_bounds = array<i64: 128, 128>}, {transform_indices = @transform_5, window_bounds = array<i64: 128, 128>}, {transform_indices = @transform_6, window_bounds = array<i64: 128, 128>}]} {
    %c0_i32 = arith.constant 0 : i32
    %0 = arith.cmpi eq, %arg1, %c0_i32 : i32
    %1 = arith.extui %0 : i1 to i32
    %c0_i32_0 = arith.constant 0 : i32
    %2 = arith.cmpi ne, %1, %c0_i32_0 : i32
    scf.if %2 {
      %cst_26 = arith.constant 0xFF800000 : f32
      %38 = vector.broadcast %cst_26 : f32 to vector<128x1xf32>
      %c0_27 = arith.constant 0 : index
      %c0_28 = arith.constant 0 : index
      %39 = vector.load %arg10[%c0_27, %c0_28] : memref<128x1xf32, #tpu.memory_space<vmem>>, vector<128x1xf32>
      tpu.vector_store %arg10[%c0_27, %c0_28], %38 {strides = array<i32>} : memref<128x1xf32, #tpu.memory_space<vmem>>, vector<128x1xf32>,
      %cst_29 = arith.constant 0.000000e+00 : f32
      %40 = vector.broadcast %cst_29 : f32 to vector<128x1xf32>
      %c0_30 = arith.constant 0 : index
      %c0_31 = arith.constant 0 : index
      %41 = vector.load %arg11[%c0_30, %c0_31] : memref<128x1xf32, #tpu.memory_space<vmem>>, vector<128x1xf32>
      tpu.vector_store %arg11[%c0_30, %c0_31], %40 {strides = array<i32>} : memref<128x1xf32, #tpu.memory_space<vmem>>, vector<128x1xf32>,
      %cst_32 = arith.constant 0.000000e+00 : f32
      %42 = vector.broadcast %cst_32 : f32 to vector<128x128xf32>
      %c0_33 = arith.constant 0 : index
      %c0_34 = arith.constant 0 : index
      %43 = vector.load %arg12[%c0_33, %c0_34] : memref<128x128xf32, #tpu.memory_space<vmem>>, vector<128x128xf32>
      tpu.vector_store %arg12[%c0_33, %c0_34], %42 {strides = array<i32>} : memref<128x128xf32, #tpu.memory_space<vmem>>, vector<128x128xf32>,
      %c0_35 = arith.constant 0 : index
      %44 = memref.load %arg2[%c0_35] : memref<1xf32, #tpu.memory_space<smem>>
      %c0_36 = arith.constant 0 : index
      %c0_37 = arith.constant 0 : index
      %45 = vector.load %arg3[%c0_36, %c0_37] : memref<128x128xbf16, #tpu.memory_space<vmem>>, vector<128x128xbf16>
      %46 = arith.extf %45 : vector<128x128xbf16> to vector<128x128xf32>
      %47 = vector.broadcast %44 : f32 to vector<128x128xf32>
      %48 = arith.mulf %47, %46 : vector<128x128xf32>
      %49 = arith.truncf %48 : vector<128x128xf32> to vector<128x128xbf16>
      %c0_38 = arith.constant 0 : index
      %c0_39 = arith.constant 0 : index
      %50 = vector.load %arg9[%c0_38, %c0_39] : memref<128x128xbf16, #tpu.memory_space<vmem>>, vector<128x128xbf16>
      tpu.vector_store %arg9[%c0_38, %c0_39], %49 {strides = array<i32>} : memref<128x128xbf16, #tpu.memory_space<vmem>>, vector<128x128xbf16>,
    } else {
    }
    %c0 = arith.constant 0 : index
    %c0_1 = arith.constant 0 : index
    %3 = vector.load %arg9[%c0, %c0_1] : memref<128x128xbf16, #tpu.memory_space<vmem>>, vector<128x128xbf16>
    %c0_2 = arith.constant 0 : index
    %c0_3 = arith.constant 0 : index
    %4 = vector.load %arg4[%c0_2, %c0_3] : memref<128x128xbf16, #tpu.memory_space<vmem>>, vector<128x128xbf16>
    %cst = arith.constant dense<0.000000e+00> : vector<128x128xf32>
    %5 = tpu.matmul %3, %4, %cst {dimension_numbers = #tpu.dot_dimension_numbers<[1], [1], [0], [0], [0, 0, 1, 0], [], []>} : vector<128x128xbf16>, vector<128x128xbf16>, vector<128x128xf32> -> vector<128x128xf32>
    %c0_4 = arith.constant 0 : index
    %c0_5 = arith.constant 0 : index
    %6 = vector.load %arg6[%c0_4, %c0_5] : memref<128x128xbf16, #tpu.memory_space<vmem>>, vector<128x128xbf16>
    %7 = arith.extf %6 : vector<128x128xbf16> to vector<128x128xf32>
    %8 = arith.addf %5, %7 : vector<128x128xf32>
    %c0_6 = arith.constant 0 : index
    %c0_7 = arith.constant 0 : index
    %9 = vector.load %arg10[%c0_6, %c0_7] : memref<128x1xf32, #tpu.memory_space<vmem>>, vector<128x1xf32>
    %cst_8 = arith.constant dense<0xFF800000> : vector<128xf32>
    %10 = vector.multi_reduction <maximumf>, %8, %cst_8 [1] : vector<128x128xf32> to vector<128xf32>
    %11 = vector.shape_cast %10 : vector<128xf32> to vector<128x1xf32>
    %12 = arith.maximumf %9, %11 : vector<128x1xf32>
    %c0_9 = arith.constant 0 : index
    %c0_10 = arith.constant 0 : index
    %13 = vector.load %arg10[%c0_9, %c0_10] : memref<128x1xf32, #tpu.memory_space<vmem>>, vector<128x1xf32>
    %14 = arith.subf %13, %12 : vector<128x1xf32>
    %15 = math.exp %14 : vector<128x1xf32>
    %16 = vector.broadcast %12 : vector<128x1xf32> to vector<128x128xf32>
    %17 = arith.subf %8, %16 : vector<128x128xf32>
    %18 = math.exp %17 : vector<128x128xf32>
    %c0_11 = arith.constant 0 : index
    %c0_12 = arith.constant 0 : index
    %19 = vector.load %arg11[%c0_11, %c0_12] : memref<128x1xf32, #tpu.memory_space<vmem>>, vector<128x1xf32>
    %20 = arith.mulf %15, %19 : vector<128x1xf32>
    %cst_13 = arith.constant dense<0.000000e+00> : vector<128xf32>
    %21 = vector.multi_reduction <add>, %18, %cst_13 [1] : vector<128x128xf32> to vector<128xf32>
    %22 = vector.shape_cast %21 : vector<128xf32> to vector<128x1xf32>
    %23 = arith.addf %20, %22 : vector<128x1xf32>
    %c0_14 = arith.constant 0 : index
    %c0_15 = arith.constant 0 : index
    %24 = vector.load %arg11[%c0_14, %c0_15] : memref<128x1xf32, #tpu.memory_space<vmem>>, vector<128x1xf32>
    tpu.vector_store %arg11[%c0_14, %c0_15], %23 {strides = array<i32>} : memref<128x1xf32, #tpu.memory_space<vmem>>, vector<128x1xf32>,
    %c0_16 = arith.constant 0 : index
    %c0_17 = arith.constant 0 : index
    %25 = vector.load %arg12[%c0_16, %c0_17] : memref<128x128xf32, #tpu.memory_space<vmem>>, vector<128x128xf32>
    %26 = vector.broadcast %15 : vector<128x1xf32> to vector<128x128xf32>
    %27 = arith.mulf %26, %25 : vector<128x128xf32>
    %28 = arith.truncf %18 : vector<128x128xf32> to vector<128x128xbf16>
    %c0_18 = arith.constant 0 : index
    %c0_19 = arith.constant 0 : index
    %29 = vector.load %arg5[%c0_18, %c0_19] : memref<128x128xf32, #tpu.memory_space<vmem>>, vector<128x128xf32>
    %30 = arith.truncf %29 : vector<128x128xf32> to vector<128x128xbf16>
    %cst_20 = arith.constant dense<0.000000e+00> : vector<128x128xf32>
    %31 = tpu.matmul %28, %30, %cst_20 {dimension_numbers = #tpu.dot_dimension_numbers<[1], [0], [0], [1], [0, 0, 1, 1], [], []>} : vector<128x128xbf16>, vector<128x128xbf16>, vector<128x128xf32> -> vector<128x128xf32>
    %32 = arith.addf %27, %31 : vector<128x128xf32>
    %c0_21 = arith.constant 0 : index
    %c0_22 = arith.constant 0 : index
    %33 = vector.load %arg12[%c0_21, %c0_22] : memref<128x128xf32, #tpu.memory_space<vmem>>, vector<128x128xf32>
    tpu.vector_store %arg12[%c0_21, %c0_22], %32 {strides = array<i32>} : memref<128x128xf32, #tpu.memory_space<vmem>>, vector<128x128xf32>,
    %c0_23 = arith.constant 0 : index
    %c0_24 = arith.constant 0 : index
    %34 = vector.load %arg10[%c0_23, %c0_24] : memref<128x1xf32, #tpu.memory_space<vmem>>, vector<128x1xf32>
    tpu.vector_store %arg10[%c0_23, %c0_24], %12 {strides = array<i32>} : memref<128x1xf32, #tpu.memory_space<vmem>>, vector<128x1xf32>,
    %c1_i32 = arith.constant 1 : i32
    %35 = arith.cmpi eq, %arg1, %c1_i32 : i32
    %36 = arith.extui %35 : i1 to i32
    %c0_i32_25 = arith.constant 0 : i32
    %37 = arith.cmpi ne, %36, %c0_i32_25 : i32
    scf.if %37 {
      %c0_26 = arith.constant 0 : index
      %c0_27 = arith.constant 0 : index
      %38 = vector.load %arg12[%c0_26, %c0_27] : memref<128x128xf32, #tpu.memory_space<vmem>>, vector<128x128xf32>
      %c0_28 = arith.constant 0 : index
      %c0_29 = arith.constant 0 : index
      %39 = vector.load %arg11[%c0_28, %c0_29] : memref<128x1xf32, #tpu.memory_space<vmem>>, vector<128x1xf32>
      %40 = tpu.reciprocal %39 {approx = true} : vector<128x1xf32> -> vector<128x1xf32>
      %41 = vector.broadcast %40 : vector<128x1xf32> to vector<128x128xf32>
      %42 = arith.mulf %38, %41 : vector<128x128xf32>
      %c0_30 = arith.constant 0 : index
      %c0_31 = arith.constant 0 : index
      %43 = vector.load %arg7[%c0_30, %c0_31] : memref<128x128xf32, #tpu.memory_space<vmem>>, vector<128x128xf32>
      tpu.vector_store %arg7[%c0_30, %c0_31], %42 {strides = array<i32>} : memref<128x128xf32, #tpu.memory_space<vmem>>, vector<128x128xf32>,
      %44 = arith.mulf %42, %42 : vector<128x128xf32>
      %cst_32 = arith.constant dense<0.000000e+00> : vector<128xf32>
      %45 = vector.multi_reduction <add>, %44, %cst_32 [1] : vector<128x128xf32> to vector<128xf32>
      %46 = vector.shape_cast %45 : vector<128xf32> to vector<128x1xf32>
      %cst_33 = arith.constant 1.000000e-24 : f32
      %47 = vector.broadcast %cst_33 : f32 to vector<128x1xf32>
      %48 = arith.maximumf %46, %47 : vector<128x1xf32>
      %49 = math.rsqrt %48 : vector<128x1xf32>
      %50 = vector.broadcast %49 : vector<128x1xf32> to vector<128x128xf32>
      %51 = arith.mulf %42, %50 : vector<128x128xf32>
      %52 = arith.truncf %51 : vector<128x128xf32> to vector<128x128xbf16>
      %c0_34 = arith.constant 0 : index
      %c0_35 = arith.constant 0 : index
      %53 = vector.load %arg8[%c0_34, %c0_35] : memref<128x128xbf16, #tpu.memory_space<vmem>>, vector<128x128xbf16>
      tpu.vector_store %arg8[%c0_34, %c0_35], %52 {strides = array<i32>} : memref<128x128xbf16, #tpu.memory_space<vmem>>, vector<128x128xbf16>,
    } else {
    }
    return
  }
  func.func @transform_0(%arg0: i32, %arg1: i32) -> i32 {
    %c0_i32 = arith.constant 0 : i32
    %c0_i32_0 = arith.constant 0 : i32
    return %c0_i32 : i32
  }
  func.func @transform_1(%arg0: i32, %arg1: i32) -> (i32, i32) {
    %c0_i32 = arith.constant 0 : i32
    %c0_i32_0 = arith.constant 0 : i32
    return %arg0, %c0_i32 : i32, i32
  }
  func.func @transform_2(%arg0: i32, %arg1: i32) -> (i32, i32) {
    %c0_i32 = arith.constant 0 : i32
    %c0_i32_0 = arith.constant 0 : i32
    return %arg1, %c0_i32 : i32, i32
  }
  func.func @transform_3(%arg0: i32, %arg1: i32) -> (i32, i32) {
    %c0_i32 = arith.constant 0 : i32
    %c0_i32_0 = arith.constant 0 : i32
    return %arg1, %c0_i32 : i32, i32
  }
  func.func @transform_4(%arg0: i32, %arg1: i32) -> (i32, i32) {
    %c0_i32 = arith.constant 0 : i32
    return %arg0, %arg1 : i32, i32
  }
  func.func @transform_5(%arg0: i32, %arg1: i32) -> (i32, i32) {
    %c0_i32 = arith.constant 0 : i32
    %c0_i32_0 = arith.constant 0 : i32
    return %arg0, %c0_i32 : i32, i32
  }
  func.func @transform_6(%arg0: i32, %arg1: i32) -> (i32, i32) {
    %c0_i32 = arith.constant 0 : i32
    %c0_i32_0 = arith.constant 0 : i32
    return %arg0, %c0_i32 : i32, i32
  }
}

</mosaic_0001>

<bundles_post_ra>
// kernel: agnnet_forward.7
= control target key start
LH: loop header
LB: loop body
LE: loop exit
PB: predicated region body
PF: predicated region fallthrough
CT: control target
= control target key end

     0   :  { %8 = vsyncpa [#allocation3], 0  ;;  %s1328_s0 = inlined_call_operand.hbm [shape: f32[256,128], index: 0, kind: input, shape index: {}]   ;;  %s1329_s1 = inlined_call_operand.hbm [shape: f32[128,128], index: 1, kind: input, shape index: {}]   ;;  %s1330_s2 = inlined_call_operand.vmem [shape: f32[1,128], index: 2, kind: input, shape index: {}]   ;;  %s1331_s3 = inlined_call_operand.hbm [shape: f32[256,128], index: 3, kind: output, shape index: {}]  }
   0x1   :  { %10 = vsyncpa [#allocation3 + $0x1], 0 }
   0x2   :  { %11 = vsyncpa [#allocation6], 0 }
   0x3   :  { %12 = vsyncpa [#allocation4], 0 }
   0x4   :  { %14 = vsyncpa [#allocation4 + $0x1], 0  ;;  %s997_s12 = smov 0   ;;  %s999_s13 = smov 0  }
   0x5   :  { %s1001_s14 = smov 0   ;;  %s1003_s15 = smov 0  }
   0x6 LB: > { %s1018_s16 = sadd.s32 4294967295, %s968_s15   ;;  %s632_s17 = sadd.s32 4294967294, %s968_s15   ;;  %s968_s15 = sphi %s1003_s15, %s1351_s15   ;;  %s964_s14 = sphi %s1001_s14, %s1350_s14   ;;  %s960_s13 = sphi %s999_s13, %s1349_s13   ;;  %s956_s12 = sphi %s997_s12, %s1348_s12  }
   0x7   : > { %p40_p0 = scmp.ne.s32.totalorder %s960_s13, %s956_s12  ;;  %p1332_p1 = scmp.eq.s32.totalorder %s1018_s16, 0 }
   0x8   : > { %p112_p3 = scmp.eq.s32.totalorder %s632_s17, 1  ;;  %p633_p5 = scmp.ge.s32.totalorder %s968_s15, 1 }
   0x9   : > { %p1027_p4 = por %p1332_p1, %p40_p0  ;;  %p119_p7 = scmp.lt.s32.totalorder %s968_s15, 3 }
   0xa   : > { %p1032_p6 = por %p112_p3, %p40_p0  ;;  %s970_s21 = smov [#allocation5]  }
   0xb   : > { %s1335_s18 = scalar_select %p1027_p4, 1, 0 }
   0xc   : > { %s1336_s19 = scalar_select %p1032_p6, 1, 0 }
   0xd   : > { %p1037_p8 = pnand %p633_p5, %p119_p7  ;;  %s131_s22 = sshll.u32 %s970_s21, 4  ;;  %s1041_s22 = int_to_ptr.vmem [resolvable:$true] %s131_s22 }
   0xe   : > { %s1053_s24 = sadd.s32 1, %s968_s15   ;;  %s27_s25 = sadd.s32 1, %s964_s14 }
   0xf   : > { %s1337_s20 = scalar_select %p1037_p8, 1, 0 }
  0x10   : > { %p723_p9 = pneg %p1037_p8  ;;  %s24_s26 = ssub.s32 %s968_s15, %s1053_s24 }
  0x11   : > { %s840_s29 = scalar_lea.hbm %s1329_s1, 2048 }
  0x12   : > { %p1048_p11 = pnand %p723_p9, %p1332_p1  ;;  %p841_p12 = scmp.ne.s32.totalorder %s1329_s1, %s840_s29 }
  0x13   : > { %p847_p5 = scmp.lt.u32.totalorder %s840_s29, %s1329_s1 }
  0x14   : > { %p842_p13 = pneg %p1048_p11 }
  0x16   : > { %p843_p0 = pnand %p842_p13, %p841_p12 }
  0x18   : > { %p844_p3 = pneg %p843_p0 }
  0x1a   : > { %p849_p7 = pnand %p847_p5, %p844_p3 }
  0x1c   : > { %852 = shalt.err (!%p849_p7)
}
  0x1d   : > { %s853_s7 = scalar_lea.vmem %s1041_s22, 2048  ;;  %p861_p2 = scmp.lt.s32.totalorder %s1041_s22, %s1041_s22 }
  0x1e   : > { %p854_p9 = scmp.ne.s32.totalorder %s1041_s22, %s853_s7  ;;  %p862_p6 = scmp.lt.s32.totalorder %s853_s7, %s853_s7 }
  0x20   : > { %p856_p10 = pnand %p854_p9, %p842_p13  ;;  %p863_p4 = por %p862_p6, %p861_p2 }
  0x22   : > { %p857_p1 = pneg %p856_p10 }
  0x24   : > { %p864_p8 = pnand %p863_p4, %p857_p1 }
  0x26   : > { %867 = shalt.err (!%p864_p8)
}
  0x27   : > { %s971_s8 = smov 128   ;;  %s972_s9 = smov 8  }
  0x28   : > { %726 = dma.hbm_to_vmem [thread:$0]  (!%p1048_p11), %s1329_s1, 2048, %s1041_s22, [#allocation6], %s971_s8, %s971_s8, %s972_s9  }
  0x29   : > { %p25_p1 = scmp.eq.s32.totalorder %s24_s26, 0  ;;  %p34_p2 = scmp.ne.s32.totalorder %s964_s14, %s960_s13 }
  0x2a   : > { %p35_p4 = scmp.eq.s32.totalorder %s968_s15, 0  ;;  %p736_p6 = scmp.lt.s32.totalorder %s968_s15, 2 }
  0x2b   : > { %s1087_s17 = scalar_select %p25_p1, %s964_s14, %s27_s25  }
  0x2c   : > { %p36_p8 = por %p35_p4, %p34_p2  ;;  %p1339_p10 = scmp.eq.s32.totalorder %s1018_s16, 1 }
  0x2d   : > { %s148_s23 = sand.u32 1, %s964_s14   ;;  %s649_s27 = sshll.u32 %s968_s15, 11 }
  0x2e   : > { %p1091_p12 = por %p1339_p10, %p34_p2  ;;  %s636_s28 = sshll.u32 %s148_s23, 7 }
  0x2f   : > { %s1100_s4 = scalar_lea.hbm %s1328_s0, %s649_s27  ;;  %s152_s22 = scalar_lea.vmem [#allocation2], %s636_s28 }
  0x30   : > { %s159_s25 = sshll.u32 %s152_s22, 4  ;;  %p1102_p11 = pnand %p736_p6, %p36_p8  ;;  %s1106_s25 = int_to_ptr.vmem [resolvable:$true] %s159_s25 }
  0x31   : > { %s1108_s5 = scalar_lea.sflag [#allocation3], %s148_s23  ;;  %s868_s6 = scalar_lea.hbm %s1100_s4, 2048 }
  0x32   : > { %p869_p13 = scmp.ne.s32.totalorder %s1100_s4, %s868_s6  ;;  %p870_p0 = pneg %p1102_p11 }
  0x33   : > { %s873_s11 = scalar_lea.hbm %s1328_s0, 4096  ;;  %p874_p7 = scmp.lt.u32.totalorder %s1100_s4, %s1328_s0 }
  0x34   : > { %p871_p3 = pnand %p870_p0, %p869_p13  ;;  %p875_p9 = scmp.lt.u32.totalorder %s873_s11, %s868_s6 }
  0x35   : > { %p877_p2 = scmp.lt.u32.totalorder %s868_s6, %s1100_s4 }
  0x36   : > { %p872_p5 = pneg %p871_p3  ;;  %p876_p1 = por %p875_p9, %p874_p7 }
  0x38   : > { %p878_p4 = por %p877_p2, %p876_p1 }
  0x3a   : > { %p879_p6 = pnand %p878_p4, %p872_p5 }
  0x3c   : > { %882 = shalt.err (!%p879_p6)
}
  0x3d   : > { %s883_s23 = scalar_lea.vmem %s1106_s25, 2048  ;;  %s973_s29 = smov [#allocation2]  }
  0x3e   : > { %p884_p8 = scmp.ne.s32.totalorder %s1106_s25, %s883_s23  ;;  %s888_s30 = sshll.u32 %s973_s29, 4  ;;  %s889_s30 = int_to_ptr.vmem [resolvable:$false] %s888_s30 }
  0x3f   : > { %s890_s22 = scalar_lea.vmem %s889_s30, 4096  ;;  %p891_p3 = scmp.lt.s32.totalorder %s1106_s25, %s889_s30 }
  0x40   : > { %p886_p10 = pnand %p884_p8, %p870_p0  ;;  %p892_p7 = scmp.lt.s32.totalorder %s890_s22, %s883_s23 }
  0x42   : > { %p887_p13 = pneg %p886_p10  ;;  %p893_p9 = por %p892_p7, %p891_p3 }
  0x44   : > { %p894_p1 = pnand %p893_p9, %p887_p13 }
  0x46   : > { %897 = shalt.err (!%p894_p1)
}
  0x47   : > { %730 = dma.hbm_to_vmem [thread:$0]  (!%p1102_p11), %s1100_s4, 2048, %s1106_s25, %s1108_s5, %s971_s8, %s971_s8, %s972_s9  }
  0x48   : > { %p1342_p0 = scmp.ne.s32.totalorder %s1337_s20, 0 }
  0x49   : > { %s1142_s6 = sand.u32 (!%p1342_p0), 1, %s960_s13   ;;  %p1343_p5 = scmp.ne.s32.totalorder (!%p1342_p0), %s1335_s18, 0 }
  0x4a   : > { %171 = sbr.rel (%p1342_p0) target bundleno = 695 (0x2b7), region = 32  ;;  %s640_s7 = sshll.u32 (!%p1342_p0), %s1142_s6, 7 }
  0x4b   : > { %s174_s10 = scalar_lea.sflag (!%p1342_p0), [#allocation3], %s1142_s6  ;;  %s1148_s26 = scalar_lea.vmem (!%p1342_p0), [#allocation2], %s640_s7 }
  0x51   : > { %943 = dma.done.wait (%p1343_p5), %s174_s10, 2048  }
  0x52   : > { %945 = vsyncadd (%p1343_p5), %s174_s10, 4294965248  ;;  %p1344_p11 = scmp.eq.s32.totalorder %s1018_s16, 0 }
  0x54   : > { %947 = dma.done.wait (%p1344_p11), [#allocation6], 2048   ;;  %p1345_p2 = pmov %p1344_p11 }
  0x55   : > { %v231_v0 = vld [vmem:[#allocation5] sm:$0xff]  ;;  %v232_v1 = vld [vmem:[#allocation5 + $0x8] sm:$0xff]  ;;  %v233_v2 = vld [vmem:[#allocation5 + $0x10] sm:$0xff]  ;;  %s1244_s8 = scalar_lea.vmem [#allocation7], %s640_s7  ;;  %s650_s9 = sshll.u32 %s1018_s16, 11 }
  0x56   : > { %949 = vsyncadd (%p1345_p2), [#allocation6], 4294965248  ;;  %v247_v3 = vpack.c.bf16 %v232_v1, %v231_v0  ;;  %v234_v4 = vld [vmem:[#allocation5 + $0x18] sm:$0xff]  ;;  %v235_v6 = vld [vmem:[#allocation5 + $0x20] sm:$0xff]  ;;  %s549_s4 = sshll.u32 %s1244_s8, 4  ;;  %s1280_s11 = scalar_lea.hbm %s1331_s3, %s650_s9  ;;  %s1282_s4 = int_to_ptr.vmem [resolvable:$true] %s549_s4 }
  0x57   : > { %v248_v5 = vpack.c.bf16 %v234_v4, %v233_v2  ;;  %v236_v7 = vld [vmem:[#allocation5 + $0x28] sm:$0xff]  ;;  %v237_v9 = vld [vmem:[#allocation5 + $0x30] sm:$0xff]  ;;  %v207_v10 = vld [vmem:[%s1148_s26] sm:$0xff]  ;;  %s536_s16 = scalar_lea.sflag [#allocation4], %s1142_s6  ;;  %s898_s27 = scalar_lea.vmem %s1282_s4, 2048 }
  0x58   : > { %667 = vmatprep.subr.bf16.mxu0 %v247_v3  ;;  %699 = vmatprep.subr.bf16.mxu1 %v247_v3  ;;  %v249_v8 = vpack.c.bf16 %v236_v7, %v235_v6  ;;  %v208_v11 = vld [vmem:[%s1148_s26 + $0x8] sm:$0xff]  ;;  %v238_v12 = vld [vmem:[#allocation5 + $0x38] sm:$0xff]  ;;  %v215_v14 = vld [vmem:[%s1148_s26 + $0x40] sm:$0xff]  ;;  %p899_p4 = scmp.ne.s32.totalorder %s1282_s4, %s898_s27  ;;  %s974_s28 = smov [#allocation7]  }
  0x59   : > { %668 = vmatpush3.bf16.msra.mxu0 %v247_v3  ;;  %707 = vmatpush3.bf16.msra.mxu1 %v247_v3  ;;  %v223_v13 = vpack.c.bf16 %v208_v11, %v207_v10  ;;  %v216_v15 = vld [vmem:[%s1148_s26 + $0x48] sm:$0xff]  ;;  %v250_v17 = vpack.c.bf16 %v238_v12, %v237_v9  ;;  %v239_v18 = vld [vmem:[#allocation5 + $0x40] sm:$0xff]  ;;  %v241_v21 = vld [vmem:[#allocation5 + $0x50] sm:$0xff]  ;;  %s902_s23 = sshll.u32 %s974_s28, 4  ;;  %s903_s23 = int_to_ptr.vmem [resolvable:$false] %s902_s23 }
  0x5a   : > { %669 = vmatprep.subr.bf16.mxu0 %v248_v5  ;;  %700 = vmatprep.subr.bf16.mxu1 %v248_v5  ;;  %v227_v16 = vpack.c.bf16 %v216_v15, %v215_v14  ;;  %v240_v19 = vld [vmem:[#allocation5 + $0x48] sm:$0xff]  ;;  %v242_v22 = vld [vmem:[#allocation5 + $0x58] sm:$0xff]  ;;  %v243_v24 = vld [vmem:[#allocation5 + $0x60] sm:$0xff]  ;;  %p900_p6 = pnand %p899_p4, %p1091_p12  ;;  %s904_s29 = scalar_lea.vmem %s903_s23, 4096 }
  0x5b   : > { %683 = vmatprep.mubr.bf16.mxu0 %v223_v13  ;;  %v251_v20 = vpack.c.bf16 %v240_v19, %v239_v18  ;;  %v252_v23 = vpack.c.bf16 %v242_v22, %v241_v21  ;;  %v244_v25 = vld [vmem:[#allocation5 + $0x68] sm:$0xff]  ;;  %v245_v27 = vld [vmem:[#allocation5 + $0x70] sm:$0xff]  ;;  %v246_v28 = vld [vmem:[#allocation5 + $0x78] sm:$0xff]  ;;  %p905_p10 = scmp.lt.s32.totalorder %s1282_s4, %s903_s23  ;;  %p906_p13 = scmp.lt.s32.totalorder %s904_s29, %s898_s27 }
  0x5c   : > { %691 = vmatprep.mubr.bf16.mxu1 %v227_v16  ;;  %v253_v26 = vpack.c.bf16 %v244_v25, %v243_v24  ;;  %v254_v29 = vpack.c.bf16 %v246_v28, %v245_v27  ;;  %v209_v30 = vld [vmem:[%s1148_s26 + $0x10] sm:$0xff]  ;;  %v210_v31 = vld [vmem:[%s1148_s26 + $0x18] sm:$0xff]  ;;  %v211_v34 = vld [vmem:[%s1148_s26 + $0x20] sm:$0xff]  ;;  %p901_p8 = pneg %p900_p6 }
  0x5d   : > { %670 = vmatpush3.bf16.msra.mxu0 %v248_v5  ;;  %708 = vmatpush3.bf16.msra.mxu1 %v248_v5  ;;  %v217_v32 = vld [vmem:[%s1148_s26 + $0x50] sm:$0xff]  ;;  %v218_v33 = vld [vmem:[%s1148_s26 + $0x58] sm:$0xff]  ;;  %v212_v35 = vld [vmem:[%s1148_s26 + $0x28] sm:$0xff]  ;;  %v224_v38 = vpack.c.bf16 %v210_v31, %v209_v30  ;;  %p907_p3 = por %p906_p13, %p905_p10 }
  0x5e   : > { %671 = vmatprep.subr.bf16.mxu0 %v249_v8  ;;  %701 = vmatprep.subr.bf16.mxu1 %v249_v8  ;;  %v219_v36 = vld [vmem:[%s1148_s26 + $0x60] sm:$0xff]  ;;  %v220_v37 = vld [vmem:[%s1148_s26 + $0x68] sm:$0xff]  ;;  %v228_v39 = vpack.c.bf16 %v218_v33, %v217_v32  ;;  %v225_v40 = vpack.c.bf16 %v212_v35, %v211_v34  ;;  %v213_v42 = vld [vmem:[%s1148_s26 + $0x30] sm:$0xff] }
  0x5f   : > { %v229_v41 = vpack.c.bf16 %v220_v37, %v219_v36  ;;  %v214_v43 = vld [vmem:[%s1148_s26 + $0x38] sm:$0xff]  ;;  %v221_v44 = vld [vmem:[%s1148_s26 + $0x70] sm:$0xff]  ;;  %v643_v48 = vld [vmem:[%s1330_s2] ss:$0 sm:$0xff]  ;;  %p908_p7 = pnand %p907_p3, %p901_p8 }
  0x60   : > { %v222_v45 = vld [vmem:[%s1148_s26 + $0x78] sm:$0xff]  ;;  %v226_v46 = vpack.c.bf16 %v214_v43, %v213_v42 }
  0x61   : > { %672 = vmatpush3.bf16.msra.mxu0 %v249_v8  ;;  %709 = vmatpush3.bf16.msra.mxu1 %v249_v8  ;;  %v230_v47 = vpack.c.bf16 %v222_v45, %v221_v44 }
  0x62   : > { %673 = vmatprep.subr.bf16.mxu0 %v250_v17  ;;  %702 = vmatprep.subr.bf16.mxu1 %v250_v17 }
  0x65   : > { %674 = vmatpush3.bf16.msra.mxu0 %v250_v17  ;;  %710 = vmatpush3.bf16.msra.mxu1 %v250_v17 }
  0x66   : > { %675 = vmatprep.subr.bf16.mxu0 %v251_v20  ;;  %703 = vmatprep.subr.bf16.mxu1 %v251_v20 }
  0x69   : > { %676 = vmatpush3.bf16.msra.mxu0 %v251_v20  ;;  %711 = vmatpush3.bf16.msra.mxu1 %v251_v20 }
  0x6a   : > { %677 = vmatprep.subr.bf16.mxu0 %v252_v23  ;;  %704 = vmatprep.subr.bf16.mxu1 %v252_v23 }
  0x6d   : > { %678 = vmatpush3.bf16.msra.mxu0 %v252_v23  ;;  %712 = vmatpush3.bf16.msra.mxu1 %v252_v23 }
  0x6e   : > { %679 = vmatprep.subr.bf16.mxu0 %v253_v26  ;;  %705 = vmatprep.subr.bf16.mxu1 %v253_v26 }
  0x71   : > { %680 = vmatpush3.bf16.msra.mxu0 %v253_v26  ;;  %713 = vmatpush3.bf16.msra.mxu1 %v253_v26 }
  0x72   : > { %681 = vmatprep.subr.bf16.mxu0 %v254_v29  ;;  %706 = vmatprep.subr.bf16.mxu1 %v254_v29 }
  0x75   : > { %682 = vmatpush3.bf16.msra.mxu0 %v254_v29  ;;  %714 = vmatpush3.bf16.msra.mxu1 %v254_v29 }
  0x78   : > { %684 = vmatmul.mubr.bf16.vlgmr.msra.gmra.mrb[0].mxu0 %v224_v38  ;;  %692 = vmatmul.mubr.bf16.vlgmr.msra.gmra.mrb[0].mxu1 %v228_v39 }
  0x79   : > { %687 = vmatprep.mubr.bf16.mxu0 %v225_v40  ;;  %695 = vmatprep.mubr.bf16.mxu1 %v229_v41 }
  0x80   : > { %688 = vmatmul.mubr.bf16.gmra.mrb[4].mxu0 %v226_v46  ;;  %696 = vmatmul.mubr.bf16.gmra.mrb[4].mxu1 %v230_v47 }
 0x14b   : > { %v685_v49 = vpop.f32.mrb[0].mxu0  ;;  %v693_v50 = vpop.f32.mrb[0].mxu1 }
 0x14c   : > { %v305_v51 = vadd.f32 %v685_v49, %v643_v48  ;;  %v337_v52 = vadd.f32 %v693_v50, %v643_v48  ;;  %v296_v53 = vpop.f32.mrb[1].mxu0  ;;  %v328_v54 = vpop.f32.mrb[1].mxu1 }
 0x14d   : > { %v686_v55 = vpop.f32.mrb[2].mxu0  ;;  %v694_v56 = vpop.f32.mrb[2].mxu1  ;;  %v297_v59 = vadd.f32 %v643_v48, %v296_v53  ;;  %v329_v63 = vadd.f32 %v643_v48, %v328_v54 }
 0x14e   : > { %379 = vmax.xlane.f32.xlu0 %v337_v52  ;;  %v331_v57 = vpop.f32.mrb[3].mxu1  ;;  %363 = vmax.xlane.f32.xlu1 %v305_v51  ;;  %v299_v58 = vpop.f32.mrb[3].mxu0  ;;  %v308_v60 = vadd.f32 %v686_v55, %v643_v48  ;;  %v340_v0 = vadd.f32 %v694_v56, %v643_v48 }
 0x14f   : > { %v332_v7 = vadd.f32 %v643_v48, %v331_v57  ;;  %v300_v8 = vadd.f32 %v643_v48, %v299_v58 }
 0x152   : > { %365 = vmax.xlane.f32.xlu1 %v308_v60  ;;  %359 = vmax.xlane.f32.xlu0 %v297_v59 }
 0x153   : > { %v689_v61 = vpop.f32.mrb[4].mxu0  ;;  %v697_v62 = vpop.f32.mrb[4].mxu1 }
 0x154   : > { %v312_v1 = vpop.f32.mrb[5].mxu0  ;;  %v344_v2 = vpop.f32.mrb[5].mxu1  ;;  %v321_v9 = vadd.f32 %v689_v61, %v643_v48  ;;  %v1183_v15 = vadd.f32 %v697_v62, %v643_v48 }
 0x155   : > { %v690_v3 = vpop.f32.mrb[6].mxu0  ;;  %v698_v4 = vpop.f32.mrb[6].mxu1  ;;  %v313_v11 = vadd.f32 %v643_v48, %v312_v1  ;;  %v1177_v13 = vadd.f32 %v643_v48, %v344_v2 }
 0x156   : > { %381 = vmax.xlane.f32.xlu1 %v340_v0  ;;  %375 = vmax.xlane.f32.xlu0 %v329_v63  ;;  %v315_v5 = vpop.f32.mrb[7].mxu0  ;;  %v347_v6 = vpop.f32.mrb[7].mxu1  ;;  %v324_v10 = vadd.f32 %v690_v3, %v643_v48  ;;  %v1185_v16 = vadd.f32 %v698_v4, %v643_v48 }
 0x157   : > { %v316_v12 = vadd.f32 %v643_v48, %v315_v5  ;;  %v1179_v14 = vadd.f32 %v643_v48, %v347_v6 }
 0x15a   : > { %377 = vmax.xlane.f32.xlu1 %v332_v7  ;;  %361 = vmax.xlane.f32.xlu0 %v300_v8 }
 0x15e   : > { %373 = vmax.xlane.f32.xlu1 %v324_v10  ;;  %371 = vmax.xlane.f32.xlu0 %v321_v9 }
 0x162   : > { %369 = vmax.xlane.f32.xlu1 %v316_v12  ;;  %367 = vmax.xlane.f32.xlu0 %v313_v11 }
 0x166   : > { %385 = vmax.xlane.f32.xlu1 %v1179_v14  ;;  %383 = vmax.xlane.f32.xlu0 %v1177_v13 }
 0x16a   : > { %389 = vmax.xlane.f32.xlu1 %v1185_v16  ;;  %387 = vmax.xlane.f32.xlu0 %v1183_v15 }
 0x1db   : > { %v380_v17 = vpop.xlane.xlu0 %379  ;;  %v364_v18 = vpop.xlane.xlu1 %363 }
 0x1dc   : > { %v1189_v19 = vsub.f32 %v305_v51, %v364_v18  ;;  %v1191_v20 = vsub.f32 %v337_v52, %v380_v17 }
 0x1de   : > { %v411_v21 = vmul.f32 1.442695, %v1189_v19  ;;  %v427_v25 = vmul.f32 1.442695, %v1191_v20 }
 0x1df   : > { %v366_v22 = vpop.xlane.xlu1 %365  ;;  %v360_v23 = vpop.xlane.xlu0 %359 }
 0x1e0   : > { %v1194_v24 = vsub.f32 %v308_v60, %v366_v22  ;;  %776 = vpow2.f32 %v411_v21  ;;  %v1197_v26 = vsub.f32 %v297_v59, %v360_v23 }
 0x1e2   : > { %v413_v27 = vmul.f32 1.442695, %v1194_v24  ;;  %v407_v32 = vmul.f32 1.442695, %v1197_v26 }
 0x1e3   : > { %v382_v28 = vpop.xlane.xlu1 %381  ;;  %v376_v29 = vpop.xlane.xlu0 %375 }
 0x1e4   : > { %778 = vpow2.f32 %v413_v27  ;;  %v1200_v30 = vsub.f32 %v340_v0, %v382_v28  ;;  %v1202_v31 = vsub.f32 %v329_v63, %v376_v29 }
 0x1e5   : > { %780 = vpow2.f32 %v427_v25 }
 0x1e6   : > { %v429_v33 = vmul.f32 1.442695, %v1200_v30  ;;  %v423_v36 = vmul.f32 1.442695, %v1202_v31 }
 0x1e7   : > { %v378_v34 = vpop.xlane.xlu1 %377  ;;  %v362_v35 = vpop.xlane.xlu0 %361 }
 0x1e8   : > { %782 = vpow2.f32 %v429_v33  ;;  %v1207_v37 = vsub.f32 %v332_v7, %v378_v34  ;;  %v1209_v38 = vsub.f32 %v300_v8, %v362_v35 }
 0x1e9   : > { %784 = vpow2.f32 %v407_v32 }
 0x1ea   : > { %v409_v39 = vmul.f32 1.442695, %v1209_v38  ;;  %v777_v40 = vpop.eup %776  ;;  %786 = vpow2.f32 %v423_v36  ;;  %v425_v43 = vmul.f32 1.442695, %v1207_v37 }
 0x1eb   : > { %v374_v41 = vpop.xlane.xlu1 %373  ;;  %v372_v42 = vpop.xlane.xlu0 %371  ;;  %443 = vadd.xlane.f32.xlu0 %v777_v40 }
 0x1ec   : > { %v1213_v44 = vsub.f32 %v324_v10, %v374_v41  ;;  %v1215_v45 = vsub.f32 %v321_v9, %v372_v42  ;;  %788 = vpow2.f32 %v409_v39 }
 0x1ed   : > { %790 = vpow2.f32 %v425_v43 }
 0x1ee   : > { %v779_v46 = vpop.eup %778  ;;  %v419_v47 = vmul.f32 1.442695, %v1215_v45  ;;  %v421_v51 = vmul.f32 1.442695, %v1213_v44 }
 0x1ef   : > { %v781_v48 = vpop.eup %780  ;;  %445 = vadd.xlane.f32.xlu1 %v779_v46  ;;  %v370_v49 = vpop.xlane.xlu1 %369 }
 0x1f0   : > { %v368_v50 = vpop.xlane.xlu0 %367  ;;  %v1219_v52 = vsub.f32 %v316_v12, %v370_v49  ;;  %459 = vadd.xlane.f32.xlu0 %v781_v48  ;;  %792 = vpow2.f32 %v419_v47 }
 0x1f1   : > { %v1221_v53 = vsub.f32 %v313_v11, %v368_v50  ;;  %794 = vpow2.f32 %v421_v51 }
 0x1f2   : > { %v783_v54 = vpop.eup %782  ;;  %v417_v59 = vmul.f32 1.442695, %v1219_v52 }
 0x1f3   : > { %v415_v55 = vmul.f32 1.442695, %v1221_v53  ;;  %v785_v56 = vpop.eup %784  ;;  %461 = vadd.xlane.f32.xlu1 %v783_v54  ;;  %v386_v57 = vpop.xlane.xlu1 %385 }
 0x1f4   : > { %v384_v58 = vpop.xlane.xlu0 %383  ;;  %v1226_v60 = vsub.f32 %v1179_v14, %v386_v57  ;;  %439 = vadd.xlane.f32.xlu0 %v785_v56  ;;  %v787_v62 = vpop.eup %786 }
 0x1f5   : > { %v1229_v61 = vsub.f32 %v1177_v13, %v384_v58  ;;  %796 = vpow2.f32 %v415_v55 }
 0x1f6   : > { %v789_v0 = vpop.eup %788  ;;  %798 = vpow2.f32 %v417_v59  ;;  %v433_v3 = vmul.f32 1.442695, %v1226_v60 }
 0x1f7   : > { %v431_v63 = vmul.f32 1.442695, %v1229_v61  ;;  %v390_v1 = vpop.xlane.xlu1 %389  ;;  %441 = vadd.xlane.f32.xlu1 %v789_v0  ;;  %v791_v6 = vpop.eup %790 }
 0x1f8   : > { %v388_v2 = vpop.xlane.xlu0 %387  ;;  %455 = vadd.xlane.f32.xlu0 %v787_v62  ;;  %v1237_v5 = vsub.f32 %v1185_v16, %v390_v1 }
 0x1f9   : > { %v1234_v4 = vsub.f32 %v1183_v15, %v388_v2  ;;  %800 = vpow2.f32 %v431_v63 }
 0x1fa   : > { %v793_v8 = vpop.eup %792  ;;  %802 = vpow2.f32 %v433_v3  ;;  %v437_v9 = vmul.f32 1.442695, %v1237_v5 }
 0x1fb   : > { %v435_v7 = vmul.f32 1.442695, %v1234_v4  ;;  %457 = vadd.xlane.f32.xlu1 %v791_v6  ;;  %v795_v10 = vpop.eup %794 }
 0x1fc   : > { %451 = vadd.xlane.f32.xlu0 %v793_v8 }
 0x1fd   : > { %804 = vpow2.f32 %v435_v7 }
 0x1fe   : > { %806 = vpow2.f32 %v437_v9 }
 0x1ff   : > { %v797_v11 = vpop.eup %796  ;;  %453 = vadd.xlane.f32.xlu1 %v795_v10 }
 0x200   : > { %447 = vadd.xlane.f32.xlu0 %v797_v11  ;;  %v799_v12 = vpop.eup %798 }
 0x203   : > { %v801_v13 = vpop.eup %800  ;;  %449 = vadd.xlane.f32.xlu1 %v799_v12 }
 0x204   : > { %463 = vadd.xlane.f32.xlu0 %v801_v13  ;;  %v803_v14 = vpop.eup %802 }
 0x207   : > { %v805_v15 = vpop.eup %804  ;;  %465 = vadd.xlane.f32.xlu1 %v803_v14 }
 0x208   : > { %467 = vadd.xlane.f32.xlu0 %v805_v15  ;;  %v807_v16 = vpop.eup %806 }
 0x20b   : > { %469 = vadd.xlane.f32.xlu1 %v807_v16 }
 0x278   : > { %v444_v17 = vpop.xlane.xlu0 %443 }
 0x279   : > { %808 = vlog2.f32 %v444_v17 }
 0x27c   : > { %v446_v18 = vpop.xlane.xlu1 %445 }
 0x27d   : > { %810 = vlog2.f32 %v446_v18  ;;  %v460_v21 = vpop.xlane.xlu0 %459 }
 0x27e   : > { %812 = vlog2.f32 %v460_v21 }
 0x280   : > { %v462_v22 = vpop.xlane.xlu1 %461 }
 0x281   : > { %814 = vlog2.f32 %v462_v22  ;;  %v440_v23 = vpop.xlane.xlu0 %439 }
 0x282   : > { %816 = vlog2.f32 %v440_v23 }
 0x283   : > { %v809_v25 = vpop.eup %808 }
 0x284   : > { %v476_v27 = vmul.f32 0.6931472, %v809_v25  ;;  %v442_v28 = vpop.xlane.xlu1 %441 }
 0x285   : > { %v456_v29 = vpop.xlane.xlu0 %455  ;;  %818 = vlog2.f32 %v442_v28 }
 0x286   : > { %v505_v33 = vsub.f32 %v1189_v19, %v476_v27  ;;  %820 = vlog2.f32 %v456_v29 }
 0x287   : > { %v811_v32 = vpop.eup %810 }
 0x288   : > { %v813_v34 = vpop.eup %812  ;;  %v478_v35 = vmul.f32 0.6931472, %v811_v32  ;;  %521 = vst [vmem:[%s1244_s8 + $0x10] sm:$0xff] %v505_v33  ;;  %v458_v39 = vpop.xlane.xlu1 %457 }
 0x289   : > { %v492_v36 = vmul.f32 0.6931472, %v813_v34  ;;  %v452_v40 = vpop.xlane.xlu0 %451  ;;  %822 = vlog2.f32 %v458_v39 }
 0x28a   : > { %v506_v41 = vsub.f32 %v1194_v24, %v478_v35  ;;  %824 = vlog2.f32 %v452_v40 }
 0x28b   : > { %v815_v42 = vpop.eup %814  ;;  %v513_v19 = vsub.f32 %v1191_v20, %v492_v36 }
 0x28c   : > { %v817_v43 = vpop.eup %816  ;;  %522 = vst [vmem:[%s1244_s8 + $0x18] sm:$0xff] %v506_v41  ;;  %v494_v46 = vmul.f32 0.6931472, %v815_v42  ;;  %v454_v48 = vpop.xlane.xlu1 %453 }
 0x28d   : > { %529 = vst [vmem:[%s1244_s8 + $0x50] sm:$0xff] %v513_v19  ;;  %v472_v47 = vmul.f32 0.6931472, %v817_v43  ;;  %v448_v49 = vpop.xlane.xlu0 %447  ;;  %826 = vlog2.f32 %v454_v48 }
 0x28e   : > { %v514_v50 = vsub.f32 %v1200_v30, %v494_v46  ;;  %828 = vlog2.f32 %v448_v49 }
 0x28f   : > { %v503_v51 = vsub.f32 %v1197_v26, %v472_v47  ;;  %v819_v24 = vpop.eup %818 }
 0x290   : > { %530 = vst [vmem:[%s1244_s8 + $0x58] sm:$0xff] %v514_v50  ;;  %v821_v54 = vpop.eup %820  ;;  %v474_v20 = vmul.f32 0.6931472, %v819_v24  ;;  %v450_v55 = vpop.xlane.xlu1 %449 }
 0x291   : > { %519 = vst [vmem:[%s1244_s8] sm:$0xff] %v503_v51  ;;  %v464_v56 = vpop.xlane.xlu0 %463  ;;  %v488_v57 = vmul.f32 0.6931472, %v821_v54  ;;  %830 = vlog2.f32 %v450_v55 }
 0x292   : > { %v504_v58 = vsub.f32 %v1209_v38, %v474_v20  ;;  %832 = vlog2.f32 %v464_v56 }
 0x293   : > { %v823_v30 = vpop.eup %822  ;;  %v511_v59 = vsub.f32 %v1202_v31, %v488_v57 }
 0x294   : > { %v825_v26 = vpop.eup %824  ;;  %520 = vst [vmem:[%s1244_s8 + $0x8] sm:$0xff] %v504_v58  ;;  %v490_v62 = vmul.f32 0.6931472, %v823_v30  ;;  %v466_v63 = vpop.xlane.xlu1 %465 }
 0x295   : > { %v468_v0 = vpop.xlane.xlu0 %467  ;;  %527 = vst [vmem:[%s1244_s8 + $0x40] sm:$0xff] %v511_v59  ;;  %v484_v1 = vmul.f32 0.6931472, %v825_v26  ;;  %834 = vlog2.f32 %v466_v63 }
 0x296   : > { %v512_v2 = vsub.f32 %v1207_v37, %v490_v62  ;;  %836 = vlog2.f32 %v468_v0 }
 0x297   : > { %v827_v38 = vpop.eup %826  ;;  %v509_v3 = vsub.f32 %v1215_v45, %v484_v1 }
 0x298   : > { %v829_v6 = vpop.eup %828  ;;  %528 = vst [vmem:[%s1244_s8 + $0x48] sm:$0xff] %v512_v2  ;;  %v486_v31 = vmul.f32 0.6931472, %v827_v38  ;;  %v470_v7 = vpop.xlane.xlu1 %469 }
 0x299   : > { %525 = vst [vmem:[%s1244_s8 + $0x30] sm:$0xff] %v509_v3  ;;  %v480_v8 = vmul.f32 0.6931472, %v829_v6  ;;  %838 = vlog2.f32 %v470_v7 }
 0x29a   : > { %v510_v9 = vsub.f32 %v1213_v44, %v486_v31 }
 0x29b   : > { %v831_v10 = vpop.eup %830  ;;  %v507_v37 = vsub.f32 %v1221_v53, %v480_v8 }
 0x29c   : > { %v833_v11 = vpop.eup %832  ;;  %526 = vst [vmem:[%s1244_s8 + $0x38] sm:$0xff] %v510_v9  ;;  %v482_v12 = vmul.f32 0.6931472, %v831_v10 }
 0x29d   : > { %523 = vst [vmem:[%s1244_s8 + $0x20] sm:$0xff] %v507_v37  ;;  %v496_v45 = vmul.f32 0.6931472, %v833_v11 }
 0x29e   : > { %v508_v13 = vsub.f32 %v1219_v52, %v482_v12 }
 0x29f   : > { %v835_v14 = vpop.eup %834  ;;  %v515_v15 = vsub.f32 %v1229_v61, %v496_v45 }
 0x2a0   : > { %v837_v16 = vpop.eup %836  ;;  %524 = vst [vmem:[%s1244_s8 + $0x28] sm:$0xff] %v508_v13  ;;  %v498_v44 = vmul.f32 0.6931472, %v835_v14 }
 0x2a1   : > { %531 = vst [vmem:[%s1244_s8 + $0x60] sm:$0xff] %v515_v15  ;;  %v500_v53 = vmul.f32 0.6931472, %v837_v16 }
 0x2a2   : > { %v516_v17 = vsub.f32 %v1226_v60, %v498_v44 }
 0x2a3   : > { %v839_v18 = vpop.eup %838  ;;  %v517_v21 = vsub.f32 %v1234_v4, %v500_v53 }
 0x2a4   : > { %532 = vst [vmem:[%s1244_s8 + $0x68] sm:$0xff] %v516_v17  ;;  %v502_v52 = vmul.f32 0.6931472, %v839_v18 }
 0x2a5   : > { %533 = vst [vmem:[%s1244_s8 + $0x70] sm:$0xff] %v517_v21 }
 0x2a6   : > { %v518_v60 = vsub.f32 %v1237_v5, %v502_v52 }
 0x2a8   : > { %534 = vst [vmem:[%s1244_s8 + $0x78] sm:$0xff] %v518_v60 }
 0x2a9   : > { %911 = shalt.err (!%p908_p7)
}
 0x2aa   : > { %s912_s30 = scalar_lea.hbm %s1280_s11, 2048  ;;  %s916_s10 = scalar_lea.hbm %s1331_s3, 4096 }
 0x2ab   : > { %p913_p9 = scmp.ne.s32.totalorder %s1280_s11, %s912_s30  ;;  %p917_p5 = scmp.lt.u32.totalorder %s1280_s11, %s1331_s3 }
 0x2ac   : > { %p918_p11 = scmp.lt.u32.totalorder %s916_s10, %s912_s30  ;;  %p920_p4 = scmp.lt.u32.totalorder %s912_s30, %s1280_s11 }
 0x2ad   : > { %p914_p1 = pnand %p913_p9, %p1091_p12 }
 0x2ae   : > { %p919_p2 = por %p918_p11, %p917_p5 }
 0x2af   : > { %p915_p0 = pneg %p914_p1 }
 0x2b0   : > { %p921_p6 = por %p920_p4, %p919_p2 }
 0x2b2   : > { %p922_p8 = pnand %p921_p6, %p915_p0 }
 0x2b4   : > { %925 = shalt.err (!%p922_p8)
}
 0x2b5   : > { %s975_s20 = smov 128   ;;  %s976_s8 = smov 8  }
 0x2b6   : > { %721 = dma.vmem_to_hbm [thread:$0]  (%p1091_p12), %s1282_s4, 2048, %s1280_s11, %s536_s16, %s975_s20, %s975_s20, %s976_s8  }
 0x2b7 PF: > { %s564_s9 = sand.u32 1, %s956_s12   ;;  %p1346_p10 = scmp.ne.s32.totalorder %s1336_s19, 0 }
 0x2b8   : > { %p1347_p13 = scmp.ge.s32.totalorder %s968_s15, 2  ;;  %s565_s25 = scalar_lea.sflag [#allocation4], %s564_s9 }
 0x2ba   : > { %p732_p3 = pnand %p1347_p13, %p1346_p10 }
 0x2bc   : > { %951 = dma.done.wait (!%p732_p3), %s565_s25, 2048  }
 0x2bd   : > { %953 = vsyncadd (!%p732_p3), %s565_s25, 4294965248  ;;  %p17_p7 = scmp.ge.s32.totalorder %s1053_s24, 4   ;;  %s1348_s12 = smov %s960_s13 }
 0x2be   : > { %s1349_s13 = smov %s964_s14  ;;  %s1350_s14 = smov %s1087_s17 }
 0x2bf   : > { %s1351_s15 = smov %s1053_s24  ;;  %19 = sbr.rel (!%p17_p7) target bundleno = 6 (0x6), region = 81 }
 0x2c6   :  { %570 = vsyncpa [#allocation3], 1 }
 0x2c7   :  { %572 = vsyncpa [#allocation3 + $0x1], 1 }
 0x2c8   :  { %573 = vsyncpa [#allocation6], 1 }
 0x2c9   :  { %574 = vsyncpa [#allocation4], 1 }
 0x2ca   :  { %576 = vsyncpa [#allocation4 + $0x1], 1 }

// kernel: agnnet_forward.4
= control target key start
LH: loop header
LB: loop body
LE: loop exit
PB: predicated region body
PF: predicated region fallthrough
CT: control target
= control target key end

     0   :  { %10 = vsyncpa [#allocation3], 0  ;;  %s1611_s0 = inlined_call_operand.hbm [shape: f32[256,128], index: 0, kind: input, shape index: {}]   ;;  %s1612_s1 = inlined_call_operand.hbm [shape: f32[128,128], index: 1, kind: input, shape index: {}]   ;;  %s1613_s2 = inlined_call_operand.vmem [shape: f32[1,128], index: 2, kind: input, shape index: {}]   ;;  %s1614_s3 = inlined_call_operand.hbm [shape: f32[256,128], index: 3, kind: output, shape index: {0}]   ;;  %s1615_s4 = inlined_call_operand.hbm [shape: bf16[256,128], index: 4, kind: output, shape index: {1}]  }
   0x1   :  { %12 = vsyncpa [#allocation3 + $0x1], 0 }
   0x2   :  { %13 = vsyncpa [#allocation6], 0 }
   0x3   :  { %14 = vsyncpa [#allocation4], 0 }
   0x4   :  { %16 = vsyncpa [#allocation4 + $0x1], 0 }
   0x5   :  { %17 = vsyncpa [#allocation9], 0 }
   0x6   :  { %19 = vsyncpa [#allocation9 + $0x1], 0  ;;  %s1220_s15 = smov 0   ;;  %s1222_s16 = smov 0  }
   0x7   :  { %s1224_s17 = smov 0   ;;  %s1226_s18 = smov 0  }
   0x8 LB: > { %s1241_s19 = sadd.s32 4294967295, %s1183_s18   ;;  %s756_s20 = sadd.s32 4294967294, %s1183_s18   ;;  %s1183_s18 = sphi %s1226_s18, %s1635_s18   ;;  %s1179_s17 = sphi %s1224_s17, %s1634_s17   ;;  %s1175_s16 = sphi %s1222_s16, %s1633_s16   ;;  %s1171_s15 = sphi %s1220_s15, %s1632_s15  }
   0x9   : > { %p45_p0 = scmp.ne.s32.totalorder %s1175_s16, %s1171_s15  ;;  %p1616_p1 = scmp.eq.s32.totalorder %s1241_s19, 0 }
   0xa   : > { %p117_p3 = scmp.eq.s32.totalorder %s756_s20, 1  ;;  %p757_p5 = scmp.ge.s32.totalorder %s1183_s18, 1 }
   0xb   : > { %p1250_p4 = por %p1616_p1, %p45_p0  ;;  %p150_p7 = scmp.lt.s32.totalorder %s1183_s18, 3 }
   0xc   : > { %p1255_p6 = por %p117_p3, %p45_p0  ;;  %s1185_s24 = smov [#allocation5]  }
   0xd   : > { %s1619_s21 = scalar_select %p1250_p4, 1, 0 }
   0xe   : > { %s1620_s22 = scalar_select %p1255_p6, 1, 0 }
   0xf   : > { %p1260_p8 = pnand %p757_p5, %p150_p7  ;;  %s162_s25 = sshll.u32 %s1185_s24, 4  ;;  %s1264_s25 = int_to_ptr.vmem [resolvable:$true] %s162_s25 }
  0x10   : > { %s1276_s27 = sadd.s32 1, %s1183_s18   ;;  %s32_s28 = sadd.s32 1, %s1179_s17 }
  0x11   : > { %s1621_s23 = scalar_select %p1260_p8, 1, 0 }
  0x12   : > { %p933_p9 = pneg %p1260_p8  ;;  %s29_s29 = ssub.s32 %s1183_s18, %s1276_s27 }
  0x13   : > { %s1023_s6 = scalar_lea.hbm %s1612_s1, 2048 }
  0x14   : > { %p1271_p11 = pnand %p933_p9, %p1616_p1  ;;  %p1024_p12 = scmp.ne.s32.totalorder %s1612_s1, %s1023_s6 }
  0x15   : > { %p1030_p5 = scmp.lt.u32.totalorder %s1023_s6, %s1612_s1 }
  0x16   : > { %p1025_p13 = pneg %p1271_p11 }
  0x18   : > { %p1026_p0 = pnand %p1025_p13, %p1024_p12 }
  0x1a   : > { %p1027_p3 = pneg %p1026_p0 }
  0x1c   : > { %p1032_p7 = pnand %p1030_p5, %p1027_p3 }
  0x1e   : > { %1035 = shalt.err (!%p1032_p7)
}
  0x1f   : > { %s1036_s11 = scalar_lea.vmem %s1264_s25, 2048  ;;  %p1044_p2 = scmp.lt.s32.totalorder %s1264_s25, %s1264_s25 }
  0x20   : > { %p1037_p9 = scmp.ne.s32.totalorder %s1264_s25, %s1036_s11  ;;  %p1045_p6 = scmp.lt.s32.totalorder %s1036_s11, %s1036_s11 }
  0x22   : > { %p1039_p10 = pnand %p1037_p9, %p1025_p13  ;;  %p1046_p4 = por %p1045_p6, %p1044_p2 }
  0x24   : > { %p1040_p1 = pneg %p1039_p10 }
  0x26   : > { %p1047_p8 = pnand %p1046_p4, %p1040_p1 }
  0x28   : > { %1050 = shalt.err (!%p1047_p8)
}
  0x29   : > { %s1186_s12 = smov 128   ;;  %s1187_s13 = smov 8  }
  0x2a   : > { %936 = dma.hbm_to_vmem [thread:$0]  (!%p1271_p11), %s1612_s1, 2048, %s1264_s25, [#allocation6], %s1186_s12, %s1186_s12, %s1187_s13  }
  0x2b   : > { %p30_p1 = scmp.eq.s32.totalorder %s29_s29, 0  ;;  %p39_p2 = scmp.ne.s32.totalorder %s1179_s17, %s1175_s16 }
  0x2c   : > { %p40_p4 = scmp.eq.s32.totalorder %s1183_s18, 0  ;;  %p949_p6 = scmp.lt.s32.totalorder %s1183_s18, 2 }
  0x2d   : > { %s1310_s24 = scalar_select %p30_p1, %s1179_s17, %s32_s28  }
  0x2e   : > { %p41_p8 = por %p40_p4, %p39_p2  ;;  %p1623_p10 = scmp.eq.s32.totalorder %s1241_s19, 1 }
  0x2f   : > { %s179_s26 = sand.u32 1, %s1179_s17   ;;  %s793_s5 = sshll.u32 %s1183_s18, 11 }
  0x30   : > { %p1314_p12 = por %p1623_p10, %p39_p2  ;;  %s760_s6 = sshll.u32 %s179_s26, 7 }
  0x31   : > { %s1323_s9 = scalar_lea.hbm %s1611_s0, %s793_s5  ;;  %s183_s25 = scalar_lea.vmem [#allocation2], %s760_s6 }
  0x32   : > { %s190_s28 = sshll.u32 %s183_s25, 4  ;;  %p1325_p11 = pnand %p949_p6, %p41_p8  ;;  %s1329_s28 = int_to_ptr.vmem [resolvable:$true] %s190_s28 }
  0x33   : > { %s1331_s10 = scalar_lea.sflag [#allocation3], %s179_s26  ;;  %s1051_s11 = scalar_lea.hbm %s1323_s9, 2048 }
  0x34   : > { %p1052_p13 = scmp.ne.s32.totalorder %s1323_s9, %s1051_s11  ;;  %p1053_p0 = pneg %p1325_p11 }
  0x35   : > { %s1056_s5 = scalar_lea.hbm %s1611_s0, 4096  ;;  %p1057_p7 = scmp.lt.u32.totalorder %s1323_s9, %s1611_s0 }
  0x36   : > { %p1054_p3 = pnand %p1053_p0, %p1052_p13  ;;  %p1058_p9 = scmp.lt.u32.totalorder %s1056_s5, %s1051_s11 }
  0x37   : > { %p1060_p2 = scmp.lt.u32.totalorder %s1051_s11, %s1323_s9 }
  0x38   : > { %p1055_p5 = pneg %p1054_p3  ;;  %p1059_p1 = por %p1058_p9, %p1057_p7 }
  0x3a   : > { %p1061_p4 = por %p1060_p2, %p1059_p1 }
  0x3c   : > { %p1062_p6 = pnand %p1061_p4, %p1055_p5 }
  0x3e   : > { %1065 = shalt.err (!%p1062_p6)
}
  0x3f   : > { %s1066_s26 = scalar_lea.vmem %s1329_s28, 2048  ;;  %s1188_s8 = smov [#allocation2]  }
  0x40   : > { %p1067_p8 = scmp.ne.s32.totalorder %s1329_s28, %s1066_s26  ;;  %s1071_s25 = sshll.u32 %s1188_s8, 4  ;;  %s1072_s25 = int_to_ptr.vmem [resolvable:$false] %s1071_s25 }
  0x41   : > { %s1073_s14 = scalar_lea.vmem %s1072_s25, 4096  ;;  %p1074_p3 = scmp.lt.s32.totalorder %s1329_s28, %s1072_s25 }
  0x42   : > { %p1069_p10 = pnand %p1067_p8, %p1053_p0  ;;  %p1075_p7 = scmp.lt.s32.totalorder %s1073_s14, %s1066_s26 }
  0x44   : > { %p1070_p13 = pneg %p1069_p10  ;;  %p1076_p9 = por %p1075_p7, %p1074_p3 }
  0x46   : > { %p1077_p1 = pnand %p1076_p9, %p1070_p13 }
  0x48   : > { %1080 = shalt.err (!%p1077_p1)
}
  0x49   : > { %940 = dma.hbm_to_vmem [thread:$0]  (!%p1325_p11), %s1323_s9, 2048, %s1329_s28, %s1331_s10, %s1186_s12, %s1186_s12, %s1187_s13  }
  0x4a   : > { %p1626_p0 = scmp.ne.s32.totalorder %s1621_s23, 0 }
  0x4b   : > { %s1365_s11 = sand.u32 (!%p1626_p0), 1, %s1175_s16   ;;  %p1627_p5 = scmp.ne.s32.totalorder (!%p1626_p0), %s1619_s21, 0 }
  0x4c   : > { %202 = sbr.rel (%p1626_p0) target bundleno = 543 (0x21f), region = 32  ;;  %s764_s20 = sshll.u32 (!%p1626_p0), %s1365_s11, 7 }
  0x4d   : > { %s205_s5 = scalar_lea.sflag (!%p1626_p0), [#allocation3], %s1365_s11  ;;  %s1371_s29 = scalar_lea.vmem (!%p1626_p0), [#allocation2], %s764_s20 }
  0x53   : > { %1154 = dma.done.wait (%p1627_p5), %s205_s5, 2048  }
  0x54   : > { %1156 = vsyncadd (%p1627_p5), %s205_s5, 4294965248  ;;  %p1628_p11 = scmp.eq.s32.totalorder %s1241_s19, 0 }
  0x56   : > { %1158 = dma.done.wait (%p1628_p11), [#allocation6], 2048   ;;  %p1629_p2 = pmov %p1628_p11 }
  0x57   : > { %v270_v0 = vld [vmem:[#allocation5] sm:$0xff]  ;;  %v271_v1 = vld [vmem:[#allocation5 + $0x8] sm:$0xff]  ;;  %v272_v2 = vld [vmem:[#allocation5 + $0x10] sm:$0xff]  ;;  %s1410_s12 = scalar_lea.vmem [#allocation7], %s764_s20  ;;  %s810_s13 = sshll.u32 %s1241_s19, 11 }
  0x58   : > { %1160 = vsyncadd (%p1629_p2), [#allocation6], 4294965248  ;;  %v286_v3 = vpack.c.bf16 %v271_v1, %v270_v0  ;;  %v273_v4 = vld [vmem:[#allocation5 + $0x18] sm:$0xff]  ;;  %v274_v6 = vld [vmem:[#allocation5 + $0x20] sm:$0xff]  ;;  %s625_s9 = sshll.u32 %s1410_s12, 4  ;;  %s1505_s6 = scalar_lea.hbm %s1614_s3, %s810_s13  ;;  %s1507_s9 = int_to_ptr.vmem [resolvable:$true] %s625_s9 }
  0x59   : > { %v287_v5 = vpack.c.bf16 %v273_v4, %v272_v2  ;;  %v275_v7 = vld [vmem:[#allocation5 + $0x28] sm:$0xff]  ;;  %v276_v9 = vld [vmem:[#allocation5 + $0x30] sm:$0xff]  ;;  %v246_v10 = vld [vmem:[%s1371_s29] sm:$0xff]  ;;  %s607_s7 = scalar_lea.sflag [#allocation4], %s1365_s11  ;;  %s1081_s26 = scalar_lea.vmem %s1507_s9, 2048 }
  0x5a   : > { %875 = vmatprep.subr.bf16.mxu0 %v286_v3  ;;  %907 = vmatprep.subr.bf16.mxu1 %v286_v3  ;;  %v288_v8 = vpack.c.bf16 %v275_v7, %v274_v6  ;;  %v247_v11 = vld [vmem:[%s1371_s29 + $0x8] sm:$0xff]  ;;  %v277_v12 = vld [vmem:[#allocation5 + $0x38] sm:$0xff]  ;;  %v254_v14 = vld [vmem:[%s1371_s29 + $0x40] sm:$0xff]  ;;  %p1082_p4 = scmp.ne.s32.totalorder %s1507_s9, %s1081_s26  ;;  %s1189_s8 = smov [#allocation7]  }
  0x5b   : > { %876 = vmatpush3.bf16.msra.mxu0 %v286_v3  ;;  %915 = vmatpush3.bf16.msra.mxu1 %v286_v3  ;;  %v262_v13 = vpack.c.bf16 %v247_v11, %v246_v10  ;;  %v255_v15 = vld [vmem:[%s1371_s29 + $0x48] sm:$0xff]  ;;  %v289_v17 = vpack.c.bf16 %v277_v12, %v276_v9  ;;  %v278_v18 = vld [vmem:[#allocation5 + $0x40] sm:$0xff]  ;;  %v280_v21 = vld [vmem:[#allocation5 + $0x50] sm:$0xff]  ;;  %s1085_s25 = sshll.u32 %s1189_s8, 4  ;;  %s1086_s25 = int_to_ptr.vmem [resolvable:$false] %s1085_s25 }
  0x5c   : > { %877 = vmatprep.subr.bf16.mxu0 %v287_v5  ;;  %908 = vmatprep.subr.bf16.mxu1 %v287_v5  ;;  %v266_v16 = vpack.c.bf16 %v255_v15, %v254_v14  ;;  %v279_v19 = vld [vmem:[#allocation5 + $0x48] sm:$0xff]  ;;  %v281_v22 = vld [vmem:[#allocation5 + $0x58] sm:$0xff]  ;;  %v282_v24 = vld [vmem:[#allocation5 + $0x60] sm:$0xff]  ;;  %p1083_p6 = pnand %p1082_p4, %p1314_p12  ;;  %s1087_s14 = scalar_lea.vmem %s1086_s25, 4096 }
  0x5d   : > { %891 = vmatprep.mubr.bf16.mxu0 %v262_v13  ;;  %v290_v20 = vpack.c.bf16 %v279_v19, %v278_v18  ;;  %v291_v23 = vpack.c.bf16 %v281_v22, %v280_v21  ;;  %v283_v25 = vld [vmem:[#allocation5 + $0x68] sm:$0xff]  ;;  %v284_v27 = vld [vmem:[#allocation5 + $0x70] sm:$0xff]  ;;  %v285_v28 = vld [vmem:[#allocation5 + $0x78] sm:$0xff]  ;;  %p1088_p10 = scmp.lt.s32.totalorder %s1507_s9, %s1086_s25  ;;  %p1089_p13 = scmp.lt.s32.totalorder %s1087_s14, %s1081_s26 }
  0x5e   : > { %899 = vmatprep.mubr.bf16.mxu1 %v266_v16  ;;  %v292_v26 = vpack.c.bf16 %v283_v25, %v282_v24  ;;  %v293_v29 = vpack.c.bf16 %v285_v28, %v284_v27  ;;  %v248_v30 = vld [vmem:[%s1371_s29 + $0x10] sm:$0xff]  ;;  %v249_v31 = vld [vmem:[%s1371_s29 + $0x18] sm:$0xff]  ;;  %v250_v34 = vld [vmem:[%s1371_s29 + $0x20] sm:$0xff]  ;;  %p1084_p8 = pneg %p1083_p6 }
  0x5f   : > { %878 = vmatpush3.bf16.msra.mxu0 %v287_v5  ;;  %916 = vmatpush3.bf16.msra.mxu1 %v287_v5  ;;  %v256_v32 = vld [vmem:[%s1371_s29 + $0x50] sm:$0xff]  ;;  %v257_v33 = vld [vmem:[%s1371_s29 + $0x58] sm:$0xff]  ;;  %v251_v35 = vld [vmem:[%s1371_s29 + $0x28] sm:$0xff]  ;;  %v263_v38 = vpack.c.bf16 %v249_v31, %v248_v30  ;;  %p1090_p3 = por %p1089_p13, %p1088_p10 }
  0x60   : > { %879 = vmatprep.subr.bf16.mxu0 %v288_v8  ;;  %909 = vmatprep.subr.bf16.mxu1 %v288_v8  ;;  %v258_v36 = vld [vmem:[%s1371_s29 + $0x60] sm:$0xff]  ;;  %v259_v37 = vld [vmem:[%s1371_s29 + $0x68] sm:$0xff]  ;;  %v267_v39 = vpack.c.bf16 %v257_v33, %v256_v32  ;;  %v264_v40 = vpack.c.bf16 %v251_v35, %v250_v34  ;;  %v252_v42 = vld [vmem:[%s1371_s29 + $0x30] sm:$0xff] }
  0x61   : > { %v268_v41 = vpack.c.bf16 %v259_v37, %v258_v36  ;;  %v253_v43 = vld [vmem:[%s1371_s29 + $0x38] sm:$0xff]  ;;  %v260_v44 = vld [vmem:[%s1371_s29 + $0x70] sm:$0xff]  ;;  %v768_v48 = vld [vmem:[%s1613_s2] ss:$0 sm:$0xff]  ;;  %p1091_p7 = pnand %p1090_p3, %p1084_p8 }
  0x62   : > { %v261_v45 = vld [vmem:[%s1371_s29 + $0x78] sm:$0xff]  ;;  %v265_v46 = vpack.c.bf16 %v253_v43, %v252_v42 }
  0x63   : > { %880 = vmatpush3.bf16.msra.mxu0 %v288_v8  ;;  %917 = vmatpush3.bf16.msra.mxu1 %v288_v8  ;;  %v269_v47 = vpack.c.bf16 %v261_v45, %v260_v44 }
  0x64   : > { %881 = vmatprep.subr.bf16.mxu0 %v289_v17  ;;  %910 = vmatprep.subr.bf16.mxu1 %v289_v17 }
  0x67   : > { %882 = vmatpush3.bf16.msra.mxu0 %v289_v17  ;;  %918 = vmatpush3.bf16.msra.mxu1 %v289_v17 }
  0x68   : > { %883 = vmatprep.subr.bf16.mxu0 %v290_v20  ;;  %911 = vmatprep.subr.bf16.mxu1 %v290_v20 }
  0x6b   : > { %884 = vmatpush3.bf16.msra.mxu0 %v290_v20  ;;  %919 = vmatpush3.bf16.msra.mxu1 %v290_v20 }
  0x6c   : > { %885 = vmatprep.subr.bf16.mxu0 %v291_v23  ;;  %912 = vmatprep.subr.bf16.mxu1 %v291_v23 }
  0x6f   : > { %886 = vmatpush3.bf16.msra.mxu0 %v291_v23  ;;  %920 = vmatpush3.bf16.msra.mxu1 %v291_v23 }
  0x70   : > { %887 = vmatprep.subr.bf16.mxu0 %v292_v26  ;;  %913 = vmatprep.subr.bf16.mxu1 %v292_v26 }
  0x73   : > { %888 = vmatpush3.bf16.msra.mxu0 %v292_v26  ;;  %921 = vmatpush3.bf16.msra.mxu1 %v292_v26 }
  0x74   : > { %889 = vmatprep.subr.bf16.mxu0 %v293_v29  ;;  %914 = vmatprep.subr.bf16.mxu1 %v293_v29 }
  0x77   : > { %890 = vmatpush3.bf16.msra.mxu0 %v293_v29  ;;  %922 = vmatpush3.bf16.msra.mxu1 %v293_v29 }
  0x7a   : > { %892 = vmatmul.mubr.bf16.vlgmr.msra.gmra.mrb[0].mxu0 %v263_v38  ;;  %900 = vmatmul.mubr.bf16.vlgmr.msra.gmra.mrb[0].mxu1 %v267_v39 }
  0x7b   : > { %895 = vmatprep.mubr.bf16.mxu0 %v264_v40  ;;  %903 = vmatprep.mubr.bf16.mxu1 %v268_v41 }
  0x82   : > { %896 = vmatmul.mubr.bf16.gmra.mrb[4].mxu0 %v265_v46  ;;  %904 = vmatmul.mubr.bf16.gmra.mrb[4].mxu1 %v269_v47 }
 0x14d   : > { %v893_v49 = vpop.f32.mrb[0].mxu0  ;;  %v901_v50 = vpop.f32.mrb[0].mxu1 }
 0x14e   : > { %v344_v51 = vadd.f32 %v893_v49, %v768_v48  ;;  %v376_v52 = vadd.f32 %v901_v50, %v768_v48  ;;  %v335_v53 = vpop.f32.mrb[1].mxu0  ;;  %v367_v54 = vpop.f32.mrb[1].mxu1 }
 0x14f   : > { %v336_v55 = vadd.f32 %v768_v48, %v335_v53  ;;  %v368_v56 = vadd.f32 %v768_v48, %v367_v54  ;;  %v894_v57 = vpop.f32.mrb[2].mxu0  ;;  %v902_v58 = vpop.f32.mrb[2].mxu1 }
 0x150   : > { %v1400_v59 = vmax.f32 %v344_v51, 0.0  ;;  %v1402_v60 = vmax.f32 %v376_v52, 0.0  ;;  %v347_v61 = vadd.f32 %v894_v57, %v768_v48  ;;  %v379_v62 = vadd.f32 %v902_v58, %v768_v48  ;;  %v338_v63 = vpop.f32.mrb[3].mxu0  ;;  %v370_v0 = vpop.f32.mrb[3].mxu1 }
 0x151   : > { %v1404_v1 = vmax.f32 %v336_v55, 0.0  ;;  %v1406_v2 = vmax.f32 %v368_v56, 0.0  ;;  %v339_v3 = vadd.f32 %v768_v48, %v338_v63  ;;  %v371_v4 = vadd.f32 %v768_v48, %v370_v0 }
 0x152   : > { %416 = vst [vmem:[%s1410_s12 + $0x10] sm:$0xff] %v1400_v59  ;;  %424 = vst [vmem:[%s1410_s12 + $0x50] sm:$0xff] %v1402_v60  ;;  %v1416_v5 = vmax.f32 %v347_v61, 0.0  ;;  %v1418_v6 = vmax.f32 %v379_v62, 0.0  ;;  %v440_v7 = vmul.f32 %v1402_v60, %v1402_v60  ;;  %v432_v8 = vmul.f32 %v1400_v59, %v1400_v59 }
 0x153   : > { %414 = vst [vmem:[%s1410_s12] sm:$0xff] %v1404_v1  ;;  %422 = vst [vmem:[%s1410_s12 + $0x40] sm:$0xff] %v1406_v2  ;;  %v1428_v9 = vmax.f32 %v339_v3, 0.0  ;;  %v1430_v10 = vmax.f32 %v371_v4, 0.0  ;;  %v430_v15 = vmul.f32 %v1404_v1, %v1404_v1  ;;  %v438_v35 = vmul.f32 %v1406_v2, %v1406_v2 }
 0x154   : > { %417 = vst [vmem:[%s1410_s12 + $0x18] sm:$0xff] %v1416_v5  ;;  %425 = vst [vmem:[%s1410_s12 + $0x58] sm:$0xff] %v1418_v6  ;;  %466 = vadd.xlane.f32.xlu0 %v440_v7  ;;  %450 = vadd.xlane.f32.xlu1 %v432_v8  ;;  %v433_v13 = vmul.f32 %v1416_v5, %v1416_v5  ;;  %v441_v34 = vmul.f32 %v1418_v6, %v1418_v6 }
 0x155   : > { %415 = vst [vmem:[%s1410_s12 + $0x8] sm:$0xff] %v1428_v9  ;;  %423 = vst [vmem:[%s1410_s12 + $0x48] sm:$0xff] %v1430_v10  ;;  %v897_v11 = vpop.f32.mrb[4].mxu0  ;;  %v905_v12 = vpop.f32.mrb[4].mxu1  ;;  %v439_v39 = vmul.f32 %v1430_v10, %v1430_v10  ;;  %v431_v40 = vmul.f32 %v1428_v9, %v1428_v9 }
 0x156   : > { %v360_v14 = vadd.f32 %v897_v11, %v768_v48  ;;  %v351_v16 = vpop.f32.mrb[5].mxu0  ;;  %v392_v17 = vadd.f32 %v905_v12, %v768_v48  ;;  %v383_v18 = vpop.f32.mrb[5].mxu1 }
 0x157   : > { %v352_v19 = vadd.f32 %v768_v48, %v351_v16  ;;  %v898_v20 = vpop.f32.mrb[6].mxu0  ;;  %v384_v21 = vadd.f32 %v768_v48, %v383_v18  ;;  %v906_v22 = vpop.f32.mrb[6].mxu1 }
 0x158   : > { %452 = vadd.xlane.f32.xlu1 %v433_v13  ;;  %v1444_v23 = vmax.f32 %v360_v14, 0.0  ;;  %446 = vadd.xlane.f32.xlu0 %v430_v15  ;;  %v363_v24 = vadd.f32 %v898_v20, %v768_v48  ;;  %v354_v25 = vpop.f32.mrb[7].mxu0  ;;  %v1446_v26 = vmax.f32 %v392_v17, 0.0  ;;  %v395_v27 = vadd.f32 %v906_v22, %v768_v48  ;;  %v386_v28 = vpop.f32.mrb[7].mxu1 }
 0x159   : > { %v1448_v29 = vmax.f32 %v352_v19, 0.0  ;;  %v355_v30 = vadd.f32 %v768_v48, %v354_v25  ;;  %v1450_v31 = vmax.f32 %v384_v21, 0.0  ;;  %v387_v32 = vadd.f32 %v768_v48, %v386_v28 }
 0x15a   : > { %420 = vst [vmem:[%s1410_s12 + $0x30] sm:$0xff] %v1444_v23  ;;  %v1454_v33 = vmax.f32 %v363_v24, 0.0  ;;  %428 = vst [vmem:[%s1410_s12 + $0x70] sm:$0xff] %v1446_v26  ;;  %v1462_v36 = vmax.f32 %v395_v27, 0.0  ;;  %v436_v42 = vmul.f32 %v1444_v23, %v1444_v23  ;;  %v444_v48 = vmul.f32 %v1446_v26, %v1446_v26 }
 0x15b   : > { %418 = vst [vmem:[%s1410_s12 + $0x20] sm:$0xff] %v1448_v29  ;;  %v1466_v37 = vmax.f32 %v355_v30, 0.0  ;;  %426 = vst [vmem:[%s1410_s12 + $0x60] sm:$0xff] %v1450_v31  ;;  %v1470_v38 = vmax.f32 %v387_v32, 0.0  ;;  %v434_v44 = vmul.f32 %v1448_v29, %v1448_v29  ;;  %v442_v46 = vmul.f32 %v1450_v31, %v1450_v31 }
 0x15c   : > { %421 = vst [vmem:[%s1410_s12 + $0x38] sm:$0xff] %v1454_v33  ;;  %468 = vadd.xlane.f32.xlu1 %v441_v34  ;;  %462 = vadd.xlane.f32.xlu0 %v438_v35  ;;  %429 = vst [vmem:[%s1410_s12 + $0x78] sm:$0xff] %v1462_v36  ;;  %v437_v41 = vmul.f32 %v1454_v33, %v1454_v33  ;;  %v445_v47 = vmul.f32 %v1462_v36, %v1462_v36 }
 0x15d   : > { %419 = vst [vmem:[%s1410_s12 + $0x28] sm:$0xff] %v1466_v37  ;;  %427 = vst [vmem:[%s1410_s12 + $0x68] sm:$0xff] %v1470_v38  ;;  %v435_v43 = vmul.f32 %v1466_v37, %v1466_v37  ;;  %v443_v45 = vmul.f32 %v1470_v38, %v1470_v38 }
 0x160   : > { %464 = vadd.xlane.f32.xlu1 %v439_v39  ;;  %448 = vadd.xlane.f32.xlu0 %v431_v40 }
 0x164   : > { %460 = vadd.xlane.f32.xlu1 %v437_v41  ;;  %458 = vadd.xlane.f32.xlu0 %v436_v42 }
 0x168   : > { %456 = vadd.xlane.f32.xlu1 %v435_v43  ;;  %454 = vadd.xlane.f32.xlu0 %v434_v44 }
 0x16c   : > { %472 = vadd.xlane.f32.xlu1 %v443_v45  ;;  %470 = vadd.xlane.f32.xlu0 %v442_v46 }
 0x170   : > { %476 = vadd.xlane.f32.xlu1 %v445_v47  ;;  %474 = vadd.xlane.f32.xlu0 %v444_v48 }
 0x171   : > { %1094 = shalt.err (!%p1091_p7)
}
 0x172   : > { %s1095_s20 = scalar_lea.hbm %s1505_s6, 2048  ;;  %s1099_s21 = scalar_lea.hbm %s1614_s3, 4096 }
 0x173   : > { %p1096_p9 = scmp.ne.s32.totalorder %s1505_s6, %s1095_s20  ;;  %p1100_p5 = scmp.lt.u32.totalorder %s1505_s6, %s1614_s3 }
 0x174   : > { %p1101_p11 = scmp.lt.u32.totalorder %s1099_s21, %s1095_s20  ;;  %p1103_p4 = scmp.lt.u32.totalorder %s1095_s20, %s1505_s6 }
 0x175   : > { %p1097_p1 = pnand %p1096_p9, %p1314_p12 }
 0x176   : > { %p1102_p2 = por %p1101_p11, %p1100_p5 }
 0x177   : > { %p1098_p0 = pneg %p1097_p1 }
 0x178   : > { %p1104_p6 = por %p1103_p4, %p1102_p2 }
 0x17a   : > { %p1105_p8 = pnand %p1104_p6, %p1098_p0 }
 0x17c   : > { %1108 = shalt.err (!%p1105_p8)
}
 0x17d   : > { %s1190_s13 = smov 128   ;;  %s1191_s28 = smov 8  }
 0x17e   : > { %929 = dma.vmem_to_hbm [thread:$0]  (%p1314_p12), %s1507_s9, 2048, %s1505_s6, %s607_s7, %s1190_s13, %s1190_s13, %s1191_s28  }
 0x17f   : > { %s767_s9 = sshll.u32 %s1365_s11, 6  ;;  %s811_s6 = sshll.u32 %s1241_s19, 10 }
 0x180   : > { %s1537_s10 = scalar_lea.vmem [#allocation8], %s767_s9  ;;  %s1564_s25 = scalar_lea.hbm %s1615_s4, %s811_s6 }
 0x181   : > { %s641_s7 = sshll.u32 %s1537_s10, 4  ;;  %s612_s19 = scalar_lea.sflag [#allocation9], %s1365_s11  ;;  %s1566_s7 = int_to_ptr.vmem [resolvable:$true] %s641_s7 }
 0x182   : > { %s1109_s14 = scalar_lea.vmem %s1566_s7, 1024  ;;  %s1192_s20 = smov [#allocation8]  }
 0x183   : > { %p1110_p10 = scmp.ne.s32.totalorder %s1566_s7, %s1109_s14  ;;  %s1113_s5 = sshll.u32 %s1192_s20, 4  ;;  %s1114_s5 = int_to_ptr.vmem [resolvable:$false] %s1113_s5 }
 0x184   : > { %s1115_s29 = scalar_lea.vmem %s1114_s5, 2048  ;;  %p1116_p7 = scmp.lt.s32.totalorder %s1566_s7, %s1114_s5 }
 0x185   : > { %p1111_p13 = pnand %p1110_p10, %p1314_p12  ;;  %p1117_p9 = scmp.lt.s32.totalorder %s1115_s29, %s1109_s14 }
 0x187   : > { %p1112_p3 = pneg %p1111_p13  ;;  %p1118_p1 = por %p1117_p9, %p1116_p7 }
 0x189   : > { %p1119_p0 = pnand %p1118_p1, %p1112_p3 }
 0x1e1   : > { %v467_v49 = vpop.xlane.xlu0 %466  ;;  %v451_v50 = vpop.xlane.xlu1 %450 }
 0x1e2   : > { %v480_v51 = vmax.f32 %v451_v50, 1e-24  ;;  %v488_v54 = vmax.f32 %v467_v49, 1e-24 }
 0x1e4   : > { %991 = vrsqrt.f32 %v480_v51 }
 0x1e5   : > { %v453_v52 = vpop.xlane.xlu1 %452  ;;  %v447_v53 = vpop.xlane.xlu0 %446 }
 0x1e6   : > { %v481_v55 = vmax.f32 %v453_v52, 1e-24  ;;  %v478_v62 = vmax.f32 %v447_v53, 1e-24 }
 0x1e8   : > { %993 = vrsqrt.f32 %v481_v55 }
 0x1e9   : > { %v469_v56 = vpop.xlane.xlu1 %468  ;;  %v463_v57 = vpop.xlane.xlu0 %462  ;;  %995 = vrsqrt.f32 %v488_v54 }
 0x1ea   : > { %v489_v58 = vmax.f32 %v469_v56, 1e-24  ;;  %v486_v61 = vmax.f32 %v463_v57, 1e-24 }
 0x1ec   : > { %997 = vrsqrt.f32 %v489_v58 }
 0x1ed   : > { %v465_v63 = vpop.xlane.xlu1 %464  ;;  %v449_v0 = vpop.xlane.xlu0 %448  ;;  %999 = vrsqrt.f32 %v486_v61 }
 0x1ee   : > { %v487_v3 = vmax.f32 %v465_v63, 1e-24  ;;  %v479_v4 = vmax.f32 %v449_v0, 1e-24  ;;  %1001 = vrsqrt.f32 %v478_v62  ;;  %v992_v7 = vpop.eup %991 }
 0x1ef   : > { %v512_v15 = vmul.f32 %v992_v7, %v1400_v59 }
 0x1f0   : > { %1003 = vrsqrt.f32 %v487_v3 }
 0x1f1   : > { %1005 = vrsqrt.f32 %v479_v4  ;;  %v461_v8 = vpop.xlane.xlu1 %460  ;;  %v459_v11 = vpop.xlane.xlu0 %458 }
 0x1f2   : > { %v994_v12 = vpop.eup %993  ;;  %v485_v13 = vmax.f32 %v461_v8, 1e-24  ;;  %v484_v14 = vmax.f32 %v459_v11, 1e-24 }
 0x1f3   : > { %v513_v16 = vmul.f32 %v994_v12, %v1416_v5  ;;  %v996_v17 = vpop.eup %995 }
 0x1f4   : > { %1007 = vrsqrt.f32 %v485_v13  ;;  %v520_v25 = vmul.f32 %v996_v17, %v1402_v60 }
 0x1f5   : > { %v820_v18 = vpack.c.bf16 %v513_v16, %v512_v15  ;;  %1009 = vrsqrt.f32 %v484_v14  ;;  %v457_v19 = vpop.xlane.xlu1 %456  ;;  %v455_v20 = vpop.xlane.xlu0 %454 }
 0x1f6   : > { %v998_v21 = vpop.eup %997  ;;  %v483_v22 = vmax.f32 %v457_v19, 1e-24  ;;  %v482_v24 = vmax.f32 %v455_v20, 1e-24 }
 0x1f7   : > { %852 = vst [vmem:[%s1537_s10 + $0x8] sm:$0xff] %v820_v18   ;;  %v521_v59 = vmul.f32 %v998_v21, %v1418_v6  ;;  %v1000_v27 = vpop.eup %999 }
 0x1f8   : > { %1011 = vrsqrt.f32 %v483_v22  ;;  %v1002_v5 = vpop.eup %1001  ;;  %v518_v60 = vmul.f32 %v1000_v27, %v1406_v2 }
 0x1f9   : > { %v840_v28 = vpack.c.bf16 %v521_v59, %v520_v25  ;;  %1013 = vrsqrt.f32 %v482_v24  ;;  %v473_v30 = vpop.xlane.xlu1 %472  ;;  %v471_v32 = vpop.xlane.xlu0 %470  ;;  %v510_v6 = vmul.f32 %v1002_v5, %v1404_v1 }
 0x1fa   : > { %v1004_v34 = vpop.eup %1003  ;;  %v491_v35 = vmax.f32 %v473_v30, 1e-24  ;;  %v490_v39 = vmax.f32 %v471_v32, 1e-24 }
 0x1fb   : > { %v1006_v40 = vpop.eup %1005  ;;  %856 = vst [vmem:[%s1537_s10 + $0x28] sm:$0xff] %v840_v28   ;;  %v519_v41 = vmul.f32 %v1004_v34, %v1430_v10 }
 0x1fc   : > { %v511_v42 = vmul.f32 %v1006_v40, %v1428_v9  ;;  %1015 = vrsqrt.f32 %v491_v35 }
 0x1fd   : > { %v835_v43 = vpack.c.bf16 %v519_v41, %v518_v60  ;;  %1017 = vrsqrt.f32 %v490_v39  ;;  %v477_v44 = vpop.xlane.xlu1 %476  ;;  %v475_v45 = vpop.xlane.xlu0 %474 }
 0x1fe   : > { %v1008_v46 = vpop.eup %1007  ;;  %v815_v47 = vpack.c.bf16 %v511_v42, %v510_v6  ;;  %v493_v48 = vmax.f32 %v477_v44, 1e-24  ;;  %v492_v49 = vmax.f32 %v475_v45, 1e-24 }
 0x1ff   : > { %v1010_v50 = vpop.eup %1009  ;;  %855 = vst [vmem:[%s1537_s10 + $0x20] sm:$0xff] %v835_v43   ;;  %v517_v2 = vmul.f32 %v1008_v46, %v1454_v33 }
 0x200   : > { %816 = vst [vmem:[%s1537_s10] sm:$0xff] %v815_v47   ;;  %v516_v1 = vmul.f32 %v1010_v50, %v1444_v23  ;;  %1019 = vrsqrt.f32 %v493_v48 }
 0x201   : > { %1021 = vrsqrt.f32 %v492_v49 }
 0x202   : > { %v1012_v9 = vpop.eup %1011  ;;  %v830_v10 = vpack.c.bf16 %v517_v2, %v516_v1 }
 0x203   : > { %v1014_v51 = vpop.eup %1013  ;;  %v515_v52 = vmul.f32 %v1012_v9, %v1466_v37 }
 0x204   : > { %854 = vst [vmem:[%s1537_s10 + $0x18] sm:$0xff] %v830_v10   ;;  %v514_v53 = vmul.f32 %v1014_v51, %v1448_v29 }
 0x206   : > { %v1016_v54 = vpop.eup %1015  ;;  %v825_v55 = vpack.c.bf16 %v515_v52, %v514_v53 }
 0x207   : > { %v1018_v33 = vpop.eup %1017  ;;  %v523_v23 = vmul.f32 %v1016_v54, %v1470_v38 }
 0x208   : > { %853 = vst [vmem:[%s1537_s10 + $0x10] sm:$0xff] %v825_v55   ;;  %v522_v56 = vmul.f32 %v1018_v33, %v1450_v31 }
 0x20a   : > { %v1020_v57 = vpop.eup %1019  ;;  %v845_v58 = vpack.c.bf16 %v523_v23, %v522_v56 }
 0x20b   : > { %v1022_v61 = vpop.eup %1021  ;;  %v525_v37 = vmul.f32 %v1020_v57, %v1462_v36 }
 0x20c   : > { %857 = vst [vmem:[%s1537_s10 + $0x30] sm:$0xff] %v845_v58   ;;  %v524_v29 = vmul.f32 %v1022_v61, %v1446_v26 }
 0x20e   : > { %v850_v31 = vpack.c.bf16 %v525_v37, %v524_v29 }
 0x210   : > { %858 = vst [vmem:[%s1537_s10 + $0x38] sm:$0xff] %v850_v31  }
 0x211   : > { %1122 = shalt.err (!%p1119_p0)
}
 0x212   : > { %s1123_s21 = scalar_lea.hbm %s1564_s25, 1024  ;;  %s1127_s13 = scalar_lea.hbm %s1615_s4, 2048 }
 0x213   : > { %p1124_p5 = scmp.ne.s32.totalorder %s1564_s25, %s1123_s21  ;;  %p1128_p4 = scmp.lt.u32.totalorder %s1564_s25, %s1615_s4 }
 0x214   : > { %p1129_p6 = scmp.lt.u32.totalorder %s1127_s13, %s1123_s21  ;;  %p1131_p10 = scmp.lt.u32.totalorder %s1123_s21, %s1564_s25 }
 0x215   : > { %p1125_p11 = pnand %p1124_p5, %p1314_p12 }
 0x216   : > { %p1130_p8 = por %p1129_p6, %p1128_p4 }
 0x217   : > { %p1126_p2 = pneg %p1125_p11 }
 0x218   : > { %p1132_p13 = por %p1131_p10, %p1130_p8 }
 0x21a   : > { %p1133_p3 = pnand %p1132_p13, %p1126_p2 }
 0x21c   : > { %1136 = shalt.err (!%p1133_p3)
}
 0x21d   : > { %s1193_s10 = smov 64   ;;  %s1194_s6 = smov 4  }
 0x21e   : > { %930 = dma.vmem_to_hbm [thread:$0]  (%p1314_p12), %s1566_s7, 1024, %s1564_s25, %s612_s19, %s1193_s10, %s1193_s10, %s1194_s6  }
 0x21f PF: > { %s656_s26 = sand.u32 1, %s1171_s15   ;;  %p1630_p7 = scmp.ne.s32.totalorder %s1620_s22, 0 }
 0x220   : > { %p1631_p9 = scmp.ge.s32.totalorder %s1183_s18, 2  ;;  %s657_s8 = scalar_lea.sflag [#allocation4], %s656_s26 }
 0x222   : > { %p942_p1 = pnand %p1631_p9, %p1630_p7 }
 0x224   : > { %1162 = dma.done.wait (!%p942_p1), %s657_s8, 2048  }
 0x225   : > { %1164 = vsyncadd (!%p942_p1), %s657_s8, 4294965248  ;;  %s666_s14 = scalar_lea.sflag [#allocation9], %s656_s26 }
 0x226   : > { %1166 = dma.done.wait (!%p942_p1), %s666_s14, 1024  }
 0x227   : > { %1168 = vsyncadd (!%p942_p1), %s666_s14, 4294966272  ;;  %p22_p12 = scmp.ge.s32.totalorder %s1276_s27, 4   ;;  %s1632_s15 = smov %s1175_s16 }
 0x228   : > { %s1633_s16 = smov %s1179_s17  ;;  %s1634_s17 = smov %s1310_s24 }
 0x229   : > { %s1635_s18 = smov %s1276_s27  ;;  %24 = sbr.rel (!%p22_p12) target bundleno = 8 (0x8), region = 98 }
 0x230   :  { %671 = vsyncpa [#allocation3], 1 }
 0x231   :  { %673 = vsyncpa [#allocation3 + $0x1], 1 }
 0x232   :  { %674 = vsyncpa [#allocation6], 1 }
 0x233   :  { %675 = vsyncpa [#allocation4], 1 }
 0x234   :  { %677 = vsyncpa [#allocation4 + $0x1], 1 }
 0x235   :  { %678 = vsyncpa [#allocation9], 1 }
 0x236   :  { %680 = vsyncpa [#allocation9 + $0x1], 1 }

// kernel: agnnet_forward.5
= control target key start
LH: loop header
LB: loop body
LE: loop exit
PB: predicated region body
PF: predicated region fallthrough
CT: control target
= control target key end

     0   :  { %s3947_s0 = inlined_call_operand.<no memory space> [shape: f32[1], index: 0, kind: input, shape index: {}]   ;;  %s3948_s1 = inlined_call_operand.hbm [shape: bf16[256,128], index: 1, kind: input, shape index: {}, may-alias: {1,2}]   ;;  %s3949_s2 = inlined_call_operand.hbm [shape: bf16[256,128], index: 2, kind: input, shape index: {}, may-alias: {1,2}]   ;;  %s3950_s3 = inlined_call_operand.hbm [shape: f32[256,128], index: 3, kind: input, shape index: {}]   ;;  %s3951_s4 = inlined_call_operand.hbm [shape: bf16[256,256], index: 4, kind: input, shape index: {}]   ;;  %s3952_s5 = inlined_call_operand.hbm [shape: f32[256,128], index: 5, kind: output, shape index: {0}]   ;;  %s3953_s6 = inlined_call_operand.hbm [shape: bf16[256,128], index: 6, kind: output, shape index: {1}]  }
   0x1   :  { %3981 = sst [smem:[#allocation37_spill]] %s3949_s2 }
   0x2   :  { %3982 = sst [smem:[#allocation38_spill]] %s3952_s5 }
   0x3   :  { %3983 = sst [smem:[#allocation39_spill]] %s3953_s6 }
   0x4   :  { %12 = sst [smem:[#allocation6]] %s3947_s0 }
   0x5   :  { %13 = vsyncpa [#allocation8], 0 }
   0x6   :  { %15 = vsyncpa [#allocation8 + $0x1], 0 }
   0x7   :  { %16 = vsyncpa [#allocation11], 0 }
   0x8   :  { %18 = vsyncpa [#allocation11 + $0x1], 0 }
   0x9   :  { %19 = vsyncpa [#allocation14], 0 }
   0xa   :  { %21 = vsyncpa [#allocation14 + $0x1], 0 }
   0xb   :  { %22 = vsyncpa [#allocation9], 0 }
   0xc   :  { %24 = vsyncpa [#allocation9 + $0x1], 0 }
   0xd   :  { %25 = vsyncpa [#allocation17], 0 }
   0xe   :  { %27 = vsyncpa [#allocation17 + $0x1], 0  ;;  %s2890_s23 = smov 0   ;;  %s2892_s24 = smov 0  }
   0xf   :  { %s2894_s25 = smov 0   ;;  %s2896_s26 = smov 0  }
  0x10   :  { %s2898_s27 = smov 0   ;;  %s2900_s0 = smov 0  }
  0x11   :  { %s2902_s28 = smov 0   ;;  %s2904_s29 = smov 0  }
  0x12   :  { %s2906_s30 = smov 0   ;;  %s2908_s7 = smov 0  }
  0x13   :  { %s2910_s8 = smov 0   ;;  %s2912_s9 = smov 0  }
  0x14   :  { %s2914_s10 = smov 0   ;;  %s2916_s11 = smov 0  }
  0x15 LB: > { %3984 = sst [smem:[#allocation23_spill]] %s2796_s27  ;;  %s2959_s12 = sadd.s32 4294967295, %s2832_s11   ;;  %s2832_s11 = sphi %s2916_s11, %s33_s11   ;;  %s2828_s10 = sphi %s2914_s10, %s4055_s10   ;;  %s2824_s9 = sphi %s2912_s9, %s4054_s9   ;;  %s2820_s8 = sphi %s2910_s8, %s4053_s8   ;;  %s2816_s7 = sphi %s2908_s7, %s4052_s7   ;;  %s2812_s30 = sphi %s2906_s30, %s4044_s30   ;;  %s2808_s29 = sphi %s2904_s29, %s4051_s29   ;;  %s2804_s28 = sphi %s2902_s28, %s4050_s28   ;;  %s2800_s0 = sphi %s2900_s0, %s4042_s0   ;;  %s2796_s27 = sphi %s2898_s27, %s4041_s27   ;;  %s2792_s26 = sphi %s2896_s26, %s4040_s26   ;;  %s2788_s25 = sphi %s2894_s25, %s4049_s25   ;;  %s2784_s24 = sphi %s2892_s24, %s4048_s24   ;;  %s2780_s23 = sphi %s2890_s23, %s4047_s23  }
  0x16   : > { %3985 = sst [smem:[#allocation24_spill]] %s2800_s0  ;;  %s42_s13 = sadd.s32 1, %s2824_s9 }
  0x17   : > { %3986 = sst [smem:[#allocation25_spill]] %s2804_s28  ;;  %p2962_p0 = scmp.ge.s32.totalorder %s42_s13, 2 }
  0x18   : > { %3987 = sst [smem:[#allocation26_spill]] %s2812_s30  ;;  %p3961_p1 = scmp.eq.s32.totalorder %s2832_s11, 0 }
  0x19   : > { %3988 = sst [smem:[#allocation27_spill]] %s2816_s7  ;;  %p3960_p2 = scmp.eq.s32.totalorder %s2959_s12, 0 }
  0x1a   : > { %3989 = sst [smem:[#allocation28_spill]] %s2820_s8  ;;  %s99_s15 = sadd.s32 1, %s2800_s0 }
  0x1b   : > { %s4057_s13 = smov (%p2962_p0, %s42_s13), 0  ;;  %p106_p3 = scmp.ne.s32.totalorder %s2800_s0, %s2796_s27 }
  0x1c   : > { %3991 = sst [smem:[#allocation29_spill]] %s4057_s13  ;;  %p112_p4 = scmp.ne.s32.totalorder %s2796_s27, %s2792_s26 }
  0x1d   : > { %s2978_s16 = ssub.s32 %s2824_s9, %s4057_s13  ;;  %p108_p6 = por %p106_p3, %p3961_p1 }
  0x1e   : > { %p97_p5 = scmp.eq.s32.totalorder %s2978_s16, 0  ;;  %p2985_p7 = por %p112_p4, %p3960_p2 }
  0x1f   : > { %p3959_p8 = scmp.lt.s32.totalorder %s2832_s11, 4  ;;  %s266_s19 = sand.u32 1, %s2832_s11  }
  0x20   : > { %s3992_s17 = scalar_select %p2985_p7, 1, 0 }
  0x21   : > { %s2991_s18 = scalar_select %p97_p5, %s2800_s0, %s99_s15  }
  0x22   : > { %3993 = sst [smem:[#allocation30_spill]] %s3992_s17  ;;  %s268_s20 = sand.u32 1, %s2800_s0  }
  0x23   : > { %3994 = sst [smem:[#allocation31_spill]] %s2991_s18  ;;  %s1934_s21 = sshll.u32 %s268_s20, 6 }
  0x24   : > { %s1986_s22 = sshll.u32 %s2824_s9, 10  ;;  %s3995_s2 = sld [smem:[#allocation37_spill]] }
  0x25   : > { %s270_s5 = scalar_lea.vmem [#allocation10], %s1934_s21  ;;  %p3005_p9 = pnand %p3959_p8, %p108_p6 }
  0x26   : > { %s277_s8 = sshll.u32 %s270_s5, 4  ;;  %s3009_s18 = sshll.u32 %s268_s20, 7  ;;  %s3001_s8 = int_to_ptr.vmem [resolvable:$true] %s277_s8 }
  0x27   : > { %s3012_s13 = scalar_lea.sflag [#allocation11], %s266_s19  ;;  %p3978_p12 = pneg %p3005_p9 }
  0x2a   : > { %s2999_s6 = scalar_lea.hbm %s3995_s2, %s1986_s22  ;;  %s2531_s26 = scalar_lea.hbm %s3995_s2, 2048 }
  0x2b   : > { %s2526_s22 = scalar_lea.hbm %s2999_s6, 1024  ;;  %p2532_p4 = scmp.lt.u32.totalorder %s2999_s6, %s3995_s2 }
  0x2c   : > { %p2527_p11 = scmp.ne.s32.totalorder %s2999_s6, %s2526_s22  ;;  %p2533_p5 = scmp.lt.u32.totalorder %s2531_s26, %s2526_s22 }
  0x2d   : > { %p2535_p8 = scmp.lt.u32.totalorder %s2526_s22, %s2999_s6 }
  0x2e   : > { %p2529_p13 = pnand %p3978_p12, %p2527_p11  ;;  %p2534_p6 = por %p2533_p5, %p2532_p4 }
  0x30   : > { %p2530_p3 = pneg %p2529_p13  ;;  %p2536_p2 = por %p2535_p8, %p2534_p6 }
  0x32   : > { %p2537_p1 = pnand %p2536_p2, %p2530_p3 }
  0x34   : > { %2540 = shalt.err (!%p2537_p1)
}
  0x35   : > { %s2541_s19 = scalar_lea.vmem %s3001_s8, 1024  ;;  %s2834_s20 = smov [#allocation10]  }
  0x36   : > { %p2542_p11 = scmp.ne.s32.totalorder %s3001_s8, %s2541_s19  ;;  %s2546_s5 = sshll.u32 %s2834_s20, 4  ;;  %s2547_s5 = int_to_ptr.vmem [resolvable:$false] %s2546_s5 }
  0x37   : > { %s2548_s0 = scalar_lea.vmem %s2547_s5, 2048  ;;  %p2549_p7 = scmp.lt.s32.totalorder %s3001_s8, %s2547_s5 }
  0x38   : > { %p2544_p13 = pnand %p2542_p11, %p3978_p12  ;;  %p2550_p4 = scmp.lt.s32.totalorder %s2548_s0, %s2541_s19 }
  0x3a   : > { %p2545_p10 = pneg %p2544_p13  ;;  %p2551_p5 = por %p2550_p4, %p2549_p7 }
  0x3c   : > { %p2552_p8 = pnand %p2551_p5, %p2545_p10 }
  0x3e   : > { %2555 = shalt.err (!%p2552_p8)
}
  0x3f   : > { %s3963_s7 = smov 64   ;;  %s3965_s22 = smov 4  }
  0x40   : > { %2246 = dma.hbm_to_vmem [thread:$0]  (!%p3005_p9), %s2999_s6, 1024, %s3001_s8, %s3012_s13, %s3963_s7, %s3963_s7, %s3965_s22  }
  0x41   : > { %s291_s21 = scalar_lea.vmem [#allocation12], %s3009_s18  ;;  %p329_p1 = scmp.lt.s32.totalorder %s2832_s11, 5 }
  0x42   : > { %s3044_s26 = sshll.u32 %s291_s21, 4  ;;  %p3997_p2 = scmp.ge.s32.totalorder %s2832_s11, 1  ;;  %s3121_s26 = int_to_ptr.vmem [resolvable:$true] %s3044_s26 }
  0x43   : > { %s1928_s20 = sadd.s32 4294967294, %s2832_s11   ;;  %s45_s5 = sadd.s32 1, %s2828_s10 }
  0x44   : > { %p3049_p7 = pnand %p3997_p2, %p329_p1  ;;  %s73_s0 = sadd.s32 1, %s2812_s30 }
  0x45   : > { %s4059_s5 = smov (!%p2962_p0, %s45_s5), %s2828_s10  ;;  %p80_p10 = scmp.ne.s32.totalorder %s2812_s30, %s2808_s29 }
  0x46   : > { %s3998_s19 = scalar_select %p3049_p7, 1, 0 }
  0x47   : > { %p86_p3 = scmp.ne.s32.totalorder %s2808_s29, %s2804_s28  ;;  %p47_p6 = scmp.ge.s32.totalorder %s4059_s5, 2 }
  0x48   : > { %p190_p11 = scmp.eq.s32.totalorder %s2959_s12, 3  ;;  %p3999_p13 = scmp.eq.s32.totalorder %s2832_s11, 0 }
  0x49   : > { %p4001_p5 = scmp.eq.s32.totalorder %s2959_s12, 0  ;;  %s4061_s5 = smov (%p47_p6, %s4059_s5), 0 }
  0x4a   : > { %p3066_p4 = por %p3999_p13, %p80_p10  ;;  %4004 = sst [smem:[#allocation33_spill]] %s4061_s5 }
  0x4b   : > { %p3075_p8 = por %p4001_p5, %p86_p3  ;;  %p3081_p0 = por %p190_p11, %p80_p10 }
  0x4c   : > { %p196_p1 = scmp.eq.s32.totalorder %s1928_s20, 3  ;;  %s70_s18 = ssub.s32 %s2828_s10, %s4061_s5 }
  0x4d   : > { %s4002_s8 = scalar_select %p3075_p8, 1, 0 }
  0x4e   : > { %s4005_s14 = scalar_select %p3081_p0, 1, 0 }
  0x4f   : > { %4003 = sst [smem:[#allocation32_spill]] %s4002_s8  ;;  %s245_s21 = sand.u32 1, %s2812_s30  }
  0x50   : > { %4006 = sst [smem:[#allocation34_spill]] %s4005_s14  ;;  %p71_p2 = scmp.eq.s32.totalorder %s70_s18, 0 }
  0x51   : > { %s150_s7 = sor.u32 %s2978_s16, %s70_s18  ;;  %p3096_p6 = por %p196_p1, %p86_p3 }
  0x52   : > { %p3089_p13 = scmp.eq.s32.totalorder %s150_s7, 0  ;;  %s1931_s27 = sshll.u32 %s245_s21, 6 }
  0x53   : > { %s4008_s2 = scalar_select %p3096_p6, 1, 0 }
  0x54   : > { %s4007_s22 = scalar_select %p3089_p13, 1, 0 }
  0x55   : > { %4009 = sst [smem:[#allocation35_spill]] %s4008_s2  ;;  %s1985_s14 = sshll.u32 %s2828_s10, 10 }
  0x56   : > { %s3101_s17 = scalar_select %p71_p2, %s2812_s30, %s73_s0  }
  0x57   : > { %s3107_s5 = scalar_lea.hbm %s3948_s1, %s1985_s14  ;;  %s249_s16 = scalar_lea.vmem [#allocation7], %s1931_s27 }
  0x58   : > { %4010 = sst [smem:[#allocation36_spill]] %s3101_s17  ;;  %s256_s7 = sshll.u32 %s249_s16, 4  ;;  %s3109_s7 = int_to_ptr.vmem [resolvable:$true] %s256_s7 }
  0x59   : > { %p4011_p10 = scmp.lt.s32.totalorder %s2832_s11, 4  ;;  %s1987_s18 = sshll.u32 %s2824_s9, 11 }
  0x5a   : > { %s3126_s20 = scalar_lea.hbm %s3950_s3, %s1987_s18  ;;  %s3128_s27 = scalar_lea.sflag [#allocation8], %s245_s21 }
  0x5b   : > { %p3115_p3 = pnand %p4011_p10, %p3066_p4  ;;  %s2556_s16 = scalar_lea.hbm %s3107_s5, 1024 }
  0x5c   : > { %p2557_p11 = scmp.ne.s32.totalorder %s3107_s5, %s2556_s16  ;;  %s2561_s30 = scalar_lea.hbm %s3948_s1, 2048 }
  0x5d   : > { %p2558_p5 = pneg %p3115_p3  ;;  %p2562_p2 = scmp.lt.u32.totalorder %s3107_s5, %s3948_s1 }
  0x5e   : > { %p2563_p10 = scmp.lt.u32.totalorder %s2561_s30, %s2556_s16  ;;  %p2565_p6 = scmp.lt.u32.totalorder %s2556_s16, %s3107_s5 }
  0x5f   : > { %p2559_p4 = pnand %p2558_p5, %p2557_p11 }
  0x60   : > { %p2564_p12 = por %p2563_p10, %p2562_p2 }
  0x61   : > { %p2560_p1 = pneg %p2559_p4 }
  0x62   : > { %p2566_p0 = por %p2565_p6, %p2564_p12 }
  0x64   : > { %p2567_p8 = pnand %p2566_p0, %p2560_p1 }
  0x66   : > { %2570 = shalt.err (!%p2567_p8)
}
  0x67   : > { %s2571_s21 = scalar_lea.vmem %s3109_s7, 1024  ;;  %s2837_s17 = smov [#allocation7]  }
  0x68   : > { %p2572_p11 = scmp.ne.s32.totalorder %s3109_s7, %s2571_s21  ;;  %s2576_s18 = sshll.u32 %s2837_s17, 4  ;;  %s2577_s18 = int_to_ptr.vmem [resolvable:$false] %s2576_s18 }
  0x69   : > { %s2578_s2 = scalar_lea.vmem %s2577_s18, 2048  ;;  %p2579_p13 = scmp.lt.s32.totalorder %s3109_s7, %s2577_s18 }
  0x6a   : > { %p2574_p4 = pnand %p2572_p11, %p2558_p5  ;;  %p2580_p2 = scmp.lt.s32.totalorder %s2578_s2, %s2571_s21 }
  0x6c   : > { %p2575_p7 = pneg %p2574_p4  ;;  %p2581_p10 = por %p2580_p2, %p2579_p13 }
  0x6e   : > { %p2582_p12 = pnand %p2581_p10, %p2575_p7 }
  0x70   : > { %2585 = shalt.err (!%p2582_p12)
}
  0x71   : > { %s4013_s28 = smov 4   ;;  %s4014_s30 = smov 64  }
  0x72   : > { %2243 = dma.hbm_to_vmem [thread:$0]  (!%p3115_p3), %s3107_s5, 1024, %s3109_s7, %s3128_s27, %s4014_s30, %s4014_s30, %s4013_s28  }
  0x73   : > { %s2586_s8 = scalar_lea.hbm %s3126_s20, 2048  ;;  %p4015_p0 = pneg %p3005_p9 }
  0x74   : > { %p2587_p8 = scmp.ne.s32.totalorder %s3126_s20, %s2586_s8  ;;  %s2591_s16 = scalar_lea.hbm %s3950_s3, 4096 }
  0x75   : > { %p2592_p6 = scmp.lt.u32.totalorder %s3126_s20, %s3950_s3  ;;  %p2593_p5 = scmp.lt.u32.totalorder %s2591_s16, %s2586_s8 }
  0x76   : > { %p2589_p7 = pnand %p2587_p8, %p4015_p0  ;;  %p2595_p11 = scmp.lt.u32.totalorder %s2586_s8, %s3126_s20 }
  0x77   : > { %p2594_p1 = por %p2593_p5, %p2592_p6 }
  0x78   : > { %p2590_p13 = pneg %p2589_p7 }
  0x79   : > { %p2596_p4 = por %p2595_p11, %p2594_p1 }
  0x7b   : > { %p2597_p2 = pnand %p2596_p4, %p2590_p13 }
  0x7d   : > { %2600 = shalt.err (!%p2597_p2)
}
  0x7e   : > { %s2601_s5 = scalar_lea.vmem %s3121_s26, 2048  ;;  %p4016_p10 = pmov %p4015_p0 }
  0x7f   : > { %p2602_p3 = scmp.ne.s32.totalorder %s3121_s26, %s2601_s5  ;;  %s2838_s7 = smov [#allocation12]  }
  0x80   : > { %s2606_s27 = sshll.u32 %s2838_s7, 4  ;;  %s2607_s27 = int_to_ptr.vmem [resolvable:$false] %s2606_s27 }
  0x81   : > { %p2604_p12 = pnand %p2602_p3, %p4016_p10  ;;  %s2608_s17 = scalar_lea.vmem %s2607_s27, 4096 }
  0x82   : > { %p2609_p0 = scmp.lt.s32.totalorder %s3121_s26, %s2607_s27  ;;  %p2610_p7 = scmp.lt.s32.totalorder %s2608_s17, %s2601_s5 }
  0x83   : > { %p2605_p8 = pneg %p2604_p12 }
  0x84   : > { %p2611_p6 = por %p2610_p7, %p2609_p0 }
  0x86   : > { %p2612_p5 = pnand %p2611_p6, %p2605_p8 }
  0x88   : > { %2615 = shalt.err (!%p2612_p5)
}
  0x89   : > { %s2839_s18 = smov 128   ;;  %s2840_s2 = smov 8  }
  0x8a   : > { %2249 = dma.hbm_to_vmem [thread:$0]  (!%p3005_p9), %s3126_s20, 2048, %s3121_s26, %s3012_s13, %s2839_s18, %s2839_s18, %s2840_s2  }
  0x8b   : > { %s153_s8 = sadd.s32 1, %s2788_s25  ;;  %p160_p13 = scmp.ne.s32.totalorder %s2788_s25, %s2784_s24 }
  0x8c   : > { %p4017_p1 = scmp.ne.s32.totalorder %s4007_s22, 0  ;;  %p4018_p11 = scmp.eq.s32.totalorder %s2832_s11, 0 }
  0x8d   : > { %p166_p2 = scmp.ne.s32.totalorder %s2784_s24, %s2780_s23  ;;  %s308_s0 = sand.u32 1, %s2788_s25  }
  0x8e   : > { %s3191_s14 = scalar_select %p4017_p1, %s2788_s25, %s153_s8  }
  0x8f   : > { %p162_p4 = por %p160_p13, %p4018_p11  ;;  %s1988_s16 = sshll.u32 %s2828_s10, 5 }
  0x90   : > { %p4019_p3 = scmp.eq.s32.totalorder %s2959_s12, 0  ;;  %s1940_s15 = sshll.u32 %s308_s0, 6 }
  0x91   : > { %s318_s21 = sadd.s32 %s2824_s9, %s1988_s16  ;;  %s312_s23 = scalar_lea.vmem [#allocation13], %s1940_s15 }
  0x92   : > { %p3201_p10 = por %p166_p2, %p4019_p3  ;;  %s1943_s5 = sshll.u32 %s318_s21, 6 }
  0x93   : > { %s3209_s20 = scalar_lea.hbm %s3951_s4, %s1943_s5  ;;  %s321_s22 = sshll.u32 %s312_s23, 4  ;;  %s3211_s22 = int_to_ptr.vmem [resolvable:$true] %s321_s22 }
  0x94   : > { %p4021_p9 = scmp.lt.s32.totalorder %s2832_s11, 4  ;;  %s3219_s27 = scalar_lea.sflag [#allocation14], %s308_s0 }
  0x95   : > { %s2616_s17 = scalar_lea.hbm %s3209_s20, 1024  ;;  %s2621_s16 = scalar_lea.hbm %s3951_s4, 4096 }
  0x96   : > { %p3215_p12 = pnand %p4021_p9, %p162_p4  ;;  %p2617_p8 = scmp.ne.s32.totalorder %s3209_s20, %s2616_s17 }
  0x97   : > { %p2622_p5 = scmp.lt.u32.totalorder %s3209_s20, %s3951_s4  ;;  %p2623_p13 = scmp.lt.u32.totalorder %s2621_s16, %s2616_s17 }
  0x98   : > { %p2618_p0 = pneg %p3215_p12  ;;  %p2625_p11 = scmp.lt.u32.totalorder %s2616_s17, %s3209_s20 }
  0x99   : > { %p2624_p1 = por %p2623_p13, %p2622_p5 }
  0x9a   : > { %p2619_p7 = pnand %p2618_p0, %p2617_p8 }
  0x9b   : > { %p2626_p4 = por %p2625_p11, %p2624_p1 }
  0x9c   : > { %p2620_p6 = pneg %p2619_p7 }
  0x9e   : > { %p2627_p2 = pnand %p2626_p4, %p2620_p6 }
  0xa0   : > { %2630 = shalt.err (!%p2627_p2)
}
  0xa1   : > { %s2631_s0 = scalar_lea.vmem %s3211_s22, 1024  ;;  %s2841_s5 = smov [#allocation13]  }
  0xa2   : > { %p2632_p3 = scmp.ne.s32.totalorder %s3211_s22, %s2631_s0  ;;  %s2636_s13 = sshll.u32 %s2841_s5, 4  ;;  %s2637_s13 = int_to_ptr.vmem [resolvable:$false] %s2636_s13 }
  0xa3   : > { %s2638_s26 = scalar_lea.vmem %s2637_s13, 2048  ;;  %p2639_p7 = scmp.lt.s32.totalorder %s3211_s22, %s2637_s13 }
  0xa4   : > { %p2634_p9 = pnand %p2632_p3, %p2618_p0  ;;  %p2640_p5 = scmp.lt.s32.totalorder %s2638_s26, %s2631_s0 }
  0xa6   : > { %p2635_p8 = pneg %p2634_p9  ;;  %p2641_p13 = por %p2640_p5, %p2639_p7 }
  0xa8   : > { %p2642_p1 = pnand %p2641_p13, %p2635_p8 }
  0xaa   : > { %2645 = shalt.err (!%p2642_p1)
}
  0xab   : > { %2252 = dma.hbm_to_vmem [thread:$0]  (!%p3215_p12), %s3209_s20, 1024, %s3211_s22, %s3219_s27, %s2839_s18, %s4014_s30, %s4013_s28  }
  0xac   : > { %p4023_p0 = scmp.ne.s32.totalorder %s3998_s19, 0 }
  0xad   : > { %s4024_s23 = sld [smem:[#allocation32_spill]] (!%p4023_p0)  ;;  %s3253_s17 = sand.u32 (!%p4023_p0), 1, %s2808_s29  }
  0xae   : > { %333 = sbr.rel (%p4023_p0) target bundleno = 1413 (0x585), region = 40  ;;  %s1945_s2 = sshll.u32 (!%p4023_p0), %s3253_s17, 6 }
  0xaf   : > { %s336_s8 = scalar_lea.sflag (!%p4023_p0), [#allocation8], %s3253_s17  ;;  %s3257_s16 = scalar_lea.vmem (!%p4023_p0), [#allocation7], %s1945_s2 }
  0xb3   : > { %p4025_p6 = scmp.ne.s32.totalorder (!%p4023_p0), %s4024_s23, 0 }
  0xb5   : > { %2759 = dma.done.wait (%p4025_p6), %s336_s8, 1024  }
  0xb6   : > { %2761 = vsyncadd (%p4025_p6), %s336_s8, 4294966272  ;;  %s4026_s28 = sld [smem:[#allocation23_spill]]  ;;  %s4027_s30 = sld [smem:[#allocation30_spill]] }
  0xb7   : > { %s344_s19 = sand.u32 1, %s2959_s12  }
  0xb8   : > { %s345_s22 = scalar_lea.sflag [#allocation11], %s344_s19 }
  0xbc   : > { %s346_s18 = sand.u32 1, %s4026_s28   ;;  %p4028_p12 = scmp.ne.s32.totalorder %s4027_s30, 0 }
  0xbd   : > { %s1946_s20 = sshll.u32 %s346_s18, 6 }
  0xbe   : > { %s3265_s7 = scalar_lea.vmem [#allocation10], %s1946_s20 }
  0xbf   : > { %2763 = dma.done.wait (%p4028_p12), %s345_s22, 3072  }
  0xc0   : > { %2765 = vsyncadd (%p4028_p12), %s345_s22, 4294964224  ;;  %s1947_s27 = sshll.u32 %s346_s18, 7  ;;  %s362_s15 = sand.u32 1, %s2784_s24  }
  0xc1   : > { %s1948_s21 = sshll.u32 %s362_s15, 6  ;;  %s3272_s0 = scalar_lea.vmem [#allocation12], %s1947_s27 }
  0xc2   : > { %s363_s5 = scalar_lea.sflag [#allocation14], %s362_s15  ;;  %s3274_s13 = scalar_lea.vmem [#allocation13], %s1948_s21 }
  0xc3   : > { %2767 = dma.done.wait (%p3201_p10), %s363_s5, 1024  }
  0xc4   : > { %2769 = vsyncadd (%p3201_p10), %s363_s5, 4294966272  ;;  %s1949_s12 = sshll.u32 %s3253_s17, 7  ;;  %s3283_s23 = scalar_lea.vmem [#allocation16], %s1945_s2 }
  0xc5   : > { %s3281_s26 = scalar_lea.vmem [#allocation15], %s1949_s12  ;;  %s4029_s8 = sld [smem:[#allocation27_spill]] }
  0xcb   : > { %p1951_p11 = scmp.ne.s32.totalorder %s4029_s8, 0 }
  0xcc   : > { %vm426_vm0 = vcmask (!%p1951_p11), 7168   ;;  %s3286_s28 = sld [smem:[#allocation6]] (!%p1951_p11)  ;;  %v3289_v0 = vld [vmem:[%s3257_s16] sm:$0xff] (!%p1951_p11)   ;;  %v2842_v1 = vmov (!%p1951_p11), -inf   ;;  %v2843_v2 = vmov (!%p1951_p11), 0.0   ;;  %v2111_v3 = vld [vmem:[%s3257_s16 + $0x8] sm:$0xff] (!%p1951_p11)  }
  0xcd   : > { %425 = sbr.rel (%p1951_p11) target bundleno = 233 (0xe9), region = 60  ;;  %427 = vst.msk [vmem:[#allocation3] sm:$0xff] (!%p1951_p11), %vm426_vm0, %v2842_v1  ;;  %428 = vst.msk [vmem:[#allocation3 + $0x8] sm:$0xff] (!%p1951_p11), %vm426_vm0, %v2842_v1  ;;  %v2112_v4 = vld [vmem:[%s3257_s16 + $0x10] sm:$0xff] (!%p1951_p11)   ;;  %v2113_v5 = vld [vmem:[%s3257_s16 + $0x18] sm:$0xff] (!%p1951_p11)   ;;  %v2009_v6 = vunpack.c.l.bf16 (!%p1951_p11), %v3289_v0  ;;  %v2010_v10 = vunpack.c.h.bf16 (!%p1951_p11), %v3289_v0  ;;  %v2013_v11 = vunpack.c.l.bf16 (!%p1951_p11), %v2111_v3  ;;  %v2014_v12 = vunpack.c.h.bf16 (!%p1951_p11), %v2111_v3 }
  0xce   : > { %429 = vst.msk [vmem:[#allocation3 + $0x10] sm:$0xff] (!%p1951_p11), %vm426_vm0, %v2842_v1  ;;  %430 = vst.msk [vmem:[#allocation3 + $0x18] sm:$0xff] (!%p1951_p11), %vm426_vm0, %v2842_v1  ;;  %v2114_v7 = vld [vmem:[%s3257_s16 + $0x20] sm:$0xff] (!%p1951_p11)   ;;  %v2115_v8 = vld [vmem:[%s3257_s16 + $0x28] sm:$0xff] (!%p1951_p11)   ;;  %v2017_v13 = vunpack.c.l.bf16 (!%p1951_p11), %v2112_v4  ;;  %v2018_v15 = vunpack.c.h.bf16 (!%p1951_p11), %v2112_v4  ;;  %v2021_v16 = vunpack.c.l.bf16 (!%p1951_p11), %v2113_v5  ;;  %v2022_v17 = vunpack.c.h.bf16 (!%p1951_p11), %v2113_v5 }
  0xcf   : > { %431 = vst.msk [vmem:[#allocation3 + $0x20] sm:$0xff] (!%p1951_p11), %vm426_vm0, %v2842_v1  ;;  %432 = vst.msk [vmem:[#allocation3 + $0x28] sm:$0xff] (!%p1951_p11), %vm426_vm0, %v2842_v1  ;;  %v2116_v9 = vld [vmem:[%s3257_s16 + $0x30] sm:$0xff] (!%p1951_p11)   ;;  %v2117_v14 = vld [vmem:[%s3257_s16 + $0x38] sm:$0xff] (!%p1951_p11)   ;;  %v2025_v18 = vunpack.c.l.bf16 (!%p1951_p11), %v2114_v7  ;;  %v2026_v19 = vunpack.c.h.bf16 (!%p1951_p11), %v2114_v7  ;;  %v2029_v20 = vunpack.c.l.bf16 (!%p1951_p11), %v2115_v8  ;;  %v2030_v21 = vunpack.c.h.bf16 (!%p1951_p11), %v2115_v8 }
  0xd0   : > { %433 = vst.msk [vmem:[#allocation3 + $0x30] sm:$0xff] (!%p1951_p11), %vm426_vm0, %v2842_v1  ;;  %434 = vst.msk [vmem:[#allocation3 + $0x38] sm:$0xff] (!%p1951_p11), %vm426_vm0, %v2842_v1  ;;  %v2033_v22 = vunpack.c.l.bf16 (!%p1951_p11), %v2116_v9  ;;  %v2034_v24 = vunpack.c.h.bf16 (!%p1951_p11), %v2116_v9  ;;  %v2037_v25 = vunpack.c.l.bf16 (!%p1951_p11), %v2117_v14  ;;  %v2038_v26 = vunpack.c.h.bf16 (!%p1951_p11), %v2117_v14 }
  0xd1   : > { %435 = vst.msk [vmem:[#allocation3 + $0x40] sm:$0xff] (!%p1951_p11), %vm426_vm0, %v2842_v1  ;;  %436 = vst.msk [vmem:[#allocation3 + $0x48] sm:$0xff] (!%p1951_p11), %vm426_vm0, %v2842_v1 }
  0xd2   : > { %437 = vst.msk [vmem:[#allocation3 + $0x50] sm:$0xff] (!%p1951_p11), %vm426_vm0, %v2842_v1  ;;  %438 = vst.msk [vmem:[#allocation3 + $0x58] sm:$0xff] (!%p1951_p11), %vm426_vm0, %v2842_v1  ;;  %v508_v23 = vstv (!%p1951_p11), %s3286_s28 }
  0xd3   : > { %439 = vst.msk [vmem:[#allocation3 + $0x60] sm:$0xff] (!%p1951_p11), %vm426_vm0, %v2842_v1  ;;  %440 = vst.msk [vmem:[#allocation3 + $0x68] sm:$0xff] (!%p1951_p11), %vm426_vm0, %v2842_v1  ;;  %v509_v27 = vmul.f32 (!%p1951_p11), %v2009_v6, %v508_v23  ;;  %v510_v28 = vmul.f32 (!%p1951_p11), %v2010_v10, %v508_v23  ;;  %v511_v29 = vmul.f32 (!%p1951_p11), %v2013_v11, %v508_v23 }
  0xd4   : > { %441 = vst.msk [vmem:[#allocation3 + $0x70] sm:$0xff] %vm426_vm0, %v2842_v1  ;;  %442 = vst.msk [vmem:[#allocation3 + $0x78] sm:$0xff] %vm426_vm0, %v2842_v1  ;;  %v512_v30 = vmul.f32 %v2014_v12, %v508_v23  ;;  %v513_v31 = vmul.f32 %v2017_v13, %v508_v23  ;;  %v514_v32 = vmul.f32 %v2018_v15, %v508_v23 }
  0xd5   : > { %443 = vst.msk [vmem:[#allocation4] sm:$0xff] %vm426_vm0, %v2843_v2  ;;  %444 = vst.msk [vmem:[#allocation4 + $0x8] sm:$0xff] %vm426_vm0, %v2843_v2  ;;  %v515_v33 = vmul.f32 %v2021_v16, %v508_v23  ;;  %v516_v34 = vmul.f32 %v2022_v17, %v508_v23  ;;  %v525_v35 = vpack.c.bf16 %v510_v28, %v509_v27 }
  0xd6   : > { %445 = vst.msk [vmem:[#allocation4 + $0x10] sm:$0xff] %vm426_vm0, %v2843_v2  ;;  %446 = vst.msk [vmem:[#allocation4 + $0x18] sm:$0xff] %vm426_vm0, %v2843_v2  ;;  %v526_v36 = vpack.c.bf16 %v512_v30, %v511_v29  ;;  %v517_v37 = vmul.f32 %v2025_v18, %v508_v23  ;;  %v518_v38 = vmul.f32 %v2026_v19, %v508_v23 }
  0xd7   : > { %447 = vst.msk [vmem:[#allocation4 + $0x20] sm:$0xff] %vm426_vm0, %v2843_v2  ;;  %448 = vst.msk [vmem:[#allocation4 + $0x28] sm:$0xff] %vm426_vm0, %v2843_v2  ;;  %v527_v39 = vpack.c.bf16 %v514_v32, %v513_v31  ;;  %v528_v40 = vpack.c.bf16 %v516_v34, %v515_v33  ;;  %v519_v41 = vmul.f32 %v2029_v20, %v508_v23 }
  0xd8   : > { %449 = vst.msk [vmem:[#allocation4 + $0x30] sm:$0xff] %vm426_vm0, %v2843_v2  ;;  %450 = vst.msk [vmem:[#allocation4 + $0x38] sm:$0xff] %vm426_vm0, %v2843_v2  ;;  %v520_v42 = vmul.f32 %v2030_v21, %v508_v23  ;;  %v529_v43 = vpack.c.bf16 %v518_v38, %v517_v37  ;;  %v521_v44 = vmul.f32 %v2033_v22, %v508_v23 }
  0xd9   : > { %451 = vst.msk [vmem:[#allocation4 + $0x40] sm:$0xff] %vm426_vm0, %v2843_v2  ;;  %452 = vst.msk [vmem:[#allocation4 + $0x48] sm:$0xff] %vm426_vm0, %v2843_v2  ;;  %v522_v45 = vmul.f32 %v2034_v24, %v508_v23  ;;  %v523_v46 = vmul.f32 %v2037_v25, %v508_v23  ;;  %v524_v48 = vmul.f32 %v2038_v26, %v508_v23 }
  0xda   : > { %453 = vst.msk [vmem:[#allocation4 + $0x50] sm:$0xff] %vm426_vm0, %v2843_v2  ;;  %454 = vst.msk [vmem:[#allocation4 + $0x58] sm:$0xff] %vm426_vm0, %v2843_v2  ;;  %v530_v47 = vpack.c.bf16 %v520_v42, %v519_v41 }
  0xdb   : > { %455 = vst.msk [vmem:[#allocation4 + $0x60] sm:$0xff] %vm426_vm0, %v2843_v2  ;;  %456 = vst.msk [vmem:[#allocation4 + $0x68] sm:$0xff] %vm426_vm0, %v2843_v2  ;;  %v531_v49 = vpack.c.bf16 %v522_v45, %v521_v44  ;;  %v532_v50 = vpack.c.bf16 %v524_v48, %v523_v46 }
  0xdc   : > { %457 = vst.msk [vmem:[#allocation4 + $0x70] sm:$0xff] %vm426_vm0, %v2843_v2  ;;  %458 = vst.msk [vmem:[#allocation4 + $0x78] sm:$0xff] %vm426_vm0, %v2843_v2 }
  0xdd   : > { %459 = vst [vmem:[#allocation5] sm:$0xff] %v2843_v2  ;;  %460 = vst [vmem:[#allocation5 + $0x8] sm:$0xff] %v2843_v2 }
  0xde   : > { %461 = vst [vmem:[#allocation5 + $0x10] sm:$0xff] %v2843_v2  ;;  %462 = vst [vmem:[#allocation5 + $0x18] sm:$0xff] %v2843_v2 }
  0xdf   : > { %463 = vst [vmem:[#allocation5 + $0x20] sm:$0xff] %v2843_v2  ;;  %464 = vst [vmem:[#allocation5 + $0x28] sm:$0xff] %v2843_v2 }
  0xe0   : > { %465 = vst [vmem:[#allocation5 + $0x30] sm:$0xff] %v2843_v2  ;;  %466 = vst [vmem:[#allocation5 + $0x38] sm:$0xff] %v2843_v2 }
  0xe1   : > { %467 = vst [vmem:[#allocation5 + $0x40] sm:$0xff] %v2843_v2  ;;  %468 = vst [vmem:[#allocation5 + $0x48] sm:$0xff] %v2843_v2 }
  0xe2   : > { %469 = vst [vmem:[#allocation5 + $0x50] sm:$0xff] %v2843_v2  ;;  %470 = vst [vmem:[#allocation5 + $0x58] sm:$0xff] %v2843_v2 }
  0xe3   : > { %471 = vst [vmem:[#allocation5 + $0x60] sm:$0xff] %v2843_v2  ;;  %472 = vst [vmem:[#allocation5 + $0x68] sm:$0xff] %v2843_v2 }
  0xe4   : > { %473 = vst [vmem:[#allocation5 + $0x70] sm:$0xff] %v2843_v2  ;;  %474 = vst [vmem:[#allocation5 + $0x78] sm:$0xff] %v2843_v2 }
  0xe5   : > { %533 = vst [vmem:[#allocation2] sm:$0xff] %v525_v35  ;;  %534 = vst [vmem:[#allocation2 + $0x8] sm:$0xff] %v526_v36 }
  0xe6   : > { %535 = vst [vmem:[#allocation2 + $0x10] sm:$0xff] %v527_v39  ;;  %536 = vst [vmem:[#allocation2 + $0x18] sm:$0xff] %v528_v40 }
  0xe7   : > { %537 = vst [vmem:[#allocation2 + $0x20] sm:$0xff] %v529_v43  ;;  %538 = vst [vmem:[#allocation2 + $0x28] sm:$0xff] %v530_v47 }
  0xe8   : > { %539 = vst [vmem:[#allocation2 + $0x30] sm:$0xff] %v531_v49  ;;  %540 = vst [vmem:[#allocation2 + $0x38] sm:$0xff] %v532_v50 }
  0xe9 PF: > { %v2388_v51 = vld [vmem:[%s3265_s7] sm:$0xff]   ;;  %v2389_v52 = vld [vmem:[%s3265_s7 + $0x8] sm:$0xff]   ;;  %v2390_v53 = vld [vmem:[%s3265_s7 + $0x10] sm:$0xff]   ;;  %v2844_v41 = vmov 0   ;;  %vm1062_vm1 = vcmask 7168   ;;  %s4030_s6 = sld [smem:[#allocation27_spill]] }
  0xea   : > { %2164 = vmatprep.subr.bf16.mxu0 %v2388_v51  ;;  %v2391_v55 = vld [vmem:[%s3265_s7 + $0x18] sm:$0xff]   ;;  %v2392_v56 = vld [vmem:[%s3265_s7 + $0x20] sm:$0xff]   ;;  %v2393_v57 = vld [vmem:[%s3265_s7 + $0x28] sm:$0xff]   ;;  %2387 = vset.pattern.permute.xlu1 %v2844_v41 }
  0xeb   : > { %2165 = vmatpush3.bf16.xpose.msra.mxu0 %v2388_v51  ;;  %v2394_v58 = vld [vmem:[%s3265_s7 + $0x30] sm:$0xff]   ;;  %v2395_v59 = vld [vmem:[%s3265_s7 + $0x38] sm:$0xff]   ;;  %v2118_v3 = vld [vmem:[%s3274_s13 + $0x8] sm:$0xff]   ;;  %2386 = vset.pattern.permute.xlu0 %v2844_v41 }
  0xec   : > { %2166 = vmatprep.subr.bf16.mxu0 %v2389_v52  ;;  %v541_v54 = vld [vmem:[#allocation2] sm:$0xff]  ;;  %v542_v60 = vld [vmem:[#allocation2 + $0x8] sm:$0xff]  ;;  %v2045_v5 = vunpack.c.l.bf16 %v2118_v3  ;;  %v2046_v10 = vunpack.c.h.bf16 %v2118_v3  ;;  %v2119_v15 = vld [vmem:[%s3274_s13 + $0x10] sm:$0xff]  }
  0xed   : > { %2180 = vmatprep.mubr.bf16.mxu0 %v541_v54  ;;  %v543_v61 = vld [vmem:[#allocation2 + $0x10] sm:$0xff]  ;;  %v544_v62 = vld [vmem:[#allocation2 + $0x18] sm:$0xff]  ;;  %v2040_v4 = vld [vmem:[%s3274_s13] sm:$0xff]   ;;  %v2049_v19 = vunpack.c.l.bf16 %v2119_v15  ;;  %v2050_v27 = vunpack.c.h.bf16 %v2119_v15 }
  0xee   : > { %v545_v63 = vld [vmem:[#allocation2 + $0x20] sm:$0xff]  ;;  %v546_v0 = vld [vmem:[#allocation2 + $0x28] sm:$0xff]  ;;  %v2041_v6 = vunpack.c.l.bf16 %v2040_v4  ;;  %v2042_v13 = vunpack.c.h.bf16 %v2040_v4  ;;  %v2120_v18 = vld [vmem:[%s3274_s13 + $0x18] sm:$0xff]  }
  0xef   : > { %v547_v1 = vld [vmem:[#allocation2 + $0x30] sm:$0xff]  ;;  %v548_v2 = vld [vmem:[#allocation2 + $0x38] sm:$0xff]  ;;  %v2054_v20 = vunpack.c.h.bf16 %v2120_v18  ;;  %v2053_v23 = vunpack.c.l.bf16 %v2120_v18  ;;  %v2121_v29 = vld [vmem:[%s3274_s13 + $0x20] sm:$0xff]   ;;  %p1960_p10 = scmp.ne.s32.totalorder %s4030_s6, 1 }
  0xf0   : > { %v2122_v30 = vld [vmem:[%s3274_s13 + $0x28] sm:$0xff]   ;;  %v2057_v32 = vunpack.c.l.bf16 %v2121_v29  ;;  %v2058_v38 = vunpack.c.h.bf16 %v2121_v29  ;;  %v2123_v44 = vld [vmem:[%s3274_s13 + $0x30] sm:$0xff]   ;;  %v2124_v46 = vld [vmem:[%s3274_s13 + $0x38] sm:$0xff]  }
  0xf1   : > { %v2062_v34 = vunpack.c.h.bf16 %v2122_v30  ;;  %v2061_v35 = vunpack.c.l.bf16 %v2122_v30  ;;  %v2065_v48 = vunpack.c.l.bf16 %v2123_v44  ;;  %v2070_v49 = vunpack.c.h.bf16 %v2124_v46  ;;  %v3403_v3 = vld [vmem:[#allocation3] sm:$0xff] }
  0xf2   : > { %v2069_v50 = vunpack.c.l.bf16 %v2124_v46  ;;  %v1210_v46 = vld [vmem:[%s3272_s0 + $0x58] sm:$0xff] }
  0xf3   : > { %2167 = vmatpush3.bf16.xpose.msra.mxu0 %v2389_v52 }
  0xf4   : > { %2168 = vmatprep.subr.bf16.mxu0 %v2390_v53 }
  0xfb   : > { %2169 = vmatpush3.bf16.xpose.msra.mxu0 %v2390_v53  ;;  %v2066_v53 = vunpack.c.h.bf16 %v2123_v44  ;;  %v1209_v44 = vld [vmem:[%s3272_s0 + $0x50] sm:$0xff] }
  0xfc   : > { %2170 = vmatprep.subr.bf16.mxu0 %v2391_v55 }
 0x103   : > { %2171 = vmatpush3.bf16.xpose.msra.mxu0 %v2391_v55 }
 0x104   : > { %2172 = vmatprep.subr.bf16.mxu0 %v2392_v56 }
 0x10b   : > { %2173 = vmatpush3.bf16.xpose.msra.mxu0 %v2392_v56 }
 0x10c   : > { %2174 = vmatprep.subr.bf16.mxu0 %v2393_v57 }
 0x113   : > { %2175 = vmatpush3.bf16.xpose.msra.mxu0 %v2393_v57 }
 0x114   : > { %2176 = vmatprep.subr.bf16.mxu0 %v2394_v58 }
 0x11b   : > { %2177 = vmatpush3.bf16.xpose.msra.mxu0 %v2394_v58 }
 0x11c   : > { %2178 = vmatprep.subr.bf16.mxu0 %v2395_v59 }
 0x123   : > { %2179 = vmatpush3.bf16.xpose.msra.mxu0 %v2395_v59 }
 0x12a   : > { %2181 = vmatmul.mubr.bf16.vlgmr.msra.gmra.mrb[0].mxu0 %v542_v60  ;;  %v1199_v60 = vld [vmem:[%s3272_s0] sm:$0xff] }
 0x12b   : > { %2184 = vmatprep.mubr.bf16.mxu0 %v543_v61  ;;  %v1200_v61 = vld [vmem:[%s3272_s0 + $0x8] sm:$0xff] }
 0x132   : > { %2185 = vmatmul.mubr.bf16.gmra.mrb[4].mxu0 %v544_v62  ;;  %v1201_v62 = vld [vmem:[%s3272_s0 + $0x10] sm:$0xff] }
 0x133   : > { %2188 = vmatprep.mubr.bf16.mxu0 %v545_v63  ;;  %v1215_v63 = vpack.c.bf16 %v1200_v61, %v1199_v60  ;;  %v1212_v60 = vld [vmem:[%s3272_s0 + $0x68] sm:$0xff] }
 0x135   : > { %2196 = vmatprep.subr.bf16.mxu1 %v1215_v63 }
 0x136   : > { %2197 = vmatpush3.bf16.msra.mxu1 %v1215_v63 }
 0x13a   : > { %2189 = vmatmul.mubr.bf16.gmra.mrb[8].mxu0 %v546_v0  ;;  %v1202_v0 = vld [vmem:[%s3272_s0 + $0x18] sm:$0xff] }
 0x13b   : > { %2192 = vmatprep.mubr.bf16.mxu0 %v547_v1  ;;  %v1216_v1 = vpack.c.bf16 %v1202_v0, %v1201_v62  ;;  %v3482_v62 = vld [vmem:[#allocation3 + $0x50] sm:$0xff]  ;;  %v3487_v0 = vld [vmem:[#allocation3 + $0x48] sm:$0xff] }
 0x13d   : > { %2198 = vmatprep.subr.bf16.mxu1 %v1216_v1 }
 0x13e   : > { %2199 = vmatpush3.bf16.msra.mxu1 %v1216_v1 }
 0x142   : > { %2193 = vmatmul.mubr.bf16.gmra.mrb[12].mxu0 %v548_v2  ;;  %v3401_v2 = vld [vmem:[#allocation3 + $0x10] sm:$0xff] }
 0x1fd   : > { %v2182_v7 = vpop.f32.mrb[0].mxu0 }
 0x1fe   : > { %v3343_v8 = vadd.f32 %v2182_v7, %v2045_v5  ;;  %v679_v9 = vpop.f32.mrb[1].mxu0 }
 0x1ff   : > { %v3345_v11 = vadd.f32 %v2041_v6, %v679_v9  ;;  %v2183_v12 = vpop.f32.mrb[2].mxu0  ;;  %v3411_v9 = vld [vmem:[#allocation3 + $0x18] sm:$0xff] }
 0x200   : > { %762 = vmax.xlane.f32.xlu1 %v3343_v8  ;;  %v682_v14 = vpop.f32.mrb[3].mxu0  ;;  %v3350_v16 = vadd.f32 %v2183_v12, %v2046_v10  ;;  %v1203_v10 = vld [vmem:[%s3272_s0 + $0x20] sm:$0xff]  ;;  %v1204_v12 = vld [vmem:[%s3272_s0 + $0x28] sm:$0xff] }
 0x201   : > { %758 = vmax.xlane.f32.xlu0 %v3345_v11  ;;  %v3352_v17 = vadd.f32 %v2042_v13, %v682_v14  ;;  %v3418_v13 = vld [vmem:[#allocation3 + $0x8] sm:$0xff]  ;;  %v1217_v14 = vpack.c.bf16 %v1204_v12, %v1203_v10  ;;  %v1213_v12 = vld [vmem:[%s3272_s0 + $0x70] sm:$0xff] }
 0x203   : > { %2200 = vmatprep.subr.bf16.mxu1 %v1217_v14 }
 0x204   : > { %764 = vmax.xlane.f32.xlu1 %v3350_v16  ;;  %2201 = vmatpush3.bf16.msra.mxu1 %v1217_v14  ;;  %v1214_v14 = vld [vmem:[%s3272_s0 + $0x78] sm:$0xff] }
 0x205   : > { %v2186_v21 = vpop.f32.mrb[4].mxu0  ;;  %760 = vmax.xlane.f32.xlu0 %v3352_v17 }
 0x206   : > { %v695_v22 = vpop.f32.mrb[5].mxu0  ;;  %v3365_v31 = vadd.f32 %v2186_v21, %v2053_v23  ;;  %v1205_v21 = vld [vmem:[%s3272_s0 + $0x30] sm:$0xff]  ;;  %v3434_v23 = vld [vmem:[#allocation3 + $0x20] sm:$0xff] }
 0x207   : > { %v3357_v24 = vadd.f32 %v2049_v19, %v695_v22  ;;  %v2187_v25 = vpop.f32.mrb[6].mxu0  ;;  %v1206_v22 = vld [vmem:[%s3272_s0 + $0x38] sm:$0xff] }
 0x208   : > { %v3359_v26 = vadd.f32 %v2187_v25, %v2054_v20  ;;  %v698_v28 = vpop.f32.mrb[7].mxu0  ;;  %v1218_v25 = vpack.c.bf16 %v1206_v22, %v1205_v21  ;;  %v1222_v21 = vpack.c.bf16 %v1214_v14, %v1213_v12  ;;  %v3506_v22 = vld [vmem:[#allocation3 + $0x78] sm:$0xff] }
 0x209   : > { %766 = vmax.xlane.f32.xlu0 %v3357_v24  ;;  %v3367_v33 = vadd.f32 %v2050_v27, %v698_v28  ;;  %v3438_v27 = vld [vmem:[#allocation3 + $0x38] sm:$0xff] }
 0x20a   : > { %772 = vmax.xlane.f32.xlu1 %v3359_v26  ;;  %2202 = vmatprep.subr.bf16.mxu1 %v1218_v25 }
 0x20b   : > { %2203 = vmatpush3.bf16.msra.mxu1 %v1218_v25 }
 0x20d   : > { %v2190_v36 = vpop.f32.mrb[8].mxu0  ;;  %770 = vmax.xlane.f32.xlu0 %v3365_v31 }
 0x20e   : > { %v711_v37 = vpop.f32.mrb[9].mxu0  ;;  %768 = vmax.xlane.f32.xlu1 %v3367_v33  ;;  %v3376_v45 = vadd.f32 %v2190_v36, %v2061_v35  ;;  %v3449_v36 = vld [vmem:[#allocation3 + $0x30] sm:$0xff] }
 0x20f   : > { %v3371_v39 = vadd.f32 %v2057_v32, %v711_v37  ;;  %v2191_v40 = vpop.f32.mrb[10].mxu0  ;;  %v1207_v32 = vld [vmem:[%s3272_s0 + $0x40] sm:$0xff] }
 0x210   : > { %v3373_v42 = vadd.f32 %v2191_v40, %v2062_v34  ;;  %v714_v43 = vpop.f32.mrb[11].mxu0  ;;  %v1208_v34 = vld [vmem:[%s3272_s0 + $0x48] sm:$0xff] }
 0x211   : > { %774 = vmax.xlane.f32.xlu0 %v3371_v39  ;;  %v3381_v47 = vadd.f32 %v2058_v38, %v714_v43  ;;  %v1219_v37 = vpack.c.bf16 %v1208_v34, %v1207_v32  ;;  %v3453_v38 = vld [vmem:[#allocation3 + $0x28] sm:$0xff]  ;;  %v3519_v34 = vld [vmem:[#allocation3 + $0x70] sm:$0xff] }
 0x212   : > { %780 = vmax.xlane.f32.xlu1 %v3373_v42 }
 0x213   : > { %2204 = vmatprep.subr.bf16.mxu1 %v1219_v37 }
 0x214   : > { %2205 = vmatpush3.bf16.msra.mxu1 %v1219_v37  ;;  %v755_v37 = vld [vmem:[#allocation3 + $0x68] sm:$0xff] }
 0x215   : > { %v2194_v51 = vpop.f32.mrb[12].mxu0  ;;  %778 = vmax.xlane.f32.xlu0 %v3376_v45 }
 0x216   : > { %v727_v52 = vpop.f32.mrb[13].mxu0  ;;  %776 = vmax.xlane.f32.xlu1 %v3381_v47  ;;  %v3389_v58 = vadd.f32 %v2194_v51, %v2069_v50  ;;  %v1220_v50 = vpack.c.bf16 %v1210_v46, %v1209_v44  ;;  %v3470_v51 = vld [vmem:[#allocation3 + $0x58] sm:$0xff] }
 0x217   : > { %v3385_v54 = vadd.f32 %v2065_v48, %v727_v52  ;;  %v2195_v55 = vpop.f32.mrb[14].mxu0 }
 0x218   : > { %v3387_v56 = vadd.f32 %v2195_v55, %v2070_v49  ;;  %v730_v57 = vpop.f32.mrb[15].mxu0  ;;  %v3465_v49 = vld [vmem:[#allocation3 + $0x40] sm:$0xff]  ;;  %2206 = vmatprep.subr.bf16.mxu1 %v1220_v50 }
 0x219   : > { %782 = vmax.xlane.f32.xlu0 %v3385_v54  ;;  %v3393_v59 = vadd.f32 %v2066_v53, %v730_v57  ;;  %2207 = vmatpush3.bf16.msra.mxu1 %v1220_v50  ;;  %v1211_v57 = vld [vmem:[%s3272_s0 + $0x60] sm:$0xff] }
 0x21a   : > { %788 = vmax.xlane.f32.xlu1 %v3387_v56  ;;  %v1221_v63 = vpack.c.bf16 %v1212_v60, %v1211_v57 }
 0x21c   : > { %2208 = vmatprep.subr.bf16.mxu1 %v1221_v63 }
 0x21d   : > { %786 = vmax.xlane.f32.xlu0 %v3389_v58  ;;  %2209 = vmatpush3.bf16.msra.mxu1 %v1221_v63 }
 0x21e   : > { %784 = vmax.xlane.f32.xlu1 %v3393_v59  ;;  %2210 = vmatprep.subr.bf16.mxu1 %v1222_v21 }
 0x221   : > { %2211 = vmatpush3.bf16.msra.mxu1 %v1222_v21 }
 0x28d   : > { %v763_v4 = vpop.xlane.xlu1 %762 }
 0x28e   : > { %v3406_v5 = vmax.f32 %v3401_v2, %v763_v4  ;;  %v759_v6 = vpop.xlane.xlu0 %758 }
 0x28f   : > { %v3409_v7 = vmax.f32 %v3403_v3, %v759_v6 }
 0x290   : > { %1354 = vst.msk [vmem:[#allocation3 + $0x10] sm:$0xff] %vm1062_vm1, %v3406_v5  ;;  %866 = vperm.xlu1 %2387, %v3406_v5  }
 0x291   : > { %1352 = vst.msk [vmem:[#allocation3] sm:$0xff] %vm1062_vm1, %v3409_v7  ;;  %v765_v15 = vpop.xlane.xlu1 %764  ;;  %856 = vperm.xlu0 %2386, %v3409_v7   ;;  %v806_v4 = vsub.f32 %v3403_v3, %v3409_v7 }
 0x292   : > { %v3424_v18 = vmax.f32 %v3411_v9, %v765_v15  ;;  %v761_v19 = vpop.xlane.xlu0 %760 }
 0x293   : > { %v3427_v20 = vmax.f32 %v3418_v13, %v761_v19  ;;  %v3501_v19 = vld [vmem:[#allocation3 + $0x60] sm:$0xff]  ;;  %v822_v7 = vmul.f32 1.442695, %v806_v4 }
 0x294   : > { %1355 = vst.msk [vmem:[#allocation3 + $0x18] sm:$0xff] %vm1062_vm1, %v3424_v18  ;;  %871 = vperm.xlu1 %2387, %v3424_v18   ;;  %v809_v25 = vsub.f32 %v3411_v9, %v3424_v18 }
 0x295   : > { %1353 = vst.msk [vmem:[#allocation3 + $0x8] sm:$0xff] %vm1062_vm1, %v3427_v20  ;;  %2396 = vpow2.f32 %v822_v7 }
 0x296   : > { %v767_v28 = vpop.xlane.xlu0 %766 }
 0x297   : > { %v3441_v29 = vmax.f32 %v3434_v23, %v767_v28  ;;  %v773_v30 = vpop.xlane.xlu1 %772 }
 0x298   : > { %v3446_v35 = vmax.f32 %v3438_v27, %v773_v30  ;;  %861 = vperm.xlu1 %2387, %v3427_v20  }
 0x299   : > { %1356 = vst.msk [vmem:[#allocation3 + $0x20] sm:$0xff] %vm1062_vm1, %v3441_v29  ;;  %v810_v60 = vsub.f32 %v3434_v23, %v3441_v29 }
 0x29a   : > { %1359 = vst.msk [vmem:[#allocation3 + $0x38] sm:$0xff] %vm1062_vm1, %v3446_v35  ;;  %v771_v40 = vpop.xlane.xlu0 %770 }
 0x29b   : > { %v3458_v41 = vmax.f32 %v3449_v36, %v771_v40  ;;  %v769_v43 = vpop.xlane.xlu1 %768  ;;  %v807_v40 = vsub.f32 %v3418_v13, %v3427_v20  ;;  %v808_v20 = vsub.f32 %v3401_v2, %v3406_v5 }
 0x29c   : > { %v3463_v48 = vmax.f32 %v3453_v38, %v769_v43  ;;  %v828_v43 = vmul.f32 1.442695, %v809_v25 }
 0x29d   : > { %1358 = vst.msk [vmem:[#allocation3 + $0x30] sm:$0xff] %vm1062_vm1, %v3458_v41  ;;  %886 = vperm.xlu1 %2387, %v3458_v41   ;;  %v826_v57 = vmul.f32 1.442695, %v808_v20 }
 0x29e   : > { %1357 = vst.msk [vmem:[#allocation3 + $0x28] sm:$0xff] %vm1062_vm1, %v3463_v48  ;;  %v775_v52 = vpop.xlane.xlu0 %774  ;;  %v811_v44 = vsub.f32 %v3453_v38, %v3463_v48  ;;  %2398 = vpow2.f32 %v828_v43  ;;  %v813_v38 = vsub.f32 %v3438_v27, %v3446_v35  ;;  %v830_v27 = vmul.f32 1.442695, %v810_v60 }
 0x29f   : > { %v781_v53 = vpop.xlane.xlu1 %780  ;;  %v3475_v55 = vmax.f32 %v3465_v49, %v775_v52  ;;  %v3552_v5 = vpop.eup %2396 }
 0x2a0   : > { %v3480_v61 = vmax.f32 %v3470_v51, %v781_v53  ;;  %v824_v53 = vmul.f32 1.442695, %v807_v40  ;;  %v836_v63 = vmul.f32 1.442695, %v813_v38 }
 0x2a1   : > { %1360 = vst.msk [vmem:[#allocation3 + $0x40] sm:$0xff] %vm1062_vm1, %v3475_v55  ;;  %876 = vperm.xlu1 %2387, %v3441_v29  }
 0x2a2   : > { %1363 = vst.msk [vmem:[#allocation3 + $0x58] sm:$0xff] %vm1062_vm1, %v3480_v61  ;;  %v779_v1 = vpop.xlane.xlu0 %778  ;;  %2400 = vpow2.f32 %v824_v53  ;;  %v817_v2 = vsub.f32 %v3470_v51, %v3480_v61 }
 0x2a3   : > { %v777_v6 = vpop.xlane.xlu1 %776  ;;  %v3494_v10 = vmax.f32 %v3482_v62, %v779_v1 }
 0x2a4   : > { %v3499_v15 = vmax.f32 %v3487_v0, %v777_v6  ;;  %v844_v23 = vmul.f32 1.442695, %v817_v2 }
 0x2a5   : > { %1362 = vst.msk [vmem:[#allocation3 + $0x50] sm:$0xff] %vm1062_vm1, %v3494_v10  ;;  %881 = vperm.xlu1 %2387, %v3463_v48   ;;  %v832_v48 = vmul.f32 1.442695, %v811_v44 }
 0x2a6   : > { %1361 = vst.msk [vmem:[#allocation3 + $0x48] sm:$0xff] %vm1062_vm1, %v3499_v15  ;;  %901 = vperm.xlu0 %2386, %v3499_v15   ;;  %v783_v3 = vpop.xlane.xlu0 %782  ;;  %v815_v29 = vsub.f32 %v3487_v0, %v3499_v15  ;;  %v814_v0 = vsub.f32 %v3465_v49, %v3475_v55 }
 0x2a7   : > { %v789_v28 = vpop.xlane.xlu1 %788  ;;  %v3514_v30 = vmax.f32 %v3501_v19, %v783_v3  ;;  %2402 = vpow2.f32 %v832_v48 }
 0x2a8   : > { %v3517_v32 = vmax.f32 %v3506_v22, %v789_v28  ;;  %2404 = vpow2.f32 %v826_v57  ;;  %v3560_v1 = vpop.eup %2398  ;;  %v838_v15 = vmul.f32 1.442695, %v814_v0 }
 0x2a9   : > { %1364 = vst.msk [vmem:[#allocation3 + $0x60] sm:$0xff] %vm1062_vm1, %v3514_v30  ;;  %891 = vperm.xlu1 %2387, %v3446_v35   ;;  %v812_v35 = vsub.f32 %v3449_v36, %v3458_v41  ;;  %2406 = vpow2.f32 %v836_v63  ;;  %v840_v36 = vmul.f32 1.442695, %v815_v29  ;;  %v818_v21 = vsub.f32 %v3501_v19, %v3514_v30 }
 0x2aa   : > { %v821_v9 = vsub.f32 %v3506_v22, %v3517_v32  ;;  %1367 = vst.msk [vmem:[#allocation3 + $0x78] sm:$0xff] %vm1062_vm1, %v3517_v32  ;;  %911 = vperm.xlu0 %2386, %v3480_v61   ;;  %v787_v18 = vpop.xlane.xlu0 %786  ;;  %2408 = vpow2.f32 %v830_v27  ;;  %v816_v61 = vsub.f32 %v3482_v62, %v3494_v10 }
 0x2ab   : > { %v785_v46 = vpop.xlane.xlu1 %784  ;;  %v3534_v50 = vmax.f32 %v3519_v34, %v787_v18  ;;  %v834_v51 = vmul.f32 1.442695, %v812_v35  ;;  %2410 = vpow2.f32 %v844_v23  ;;  %v846_v3 = vmul.f32 1.442695, %v818_v21 }
 0x2ac   : > { %v803_v52 = vmax.f32 %v755_v37, %v785_v46  ;;  %v3566_v4 = vpop.eup %2400  ;;  %v842_v12 = vmul.f32 1.442695, %v816_v61 }
 0x2ad   : > { %v820_v13 = vsub.f32 %v3519_v34, %v3534_v50  ;;  %1366 = vst.msk [vmem:[#allocation3 + $0x70] sm:$0xff] %vm1062_vm1, %v3534_v50  ;;  %896 = vperm.xlu1 %2387, %v3475_v55   ;;  %2412 = vpow2.f32 %v834_v51 }
 0x2ae   : > { %1365 = vst.msk [vmem:[#allocation3 + $0x68] sm:$0xff] %vm1062_vm1, %v803_v52  ;;  %921 = vperm.xlu0 %2386, %v803_v52   ;;  %v819_v41 = vsub.f32 %v755_v37, %v803_v52  ;;  %2414 = vpow2.f32 %v840_v36 }
 0x2af   : > { %2416 = vpow2.f32 %v842_v12 }
 0x2b0   : > { %v848_v62 = vmul.f32 1.442695, %v819_v41 }
 0x2b1   : > { %906 = vperm.xlu1 %2387, %v3494_v10   ;;  %v3568_v6 = vpop.eup %2402 }
 0x2b2   : > { %931 = vperm.xlu0 %2386, %v3517_v32   ;;  %v3574_v10 = vpop.eup %2404  ;;  %2418 = vpow2.f32 %v848_v62 }
 0x2b3   : > { %v3576_v14 = vpop.eup %2406  ;;  %2420 = vpow2.f32 %v838_v15 }
 0x2b4   : > { %v3582_v49 = vpop.eup %2408  ;;  %2422 = vpow2.f32 %v846_v3 }
 0x2b5   : > { %916 = vperm.xlu1 %2387, %v3514_v30   ;;  %v3584_v55 = vpop.eup %2410 }
 0x2b6   : > { %1097 = vperm.xlu0 %2386, %v3552_v5  }
 0x2b7   : > { %v3588_v7 = vpop.eup %2412 }
 0x2b8   : > { %v3590_v25 = vpop.eup %2414 }
 0x2b9   : > { %926 = vperm.xlu1 %2387, %v3534_v50   ;;  %v3594_v19 = vpop.eup %2416 }
 0x2ba   : > { %1112 = vperm.xlu0 %2386, %v3560_v1  }
 0x2bc   : > { %v3596_v28 = vpop.eup %2418 }
 0x2bd   : > { %1102 = vperm.xlu1 %2387, %v3566_v4   ;;  %v3600_v30 = vpop.eup %2420 }
 0x2be   : > { %1122 = vperm.xlu0 %2386, %v3568_v6   ;;  %v3603_v37 = vpop.eup %2422 }
 0x2c1   : > { %1107 = vperm.xlu1 %2387, %v3574_v10  }
 0x2c2   : > { %1132 = vperm.xlu0 %2386, %v3576_v14  }
 0x2c5   : > { %1117 = vperm.xlu1 %2387, %v3582_v49  }
 0x2c6   : > { %1152 = vperm.xlu0 %2386, %v3584_v55  }
 0x2c9   : > { %1127 = vperm.xlu1 %2387, %v3588_v7  }
 0x2ca   : > { %1142 = vperm.xlu0 %2386, %v3590_v25  }
 0x2cd   : > { %1147 = vperm.xlu1 %2387, %v3594_v19  }
 0x2ce   : > { %1162 = vperm.xlu0 %2386, %v3596_v28  }
 0x2d1   : > { %1137 = vperm.xlu1 %2387, %v3600_v30  }
 0x2d5   : > { %1157 = vperm.xlu1 %2387, %v3603_v37  }
 0x30f   : > { %v867_v40 = vpop.permute.xlu1 %866 }
 0x310   : > { %v936_v18 = vsub.f32 %v3343_v8, %v867_v40  ;;  %v857_v43 = vpop.permute.xlu0 %856 }
 0x311   : > { %v934_v44 = vsub.f32 %v3345_v11, %v857_v43 }
 0x312   : > { %v954_v46 = vmul.f32 1.442695, %v936_v18 }
 0x313   : > { %v950_v52 = vmul.f32 1.442695, %v934_v44  ;;  %v872_v20 = vpop.permute.xlu1 %871 }
 0x314   : > { %2424 = vpow2.f32 %v954_v46  ;;  %v937_v53 = vsub.f32 %v3350_v16, %v872_v20 }
 0x315   : > { %2426 = vpow2.f32 %v950_v52 }
 0x316   : > { %v956_v38 = vmul.f32 1.442695, %v937_v53 }
 0x317   : > { %v862_v48 = vpop.permute.xlu1 %861 }
 0x318   : > { %2428 = vpow2.f32 %v956_v38  ;;  %v935_v57 = vsub.f32 %v3352_v17, %v862_v48 }
 0x31a   : > { %v952_v60 = vmul.f32 1.442695, %v935_v57 }
 0x31c   : > { %2430 = vpow2.f32 %v952_v60  ;;  %v887_v63 = vpop.permute.xlu1 %886 }
 0x31d   : > { %v940_v8 = vsub.f32 %v3365_v31, %v887_v63 }
 0x31e   : > { %v2425_v2 = vpop.eup %2424 }
 0x31f   : > { %v2427_v27 = vpop.eup %2426  ;;  %v962_v11 = vmul.f32 1.442695, %v940_v8  ;;  %1018 = vadd.xlane.f32.xlu0 %v2425_v2 }
 0x320   : > { %v877_v35 = vpop.permute.xlu1 %876  ;;  %1014 = vadd.xlane.f32.xlu1 %v2427_v27 }
 0x321   : > { %2432 = vpow2.f32 %v962_v11  ;;  %v938_v16 = vsub.f32 %v3357_v24, %v877_v35 }
 0x322   : > { %v2429_v23 = vpop.eup %2428 }
 0x323   : > { %v958_v29 = vmul.f32 1.442695, %v938_v16  ;;  %v1192_v62 = vpack.c.bf16 %v2429_v23, %v2425_v2 }
 0x324   : > { %v882_v51 = vpop.permute.xlu1 %881  ;;  %1020 = vadd.xlane.f32.xlu1 %v2429_v23 }
 0x325   : > { %2434 = vpow2.f32 %v958_v29  ;;  %v939_v17 = vsub.f32 %v3367_v33, %v882_v51  ;;  %v902_v61 = vpop.permute.xlu0 %901 }
 0x326   : > { %v2431_v36 = vpop.eup %2430  ;;  %v943_v0 = vsub.f32 %v3381_v47, %v902_v61 }
 0x327   : > { %v960_v41 = vmul.f32 1.442695, %v939_v17  ;;  %1016 = vadd.xlane.f32.xlu0 %v2431_v36  ;;  %v1191_v31 = vpack.c.bf16 %v2431_v36, %v2427_v27 }
 0x328   : > { %v892_v12 = vpop.permute.xlu1 %891  ;;  %v968_v40 = vmul.f32 1.442695, %v943_v0 }
 0x329   : > { %2436 = vpow2.f32 %v960_v41  ;;  %v941_v15 = vsub.f32 %v3359_v26, %v892_v12  ;;  %2212 = vmatprep.mubr.bf16.mxu1 %v1191_v31  ;;  %v912_v24 = vpop.permute.xlu0 %911  ;;  %v850_v12 = vmul.f32 1.442695, %v820_v13 }
 0x32a   : > { %2213 = vmatmul.mubr.bf16.vlgmr.msra.gmra.mrb[0].mxu1 %v1192_v62  ;;  %v945_v33 = vsub.f32 %v3373_v42, %v912_v24  ;;  %v852_v62 = vmul.f32 1.442695, %v821_v9 }
 0x32b   : > { %v2433_v21 = vpop.eup %2432  ;;  %v964_v3 = vmul.f32 1.442695, %v941_v15 }
 0x32c   : > { %1026 = vadd.xlane.f32.xlu0 %v2433_v21  ;;  %v897_v18 = vpop.permute.xlu1 %896  ;;  %v972_v52 = vmul.f32 1.442695, %v945_v33 }
 0x32d   : > { %2438 = vpow2.f32 %v964_v3  ;;  %v942_v43 = vsub.f32 %v3371_v39, %v897_v18  ;;  %v922_v44 = vpop.permute.xlu0 %921 }
 0x32e   : > { %2440 = vpow2.f32 %v968_v40  ;;  %v947_v26 = vsub.f32 %v3393_v59, %v922_v44 }
 0x32f   : > { %v2435_v47 = vpop.eup %2434  ;;  %v966_v46 = vmul.f32 1.442695, %v942_v43 }
 0x330   : > { %1022 = vadd.xlane.f32.xlu0 %v2435_v47  ;;  %v907_v20 = vpop.permute.xlu1 %906  ;;  %v976_v57 = vmul.f32 1.442695, %v947_v26 }
 0x331   : > { %2442 = vpow2.f32 %v966_v46  ;;  %v944_v53 = vsub.f32 %v3376_v45, %v907_v20  ;;  %v932_v38 = vpop.permute.xlu0 %931 }
 0x332   : > { %2444 = vpow2.f32 %v972_v52  ;;  %v949_v60 = vsub.f32 %v3387_v56, %v932_v38  ;;  %v982_v52 = vld [vmem:[#allocation4] sm:$0xff] }
 0x333   : > { %v2437_v48 = vpop.eup %2436  ;;  %v970_v42 = vmul.f32 1.442695, %v944_v53  ;;  %v998_v53 = vmul.f32 %v3552_v5, %v982_v52  ;;  %v988_v5 = vld [vmem:[#allocation4 + $0x30] sm:$0xff] }
 0x334   : > { %v917_v39 = vpop.permute.xlu1 %916  ;;  %v1193_v63 = vpack.c.bf16 %v2437_v48, %v2435_v47  ;;  %v980_v27 = vmul.f32 1.442695, %v949_v60  ;;  %v984_v47 = vld [vmem:[#allocation4 + $0x10] sm:$0xff] }
 0x335   : > { %2446 = vpow2.f32 %v970_v42  ;;  %v946_v8 = vsub.f32 %v3385_v54, %v917_v39  ;;  %v1000_v26 = vmul.f32 %v3574_v10, %v984_v47  ;;  %v985_v42 = vld [vmem:[#allocation4 + $0x18] sm:$0xff]  ;;  %v983_v39 = vld [vmem:[#allocation4 + $0x8] sm:$0xff] }
 0x336   : > { %2216 = vmatprep.mubr.bf16.mxu1 %v1193_v63  ;;  %2448 = vpow2.f32 %v976_v57  ;;  %v1001_v60 = vmul.f32 %v3560_v1, %v985_v42 }
 0x337   : > { %v2439_v2 = vpop.eup %2438  ;;  %v974_v59 = vmul.f32 1.442695, %v946_v8 }
 0x338   : > { %v927_v11 = vpop.permute.xlu1 %926  ;;  %1028 = vadd.xlane.f32.xlu1 %v2439_v2  ;;  %v1194_v45 = vpack.c.bf16 %v2439_v2, %v2433_v21  ;;  %v2441_v16 = vpop.eup %2440  ;;  %v999_v2 = vmul.f32 %v3566_v4, %v983_v39  ;;  %v989_v4 = vld [vmem:[#allocation4 + $0x38] sm:$0xff]  ;;  %v995_v39 = vld [vmem:[#allocation4 + $0x68] sm:$0xff] }
 0x339   : > { %2450 = vpow2.f32 %v974_v59  ;;  %v948_v35 = vsub.f32 %v3389_v58, %v927_v11  ;;  %v3634_v21 = vpop.permute.xlu0 %1097 }
 0x33a   : > { %2217 = vmatmul.mubr.bf16.gmra.mrb[4].mxu1 %v1194_v45  ;;  %2452 = vpow2.f32 %v980_v27  ;;  %v1004_v27 = vmul.f32 %v3588_v7, %v988_v5  ;;  %v986_v45 = vld [vmem:[#allocation4 + $0x20] sm:$0xff] }
 0x33b   : > { %v2443_v23 = vpop.eup %2442  ;;  %v978_v56 = vmul.f32 1.442695, %v948_v35  ;;  %v1002_v1 = vmul.f32 %v3582_v49, %v986_v45  ;;  %v1080_v45 = vld [vmem:[#allocation5 + $0x8] sm:$0xff] }
 0x33c   : > { %1024 = vadd.xlane.f32.xlu1 %v2437_v48  ;;  %v1195_v29 = vpack.c.bf16 %v2441_v16, %v2443_v23  ;;  %v2445_v54 = vpop.eup %2444  ;;  %v3636_v3 = vpop.permute.xlu1 %1102 }
 0x33d   : > { %2454 = vpow2.f32 %v978_v56  ;;  %v3638_v34 = vpop.permute.xlu0 %1112  ;;  %v1005_v56 = vmul.f32 %v3576_v14, %v989_v4  ;;  %v991_v14 = vld [vmem:[#allocation4 + $0x48] sm:$0xff]  ;;  %v1176_v4 = vmul.f32 %v3636_v3, %v1080_v45 }
 0x33e   : > { %2220 = vmatprep.mubr.bf16.mxu1 %v1195_v29  ;;  %2456 = vpow2.f32 %v850_v12  ;;  %v990_v12 = vld [vmem:[#allocation4 + $0x40] sm:$0xff] }
 0x33f   : > { %v2447_v51 = vpop.eup %2446  ;;  %2458 = vpow2.f32 %v852_v62  ;;  %v1006_v52 = vmul.f32 %v3600_v30, %v990_v12 }
 0x340   : > { %1034 = vadd.xlane.f32.xlu0 %v2447_v51  ;;  %1036 = vadd.xlane.f32.xlu1 %v2445_v54  ;;  %v1196_v17 = vpack.c.bf16 %v2445_v54, %v2447_v51  ;;  %v2449_v61 = vpop.eup %2448  ;;  %v3640_v50 = vpop.permute.xlu1 %1107  ;;  %v987_v54 = vld [vmem:[#allocation4 + $0x28] sm:$0xff] }
 0x341   : > { %v3642_v13 = vpop.permute.xlu0 %1122  ;;  %v1003_v7 = vmul.f32 %v3568_v6, %v987_v54  ;;  %v1007_v6 = vmul.f32 %v3590_v25, %v991_v14  ;;  %v994_v25 = vld [vmem:[#allocation4 + $0x60] sm:$0xff] }
 0x342   : > { %2221 = vmatmul.mubr.bf16.gmra.mrb[8].mxu1 %v1196_v17 }
 0x343   : > { %v2451_v36 = vpop.eup %2450 }
 0x344   : > { %1030 = vadd.xlane.f32.xlu0 %v2443_v23  ;;  %1032 = vadd.xlane.f32.xlu1 %v2441_v16  ;;  %v1197_v58 = vpack.c.bf16 %v2449_v61, %v2451_v36  ;;  %v2453_v41 = vpop.eup %2452  ;;  %v3644_v22 = vpop.permute.xlu1 %1117 }
 0x345   : > { %v3646_v32 = vpop.permute.xlu0 %1132 }
 0x346   : > { %2224 = vmatprep.mubr.bf16.mxu1 %v1197_v58 }
 0x347   : > { %v2455_v31 = vpop.eup %2454 }
 0x348   : > { %1042 = vadd.xlane.f32.xlu0 %v2455_v31  ;;  %1044 = vadd.xlane.f32.xlu1 %v2453_v41  ;;  %v1198_v0 = vpack.c.bf16 %v2453_v41, %v2455_v31  ;;  %v3628_v15 = vpop.eup %2456  ;;  %v3648_v9 = vpop.permute.xlu1 %1127 }
 0x349   : > { %v3631_v24 = vpop.eup %2458  ;;  %v3650_v40 = vpop.permute.xlu0 %1152 }
 0x34a   : > { %2225 = vmatmul.mubr.bf16.gmra.mrb[12].mxu1 %v1198_v0 }
 0x34c   : > { %1038 = vadd.xlane.f32.xlu0 %v2451_v36  ;;  %1040 = vadd.xlane.f32.xlu1 %v2449_v61  ;;  %v3652_v33 = vpop.permute.xlu1 %1147  ;;  %v993_v61 = vld [vmem:[#allocation4 + $0x58] sm:$0xff]  ;;  %v992_v36 = vld [vmem:[#allocation4 + $0x50] sm:$0xff] }
 0x34d   : > { %v3654_v18 = vpop.permute.xlu0 %1142  ;;  %v1009_v49 = vmul.f32 %v3584_v55, %v993_v61  ;;  %v1008_v41 = vmul.f32 %v3594_v19, %v992_v36  ;;  %v996_v55 = vld [vmem:[#allocation4 + $0x70] sm:$0xff]  ;;  %v1086_v61 = vld [vmem:[#allocation5 + $0x38] sm:$0xff] }
 0x34e   : > { %v1012_v42 = vmul.f32 %v3628_v15, %v996_v55  ;;  %v1182_v3 = vmul.f32 %v3646_v32, %v1086_v61 }
 0x350   : > { %v3656_v43 = vpop.permute.xlu1 %1137 }
 0x351   : > { %v3658_v44 = vpop.permute.xlu0 %1162 }
 0x354   : > { %v3660_v46 = vpop.permute.xlu1 %1157 }
 0x35d   : > { %1167 = vperm.xlu1 %2387, %v3628_v15   ;;  %v1081_v15 = vld [vmem:[#allocation5 + $0x10] sm:$0xff] }
 0x362   : > { %1172 = vperm.xlu0 %2386, %v3631_v24  }
 0x3ac   : > { %v1019_v20 = vpop.xlane.xlu0 %1018 }
 0x3ad   : > { %v1048_v38 = vadd.f32 %v1019_v20, %v1000_v26  ;;  %v1015_v48 = vpop.xlane.xlu1 %1014 }
 0x3ae   : > { %v1046_v57 = vadd.f32 %v1015_v48, %v998_v53  ;;  %v997_v53 = vld [vmem:[#allocation4 + $0x78] sm:$0xff] }
 0x3af   : > { %1065 = vst.msk [vmem:[#allocation4 + $0x10] sm:$0xff] %vm1062_vm1, %v1048_v38  ;;  %v1013_v48 = vmul.f32 %v3631_v24, %v997_v53 }
 0x3b0   : > { %1063 = vst.msk [vmem:[#allocation4] sm:$0xff] %vm1062_vm1, %v1046_v57 }
 0x3b1   : > { %v1021_v63 = vpop.xlane.xlu1 %1020 }
 0x3b2   : > { %v1049_v8 = vadd.f32 %v1021_v63, %v1001_v60 }
 0x3b4   : > { %1066 = vst.msk [vmem:[#allocation4 + $0x18] sm:$0xff] %vm1062_vm1, %v1049_v8  ;;  %v1017_v10 = vpop.xlane.xlu0 %1016  ;;  %v1011_v8 = vmul.f32 %v3596_v28, %v995_v39 }
 0x3b5   : > { %v1047_v59 = vadd.f32 %v1017_v10, %v999_v2  ;;  %v1010_v2 = vmul.f32 %v3603_v37, %v994_v25 }
 0x3b7   : > { %1064 = vst.msk [vmem:[#allocation4 + $0x8] sm:$0xff] %vm1062_vm1, %v1047_v59 }
 0x3b9   : > { %v1027_v11 = vpop.xlane.xlu0 %1026 }
 0x3ba   : > { %v1052_v35 = vadd.f32 %v1027_v11, %v1004_v27  ;;  %v1079_v27 = vld [vmem:[#allocation5] sm:$0xff]  ;;  %v1082_v11 = vld [vmem:[#allocation5 + $0x18] sm:$0xff] }
 0x3bb   : > { %v1178_v28 = vmul.f32 %v3638_v34, %v1082_v11 }
 0x3bc   : > { %1069 = vst.msk [vmem:[#allocation4 + $0x30] sm:$0xff] %vm1062_vm1, %v1052_v35  ;;  %v1177_v35 = vmul.f32 %v3640_v50, %v1081_v15  ;;  %v1083_v50 = vld [vmem:[#allocation5 + $0x20] sm:$0xff] }
 0x3bd   : > { %v1023_v16 = vpop.xlane.xlu0 %1022  ;;  %v1179_v34 = vmul.f32 %v3644_v22, %v1083_v50  ;;  %v1088_v22 = vld [vmem:[#allocation5 + $0x48] sm:$0xff] }
 0x3be   : > { %v1050_v23 = vadd.f32 %v1023_v16, %v1002_v1  ;;  %v1175_v1 = vmul.f32 %v3634_v21, %v1079_v27  ;;  %v1084_v21 = vld [vmem:[#allocation5 + $0x28] sm:$0xff] }
 0x3c0   : > { %1067 = vst.msk [vmem:[#allocation4 + $0x20] sm:$0xff] %vm1062_vm1, %v1050_v23 }
 0x3c5   : > { %v1029_v29 = vpop.xlane.xlu1 %1028 }
 0x3c6   : > { %v1053_v51 = vadd.f32 %v1029_v29, %v1005_v56 }
 0x3c8   : > { %1070 = vst.msk [vmem:[#allocation4 + $0x38] sm:$0xff] %vm1062_vm1, %v1053_v51 }
 0x3c9   : > { %v1025_v17 = vpop.xlane.xlu1 %1024 }
 0x3ca   : > { %v1051_v58 = vadd.f32 %v1025_v17, %v1003_v7  ;;  %v1085_v17 = vld [vmem:[#allocation5 + $0x30] sm:$0xff] }
 0x3cb   : > { %v1181_v36 = vmul.f32 %v3648_v9, %v1085_v17  ;;  %v1090_v9 = vld [vmem:[#allocation5 + $0x58] sm:$0xff] }
 0x3cc   : > { %1068 = vst.msk [vmem:[#allocation4 + $0x28] sm:$0xff] %vm1062_vm1, %v1051_v58 }
 0x3cd   : > { %v1037_v31 = vpop.xlane.xlu1 %1036  ;;  %v1035_v0 = vpop.xlane.xlu0 %1034 }
 0x3ce   : > { %v1057_v62 = vadd.f32 %v1037_v31, %v1009_v49  ;;  %v1056_v47 = vadd.f32 %v1035_v0, %v1008_v41  ;;  %v1180_v31 = vmul.f32 %v3642_v13, %v1084_v21  ;;  %v1186_v13 = vmul.f32 %v3650_v40, %v1090_v9 }
 0x3d0   : > { %1074 = vst.msk [vmem:[#allocation4 + $0x58] sm:$0xff] %vm1062_vm1, %v1057_v62  ;;  %1073 = vst.msk [vmem:[#allocation4 + $0x50] sm:$0xff] %vm1062_vm1, %v1056_v47  ;;  %v1089_v47 = vld [vmem:[#allocation5 + $0x50] sm:$0xff] }
 0x3d1   : > { %v1033_v26 = vpop.xlane.xlu1 %1032  ;;  %v1031_v20 = vpop.xlane.xlu0 %1030 }
 0x3d2   : > { %v1055_v38 = vadd.f32 %v1033_v26, %v1007_v6  ;;  %v1054_v19 = vadd.f32 %v1031_v20, %v1006_v52  ;;  %v1087_v52 = vld [vmem:[#allocation5 + $0x40] sm:$0xff]  ;;  %v1185_v26 = vmul.f32 %v3652_v33, %v1089_v47  ;;  %v1094_v33 = vld [vmem:[#allocation5 + $0x78] sm:$0xff] }
 0x3d3   : > { %v1183_v32 = vmul.f32 %v3656_v43, %v1087_v52 }
 0x3d4   : > { %1072 = vst.msk [vmem:[#allocation4 + $0x48] sm:$0xff] %vm1062_vm1, %v1055_v38  ;;  %1071 = vst.msk [vmem:[#allocation4 + $0x40] sm:$0xff] %vm1062_vm1, %v1054_v19  ;;  %v1184_v38 = vmul.f32 %v3654_v18, %v1088_v22 }
 0x3d5   : > { %v1045_v57 = vpop.xlane.xlu1 %1044  ;;  %v1043_v60 = vpop.xlane.xlu0 %1042 }
 0x3d6   : > { %v1061_v63 = vadd.f32 %v1045_v57, %v1013_v48  ;;  %v1060_v30 = vadd.f32 %v1043_v60, %v1012_v42  ;;  %v1093_v60 = vld [vmem:[#allocation5 + $0x70] sm:$0xff] }
 0x3d7   : > { %v1399_v50 = vld [vmem:[#allocation4 + $0x58] sm:$0xff] (!%p1960_p10)  ;;  %v1398_v21 = vld [vmem:[#allocation4 + $0x50] sm:$0xff] (!%p1960_p10) }
 0x3d8   : > { %1078 = vst.msk [vmem:[#allocation4 + $0x78] sm:$0xff] %vm1062_vm1, %v1061_v63  ;;  %1077 = vst.msk [vmem:[#allocation4 + $0x70] sm:$0xff] %vm1062_vm1, %v1060_v30  ;;  %v1091_v63 = vld [vmem:[#allocation5 + $0x60] sm:$0xff]  ;;  %v1092_v30 = vld [vmem:[#allocation5 + $0x68] sm:$0xff] }
 0x3d9   : > { %v1041_v10 = vpop.xlane.xlu1 %1040  ;;  %v1039_v59 = vpop.xlane.xlu0 %1038 }
 0x3da   : > { %v1059_v5 = vadd.f32 %v1041_v10, %v1011_v8  ;;  %v1058_v24 = vadd.f32 %v1039_v59, %v1010_v2  ;;  %v1187_v8 = vmul.f32 %v3660_v46, %v1091_v63  ;;  %v1388_v46 = vld [vmem:[#allocation4] sm:$0xff] (!%p1960_p10) }
 0x3dc   : > { %1076 = vst.msk [vmem:[#allocation4 + $0x68] sm:$0xff] %vm1062_vm1, %v1059_v5  ;;  %1075 = vst.msk [vmem:[#allocation4 + $0x60] sm:$0xff] %vm1062_vm1, %v1058_v24  ;;  %v1188_v5 = vmul.f32 %v3658_v44, %v1092_v30  ;;  %v1389_v44 = vld [vmem:[#allocation4 + $0x8] sm:$0xff] (!%p1960_p10) }
 0x3dd   : > { %v1168_v39 = vpop.permute.xlu1 %1167 }
 0x3de   : > { %v1189_v40 = vmul.f32 %v1168_v39, %v1093_v60 }
 0x3e1   : > { %v1173_v43 = vpop.permute.xlu0 %1172 }
 0x3e2   : > { %v1190_v18 = vmul.f32 %v1173_v43, %v1094_v33 }
 0x3fd   : > { %v2214_v16 = vpop.f32.mrb[0].mxu1 }
 0x3fe   : > { %v1322_v37 = vadd.f32 %v2214_v16, %v1177_v35  ;;  %v1257_v23 = vpop.f32.mrb[1].mxu1  ;;  %v1390_v35 = vld [vmem:[#allocation4 + $0x10] sm:$0xff] (!%p1960_p10)  ;;  %v2845_v16 = vmov (!%p1960_p10), 0  }
 0x3ff   : > { %v1320_v56 = vadd.f32 %v1257_v23, %v1175_v1  ;;  %v2215_v29 = vpop.f32.mrb[2].mxu1  ;;  %v1391_v1 = vld [vmem:[#allocation4 + $0x18] sm:$0xff] (!%p1960_p10)  ;;  %2461 = vset.pattern.permute.xlu1 (!%p1960_p10), %v2845_v16  ;;  %2460 = vset.pattern.permute.xlu0 (!%p1960_p10), %v2845_v16  ;;  %2462 = vrcp.f32 (!%p1960_p10), %v1390_v35 }
 0x400   : > { %1338 = vst [vmem:[#allocation5 + $0x10] sm:$0xff] %v1322_v37  ;;  %v1323_v54 = vadd.f32 %v2215_v29, %v1178_v28  ;;  %v1260_v51 = vpop.f32.mrb[3].mxu1  ;;  %2464 = vrcp.f32 (!%p1960_p10), %v1388_v46  ;;  %v1393_v28 = vld [vmem:[#allocation4 + $0x28] sm:$0xff] (!%p1960_p10)  ;;  %v1392_v37 = vld [vmem:[#allocation4 + $0x20] sm:$0xff] (!%p1960_p10)  ;;  %v1395_v23 = vld [vmem:[#allocation4 + $0x38] sm:$0xff] (!%p1960_p10) }
 0x401   : > { %1336 = vst [vmem:[#allocation5] sm:$0xff] %v1320_v56  ;;  %v1321_v7 = vadd.f32 %v1260_v51, %v1176_v4  ;;  %2466 = vrcp.f32 (!%p1960_p10), %v1391_v1  ;;  %v1394_v4 = vld [vmem:[#allocation4 + $0x30] sm:$0xff] (!%p1960_p10) }
 0x402   : > { %1339 = vst [vmem:[#allocation5 + $0x18] sm:$0xff] %v1323_v54  ;;  %2468 = vrcp.f32 (!%p1960_p10), %v1389_v44  ;;  %v1397_v54 = vld [vmem:[#allocation4 + $0x48] sm:$0xff] (!%p1960_p10) }
 0x403   : > { %1337 = vst [vmem:[#allocation5 + $0x8] sm:$0xff] %v1321_v7  ;;  %2470 = vrcp.f32 (!%p1960_p10), %v1393_v28  ;;  %v1396_v7 = vld [vmem:[#allocation4 + $0x40] sm:$0xff] (!%p1960_p10) }
 0x404   : > { %2472 = vrcp.f32 (!%p1960_p10), %v1392_v37 }
 0x405   : > { %2474 = vrcp.f32 (!%p1960_p10), %v1395_v23 }
 0x406   : > { %2476 = vrcp.f32 (!%p1960_p10), %v1394_v4 }
 0x407   : > { %2478 = vrcp.f32 (!%p1960_p10), %v1397_v54  ;;  %v1374_v22 = vld [vmem:[#allocation5 + $0x10] sm:$0xff] (!%p1960_p10) }
 0x408   : > { %2480 = vrcp.f32 (!%p1960_p10), %v1396_v7 }
 0x409   : > { %v2463_v56 = vpop.eup (!%p1960_p10), %2462  ;;  %2482 = vrcp.f32 (!%p1960_p10), %v1399_v50 }
 0x40a   : > { %v2465_v29 = vpop.eup (!%p1960_p10), %2464  ;;  %1432 = vperm.xlu1 (!%p1960_p10), %2461, %v2463_v56   ;;  %2484 = vrcp.f32 (!%p1960_p10), %v1398_v21 }
 0x40b   : > { %v2467_v51 = vpop.eup (!%p1960_p10), %2466  ;;  %1422 = vperm.xlu0 (!%p1960_p10), %2460, %v2465_v29  }
 0x40c   : > { %v2469_v17 = vpop.eup (!%p1960_p10), %2468 }
 0x40d   : > { %v2218_v58 = vpop.f32.mrb[4].mxu1  ;;  %v2471_v61 = vpop.eup (!%p1960_p10), %2470 }
 0x40e   : > { %v1326_v49 = vadd.f32 %v2218_v58, %v1181_v36  ;;  %v1273_v41 = vpop.f32.mrb[5].mxu1  ;;  %1437 = vperm.xlu1 (!%p1960_p10), %2461, %v2467_v51   ;;  %v2473_v36 = vpop.eup (!%p1960_p10), %2472 }
 0x40f   : > { %v1324_v0 = vadd.f32 %v1273_v41, %v1179_v34  ;;  %v2219_v14 = vpop.f32.mrb[6].mxu1  ;;  %1427 = vperm.xlu0 (!%p1960_p10), %2460, %v2469_v17   ;;  %v1401_v34 = vld [vmem:[#allocation4 + $0x68] sm:$0xff] (!%p1960_p10)  ;;  %v2475_v58 = vpop.eup (!%p1960_p10), %2474  ;;  %v1403_v41 = vld [vmem:[#allocation4 + $0x78] sm:$0xff] (!%p1960_p10) }
 0x410   : > { %1342 = vst [vmem:[#allocation5 + $0x30] sm:$0xff] %v1326_v49  ;;  %v1327_v12 = vadd.f32 %v2219_v14, %v1182_v3  ;;  %v1276_v62 = vpop.f32.mrb[7].mxu1  ;;  %v1400_v3 = vld [vmem:[#allocation4 + $0x60] sm:$0xff] (!%p1960_p10)  ;;  %v2477_v49 = vpop.eup (!%p1960_p10), %2476  ;;  %2486 = vrcp.f32 (!%p1960_p10), %v1401_v34 }
 0x411   : > { %1340 = vst [vmem:[#allocation5 + $0x20] sm:$0xff] %v1324_v0  ;;  %v1325_v6 = vadd.f32 %v1276_v62, %v1180_v31  ;;  %2488 = vrcp.f32 (!%p1960_p10), %v1400_v3  ;;  %v2479_v31 = vpop.eup (!%p1960_p10), %2478  ;;  %v1402_v0 = vld [vmem:[#allocation4 + $0x70] sm:$0xff] (!%p1960_p10) }
 0x412   : > { %1343 = vst [vmem:[#allocation5 + $0x38] sm:$0xff] %v1327_v12  ;;  %1447 = vperm.xlu1 (!%p1960_p10), %2461, %v2471_v61   ;;  %v2481_v14 = vpop.eup (!%p1960_p10), %2480  ;;  %2490 = vrcp.f32 (!%p1960_p10), %v1403_v41 }
 0x413   : > { %1341 = vst [vmem:[#allocation5 + $0x28] sm:$0xff] %v1325_v6  ;;  %1442 = vperm.xlu0 (!%p1960_p10), %2460, %v2473_v36   ;;  %2492 = vrcp.f32 (!%p1960_p10), %v1402_v0  ;;  %v2483_v12 = vpop.eup (!%p1960_p10), %2482 }
 0x414   : > { %v2485_v62 = vpop.eup (!%p1960_p10), %2484 }
 0x415   : > { %v2222_v20 = vpop.f32.mrb[8].mxu1 }
 0x416   : > { %v1330_v53 = vadd.f32 %v2222_v20, %v1185_v26  ;;  %v1289_v55 = vpop.f32.mrb[9].mxu1  ;;  %1457 = vperm.xlu1 (!%p1960_p10), %2461, %v2475_v58   ;;  %v1372_v26 = vld [vmem:[#allocation5] sm:$0xff] (!%p1960_p10) }
 0x417   : > { %v1328_v19 = vadd.f32 %v1289_v55, %v1183_v32  ;;  %v2223_v48 = vpop.f32.mrb[10].mxu1  ;;  %1452 = vperm.xlu0 (!%p1960_p10), %2460, %v2477_v49   ;;  %v1375_v55 = vld [vmem:[#allocation5 + $0x18] sm:$0xff] (!%p1960_p10) }
 0x418   : > { %1346 = vst [vmem:[#allocation5 + $0x50] sm:$0xff] %v1330_v53  ;;  %v1331_v42 = vadd.f32 %v2223_v48, %v1186_v13  ;;  %v1292_v57 = vpop.f32.mrb[11].mxu1  ;;  %v1376_v63 = vld [vmem:[#allocation5 + $0x20] sm:$0xff] (!%p1960_p10) }
 0x419   : > { %1344 = vst [vmem:[#allocation5 + $0x40] sm:$0xff] %v1328_v19  ;;  %v1329_v25 = vadd.f32 %v1292_v57, %v1184_v38  ;;  %v1373_v38 = vld [vmem:[#allocation5 + $0x8] sm:$0xff] (!%p1960_p10) }
 0x41a   : > { %1347 = vst [vmem:[#allocation5 + $0x58] sm:$0xff] %v1331_v42  ;;  %1467 = vperm.xlu1 (!%p1960_p10), %2461, %v2479_v31   ;;  %v2487_v47 = vpop.eup (!%p1960_p10), %2486  ;;  %v1377_v39 = vld [vmem:[#allocation5 + $0x28] sm:$0xff] (!%p1960_p10) }
 0x41b   : > { %1345 = vst [vmem:[#allocation5 + $0x48] sm:$0xff] %v1329_v25  ;;  %1462 = vperm.xlu0 (!%p1960_p10), %2460, %v2481_v14   ;;  %v2489_v6 = vpop.eup (!%p1960_p10), %2488 }
 0x41c   : > { %v2491_v52 = vpop.eup (!%p1960_p10), %2490 }
 0x41d   : > { %v2226_v2 = vpop.f32.mrb[12].mxu1  ;;  %1371 = sbr.rel (%p1960_p10) target bundleno = 1359 (0x54f), region = 64  ;;  %v2493_v9 = vpop.eup (!%p1960_p10), %2492 }
 0x41e   : > { %v1334_v10 = vadd.f32 %v2226_v2, %v1189_v40  ;;  %v1305_v59 = vpop.f32.mrb[13].mxu1  ;;  %1477 = vperm.xlu1 (!%p1960_p10), %2461, %v2483_v12   ;;  %v1379_v2 = vld [vmem:[#allocation5 + $0x38] sm:$0xff] (!%p1960_p10) }
 0x41f   : > { %v1332_v24 = vadd.f32 %v1305_v59, %v1187_v8  ;;  %v2227_v15 = vpop.f32.mrb[14].mxu1  ;;  %1472 = vperm.xlu0 (!%p1960_p10), %2460, %v2485_v62   ;;  %v1382_v23 = vld [vmem:[#allocation5 + $0x50] sm:$0xff] (!%p1960_p10) }
 0x420   : > { %1350 = vst [vmem:[#allocation5 + $0x70] sm:$0xff] %v1334_v10  ;;  %v1335_v27 = vadd.f32 %v2227_v15, %v1190_v18  ;;  %v1308_v11 = vpop.f32.mrb[15].mxu1  ;;  %v1378_v18 = vld [vmem:[#allocation5 + $0x30] sm:$0xff] (!%p1960_p10) }
 0x421   : > { %1348 = vst [vmem:[#allocation5 + $0x60] sm:$0xff] %v1332_v24  ;;  %v1333_v45 = vadd.f32 %v1308_v11, %v1188_v5  ;;  %v1383_v37 = vld [vmem:[#allocation5 + $0x58] sm:$0xff] (!%p1960_p10) }
 0x422   : > { %1351 = vst [vmem:[#allocation5 + $0x78] sm:$0xff] %v1335_v27  ;;  %1487 = vperm.xlu1 (!%p1960_p10), %2461, %v2487_v47   ;;  %v1381_v11 = vld [vmem:[#allocation5 + $0x48] sm:$0xff] (!%p1960_p10) }
 0x423   : > { %1349 = vst [vmem:[#allocation5 + $0x68] sm:$0xff] %v1333_v45  ;;  %1482 = vperm.xlu0 (!%p1960_p10), %2460, %v2489_v6   ;;  %v1380_v45 = vld [vmem:[#allocation5 + $0x40] sm:$0xff] (!%p1960_p10) }
 0x426   : > { %1497 = vperm.xlu1 %2461, %v2491_v52  }
 0x427   : > { %1492 = vperm.xlu0 %2460, %v2493_v9   ;;  %v1386_v41 = vld [vmem:[#allocation5 + $0x70] sm:$0xff] }
 0x428   : > { %v1384_v50 = vld [vmem:[#allocation5 + $0x60] sm:$0xff] }
 0x429   : > { %v1387_v49 = vld [vmem:[#allocation5 + $0x78] sm:$0xff] }
 0x42a   : > { %v1385_v17 = vld [vmem:[#allocation5 + $0x68] sm:$0xff] }
 0x489   : > { %v1433_v32 = vpop.permute.xlu1 %1432 }
 0x48a   : > { %v3709_v20 = vmul.f32 %v1433_v32, %v1374_v22  ;;  %v1423_v13 = vpop.permute.xlu0 %1422 }
 0x48b   : > { %v3711_v53 = vmul.f32 %v1423_v13, %v1372_v26 }
 0x48c   : > { %1518 = vst [vmem:[%s3281_s26 + $0x10] sm:$0xff] %v3709_v20  ;;  %v1534_v25 = vmul.f32 %v3709_v20, %v3709_v20 }
 0x48d   : > { %1516 = vst [vmem:[%s3281_s26] sm:$0xff] %v3711_v53  ;;  %v1438_v19 = vpop.permute.xlu1 %1437  ;;  %v1532_v48 = vmul.f32 %v3711_v53, %v3711_v53 }
 0x48e   : > { %v3719_v42 = vmul.f32 %v1438_v19, %v1375_v55  ;;  %v1428_v57 = vpop.permute.xlu0 %1427 }
 0x48f   : > { %v3721_v60 = vmul.f32 %v1428_v57, %v1373_v38  ;;  %1548 = vadd.xlane.f32.xlu0 %v1532_v48 }
 0x490   : > { %1519 = vst [vmem:[%s3281_s26 + $0x18] sm:$0xff] %v3719_v42  ;;  %v1535_v5 = vmul.f32 %v3719_v42, %v3719_v42 }
 0x491   : > { %1517 = vst [vmem:[%s3281_s26 + $0x8] sm:$0xff] %v3721_v60  ;;  %v1448_v33 = vpop.permute.xlu1 %1447  ;;  %v1533_v43 = vmul.f32 %v3721_v60, %v3721_v60 }
 0x492   : > { %v3731_v30 = vmul.f32 %v1448_v33, %v1377_v39  ;;  %v1443_v40 = vpop.permute.xlu0 %1442 }
 0x493   : > { %v3733_v8 = vmul.f32 %v1443_v40, %v1376_v63  ;;  %1550 = vadd.xlane.f32.xlu1 %v1533_v43  ;;  %1552 = vadd.xlane.f32.xlu0 %v1534_v25 }
 0x494   : > { %1521 = vst [vmem:[%s3281_s26 + $0x28] sm:$0xff] %v3731_v30  ;;  %v1537_v1 = vmul.f32 %v3731_v30, %v3731_v30 }
 0x495   : > { %1520 = vst [vmem:[%s3281_s26 + $0x20] sm:$0xff] %v3733_v8  ;;  %v1458_v10 = vpop.permute.xlu1 %1457  ;;  %v1536_v59 = vmul.f32 %v3733_v8, %v3733_v8 }
 0x496   : > { %v3743_v24 = vmul.f32 %v1458_v10, %v1379_v2  ;;  %v1453_v15 = vpop.permute.xlu0 %1452 }
 0x497   : > { %v3745_v27 = vmul.f32 %v1453_v15, %v1378_v18  ;;  %1556 = vadd.xlane.f32.xlu1 %v1536_v59  ;;  %1554 = vadd.xlane.f32.xlu0 %v1535_v5 }
 0x498   : > { %1523 = vst [vmem:[%s3281_s26 + $0x38] sm:$0xff] %v3743_v24  ;;  %v1539_v29 = vmul.f32 %v3743_v24, %v3743_v24 }
 0x499   : > { %1522 = vst [vmem:[%s3281_s26 + $0x30] sm:$0xff] %v3745_v27  ;;  %v1468_v35 = vpop.permute.xlu1 %1467  ;;  %v1538_v46 = vmul.f32 %v3745_v27, %v3745_v27 }
 0x49a   : > { %v3755_v16 = vmul.f32 %v1468_v35, %v1381_v11  ;;  %v1463_v44 = vpop.permute.xlu0 %1462 }
 0x49b   : > { %v3757_v28 = vmul.f32 %v1463_v44, %v1380_v45  ;;  %1560 = vadd.xlane.f32.xlu1 %v1538_v46  ;;  %1558 = vadd.xlane.f32.xlu0 %v1537_v1 }
 0x49c   : > { %1525 = vst [vmem:[%s3281_s26 + $0x48] sm:$0xff] %v3755_v16  ;;  %v1541_v36 = vmul.f32 %v3755_v16, %v3755_v16 }
 0x49d   : > { %1524 = vst [vmem:[%s3281_s26 + $0x40] sm:$0xff] %v3757_v28  ;;  %v1478_v4 = vpop.permute.xlu1 %1477  ;;  %v1540_v56 = vmul.f32 %v3757_v28, %v3757_v28 }
 0x49e   : > { %v3767_v54 = vmul.f32 %v1478_v4, %v1383_v37  ;;  %v1473_v51 = vpop.permute.xlu0 %1472 }
 0x49f   : > { %v3769_v7 = vmul.f32 %v1473_v51, %v1382_v23  ;;  %1564 = vadd.xlane.f32.xlu1 %v1540_v56  ;;  %1562 = vadd.xlane.f32.xlu0 %v1539_v29 }
 0x4a0   : > { %1527 = vst [vmem:[%s3281_s26 + $0x58] sm:$0xff] %v3767_v54  ;;  %v1543_v14 = vmul.f32 %v3767_v54, %v3767_v54 }
 0x4a1   : > { %1526 = vst [vmem:[%s3281_s26 + $0x50] sm:$0xff] %v3769_v7  ;;  %v1488_v61 = vpop.permute.xlu1 %1487  ;;  %v1542_v21 = vmul.f32 %v3769_v7, %v3769_v7 }
 0x4a2   : > { %v3779_v34 = vmul.f32 %v1488_v61, %v1385_v17  ;;  %v1483_v58 = vpop.permute.xlu0 %1482 }
 0x4a3   : > { %v3781_v3 = vmul.f32 %v1483_v58, %v1384_v50  ;;  %1568 = vadd.xlane.f32.xlu1 %v1542_v21  ;;  %1566 = vadd.xlane.f32.xlu0 %v1541_v36 }
 0x4a4   : > { %1529 = vst [vmem:[%s3281_s26 + $0x68] sm:$0xff] %v3779_v34  ;;  %v1545_v52 = vmul.f32 %v3779_v34, %v3779_v34 }
 0x4a5   : > { %1528 = vst [vmem:[%s3281_s26 + $0x60] sm:$0xff] %v3781_v3  ;;  %v1498_v31 = vpop.permute.xlu1 %1497  ;;  %v1544_v0 = vmul.f32 %v3781_v3, %v3781_v3 }
 0x4a6   : > { %v3791_v12 = vmul.f32 %v1498_v31, %v1387_v49  ;;  %v1493_v62 = vpop.permute.xlu0 %1492 }
 0x4a7   : > { %v3793_v47 = vmul.f32 %v1493_v62, %v1386_v41  ;;  %1572 = vadd.xlane.f32.xlu1 %v1544_v0  ;;  %1570 = vadd.xlane.f32.xlu0 %v1543_v14 }
 0x4a8   : > { %1531 = vst [vmem:[%s3281_s26 + $0x78] sm:$0xff] %v3791_v12  ;;  %v1547_v9 = vmul.f32 %v3791_v12, %v3791_v12 }
 0x4a9   : > { %1530 = vst [vmem:[%s3281_s26 + $0x70] sm:$0xff] %v3793_v47  ;;  %v1546_v6 = vmul.f32 %v3793_v47, %v3793_v47 }
 0x4ab   : > { %1576 = vadd.xlane.f32.xlu1 %v1546_v6  ;;  %1574 = vadd.xlane.f32.xlu0 %v1545_v52 }
 0x4af   : > { %1578 = vadd.xlane.f32.xlu0 %v1547_v9 }
 0x51c   : > { %v1549_v22 = vpop.xlane.xlu0 %1548 }
 0x51d   : > { %v1580_v26 = vmax.f32 %v1549_v22, 1e-24 }
 0x51f   : > { %2494 = vrsqrt.f32 %v1580_v26 }
 0x520   : > { %v1551_v32 = vpop.xlane.xlu1 %1550  ;;  %v1553_v13 = vpop.xlane.xlu0 %1552 }
 0x521   : > { %v1581_v55 = vmax.f32 %v1551_v32, 1e-24  ;;  %v1582_v38 = vmax.f32 %v1553_v13, 1e-24 }
 0x523   : > { %2496 = vrsqrt.f32 %v1581_v55 }
 0x524   : > { %v1557_v19 = vpop.xlane.xlu1 %1556  ;;  %v1555_v48 = vpop.xlane.xlu0 %1554  ;;  %2498 = vrsqrt.f32 %v1582_v38 }
 0x525   : > { %v1583_v57 = vmax.f32 %v1555_v48, 1e-24  ;;  %v1584_v39 = vmax.f32 %v1557_v19, 1e-24 }
 0x527   : > { %2500 = vrsqrt.f32 %v1583_v57 }
 0x528   : > { %v1561_v25 = vpop.xlane.xlu1 %1560  ;;  %v1559_v63 = vpop.xlane.xlu0 %1558  ;;  %2502 = vrsqrt.f32 %v1584_v39 }
 0x529   : > { %v1585_v33 = vmax.f32 %v1559_v63, 1e-24  ;;  %v1586_v43 = vmax.f32 %v1561_v25, 1e-24  ;;  %v2495_v40 = vpop.eup %2494 }
 0x52a   : > { %v1612_v5 = vmul.f32 %v2495_v40, %v3711_v53 }
 0x52b   : > { %2504 = vrsqrt.f32 %v1585_v33 }
 0x52c   : > { %v1565_v2 = vpop.xlane.xlu1 %1564  ;;  %v1563_v18 = vpop.xlane.xlu0 %1562  ;;  %2506 = vrsqrt.f32 %v1586_v43 }
 0x52d   : > { %v2497_v10 = vpop.eup %2496  ;;  %v1587_v59 = vmax.f32 %v1563_v18, 1e-24  ;;  %v1588_v11 = vmax.f32 %v1565_v2, 1e-24 }
 0x52e   : > { %v1613_v15 = vmul.f32 %v2497_v10, %v3721_v60  ;;  %v2499_v45 = vpop.eup %2498 }
 0x52f   : > { %2508 = vrsqrt.f32 %v1587_v59  ;;  %v1614_v4 = vmul.f32 %v2499_v45, %v3709_v20 }
 0x530   : > { %v2074_v35 = vpack.c.bf16 %v1613_v15, %v1612_v5  ;;  %v1569_v46 = vpop.xlane.xlu1 %1568  ;;  %v1567_v1 = vpop.xlane.xlu0 %1566  ;;  %2510 = vrsqrt.f32 %v1588_v11 }
 0x531   : > { %v1589_v44 = vmax.f32 %v1567_v1, 1e-24  ;;  %v2501_v37 = vpop.eup %2500  ;;  %v1590_v23 = vmax.f32 %v1569_v46, 1e-24 }
 0x532   : > { %2075 = vst [vmem:[%s3283_s23] sm:$0xff] %v2074_v35   ;;  %v1615_v56 = vmul.f32 %v2501_v37, %v3719_v42  ;;  %v2503_v53 = vpop.eup %2502 }
 0x533   : > { %2512 = vrsqrt.f32 %v1589_v44  ;;  %v1616_v21 = vmul.f32 %v2503_v53, %v3733_v8 }
 0x534   : > { %v1573_v60 = vpop.xlane.xlu1 %1572  ;;  %v1571_v29 = vpop.xlane.xlu0 %1570  ;;  %v2079_v51 = vpack.c.bf16 %v1615_v56, %v1614_v4  ;;  %2514 = vrsqrt.f32 %v1590_v23 }
 0x535   : > { %v1591_v17 = vmax.f32 %v1571_v29, 1e-24  ;;  %v2505_v50 = vpop.eup %2504  ;;  %v1592_v61 = vmax.f32 %v1573_v60, 1e-24 }
 0x536   : > { %2125 = vst [vmem:[%s3283_s23 + $0x8] sm:$0xff] %v2079_v51   ;;  %v1617_v36 = vmul.f32 %v2505_v50, %v3731_v30  ;;  %v2507_v58 = vpop.eup %2506 }
 0x537   : > { %2516 = vrsqrt.f32 %v1591_v17  ;;  %v1618_v14 = vmul.f32 %v2507_v58, %v3745_v27 }
 0x538   : > { %v1577_v20 = vpop.xlane.xlu1 %1576  ;;  %v1575_v49 = vpop.xlane.xlu0 %1574  ;;  %v2084_v42 = vpack.c.bf16 %v1617_v36, %v1616_v21  ;;  %2518 = vrsqrt.f32 %v1592_v61 }
 0x539   : > { %v1594_v41 = vmax.f32 %v1577_v20, 1e-24  ;;  %v1593_v31 = vmax.f32 %v1575_v49, 1e-24  ;;  %v2509_v0 = vpop.eup %2508 }
 0x53a   : > { %2126 = vst [vmem:[%s3283_s23 + $0x10] sm:$0xff] %v2084_v42   ;;  %v1619_v62 = vmul.f32 %v2509_v0, %v3743_v24  ;;  %v2511_v8 = vpop.eup %2510 }
 0x53b   : > { %2520 = vrsqrt.f32 %v1593_v31  ;;  %v1620_v22 = vmul.f32 %v2511_v8, %v3757_v28 }
 0x53c   : > { %v1579_v6 = vpop.xlane.xlu0 %1578  ;;  %v2089_v30 = vpack.c.bf16 %v1619_v62, %v1618_v14  ;;  %2522 = vrsqrt.f32 %v1594_v41 }
 0x53d   : > { %v1595_v52 = vmax.f32 %v1579_v6, 1e-24  ;;  %v2513_v9 = vpop.eup %2512 }
 0x53e   : > { %2127 = vst [vmem:[%s3283_s23 + $0x18] sm:$0xff] %v2089_v30   ;;  %v1621_v26 = vmul.f32 %v2513_v9, %v3755_v16  ;;  %v2515_v32 = vpop.eup %2514 }
 0x53f   : > { %2524 = vrsqrt.f32 %v1595_v52  ;;  %v1622_v24 = vmul.f32 %v2515_v32, %v3769_v7 }
 0x540   : > { %v2094_v27 = vpack.c.bf16 %v1621_v26, %v1620_v22 }
 0x541   : > { %v2517_v13 = vpop.eup %2516 }
 0x542   : > { %2128 = vst [vmem:[%s3283_s23 + $0x20] sm:$0xff] %v2094_v27   ;;  %v1623_v55 = vmul.f32 %v2517_v13, %v3767_v54  ;;  %v2519_v38 = vpop.eup %2518 }
 0x543   : > { %v1624_v28 = vmul.f32 %v2519_v38, %v3781_v3 }
 0x544   : > { %v2099_v19 = vpack.c.bf16 %v1623_v55, %v1622_v24 }
 0x545   : > { %v2521_v48 = vpop.eup %2520 }
 0x546   : > { %v2523_v57 = vpop.eup %2522  ;;  %2129 = vst [vmem:[%s3283_s23 + $0x28] sm:$0xff] %v2099_v19   ;;  %v1625_v16 = vmul.f32 %v2521_v48, %v3779_v34 }
 0x547   : > { %v1626_v63 = vmul.f32 %v2523_v57, %v3793_v47 }
 0x548   : > { %v2104_v25 = vpack.c.bf16 %v1625_v16, %v1624_v28 }
 0x549   : > { %v2525_v39 = vpop.eup %2524 }
 0x54a   : > { %v1627_v33 = vmul.f32 %v2525_v39, %v3791_v12  ;;  %2130 = vst [vmem:[%s3283_s23 + $0x30] sm:$0xff] %v2104_v25  }
 0x54c   : > { %v2109_v7 = vpack.c.bf16 %v1627_v33, %v1626_v63 }
 0x54e   : > { %2131 = vst [vmem:[%s3283_s23 + $0x38] sm:$0xff] %v2109_v7  }
 0x54f PF: > { %s4031_s2 = sld [smem:[#allocation28_spill]]  ;;  %s4032_s16 = sld [smem:[#allocation34_spill]] }
 0x550   : > { %s4033_s20 = sld [smem:[#allocation38_spill]]  ;;  %s1727_s7 = sshll.u32 %s3281_s26, 4  ;;  %s3836_s7 = int_to_ptr.vmem [resolvable:$true] %s1727_s7 }
 0x551   : > { %s1709_s27 = scalar_lea.sflag [#allocation9], %s3253_s17  ;;  %s2646_s15 = scalar_lea.vmem %s3836_s7, 2048 }
 0x552   : > { %p2647_p4 = scmp.ne.s32.totalorder %s3836_s7, %s2646_s15  ;;  %s2846_s21 = smov [#allocation15]  }
 0x553   : > { %s2650_s0 = sshll.u32 %s2846_s21, 4  ;;  %s2651_s0 = int_to_ptr.vmem [resolvable:$false] %s2650_s0 }
 0x554   : > { %s2652_s5 = scalar_lea.vmem %s2651_s0, 4096  ;;  %p2653_p8 = scmp.lt.s32.totalorder %s3836_s7, %s2651_s0 }
 0x555   : > { %s2005_s30 = sshll.u32 %s4031_s2, 11  ;;  %p4034_p2 = scmp.ne.s32.totalorder %s4032_s16, 0 }
 0x556   : > { %s3833_s22 = scalar_lea.hbm %s4033_s20, %s2005_s30  ;;  %p2654_p7 = scmp.lt.s32.totalorder %s2652_s5, %s2646_s15 }
 0x557   : > { %p2648_p3 = pnand %p2647_p4, %p4034_p2 }
 0x558   : > { %p2655_p5 = por %p2654_p7, %p2653_p8 }
 0x559   : > { %p2649_p9 = pneg %p2648_p3 }
 0x55b   : > { %p2656_p13 = pnand %p2655_p5, %p2649_p9 }
 0x55d   : > { %2659 = shalt.err (!%p2656_p13)
}
 0x55e   : > { %s2660_s13 = scalar_lea.hbm %s3833_s22, 2048  ;;  %s2664_s8 = scalar_lea.hbm %s4033_s20, 4096 }
 0x55f   : > { %p2661_p1 = scmp.ne.s32.totalorder %s3833_s22, %s2660_s13  ;;  %p2665_p12 = scmp.lt.u32.totalorder %s3833_s22, %s4033_s20 }
 0x560   : > { %p2666_p11 = scmp.lt.u32.totalorder %s2664_s8, %s2660_s13  ;;  %p2668_p4 = scmp.lt.u32.totalorder %s2660_s13, %s3833_s22 }
 0x561   : > { %p2662_p0 = pnand %p2661_p1, %p4034_p2 }
 0x562   : > { %p2667_p10 = por %p2666_p11, %p2665_p12 }
 0x563   : > { %p2663_p6 = pneg %p2662_p0 }
 0x564   : > { %p2669_p3 = por %p2668_p4, %p2667_p10 }
 0x566   : > { %p2670_p9 = pnand %p2669_p3, %p2663_p6 }
 0x568   : > { %2673 = shalt.err (!%p2670_p9)
}
 0x569   : > { %s2847_s30 = smov 128   ;;  %s2848_s19 = smov 8  }
 0x56a   : > { %2236 = dma.vmem_to_hbm [thread:$0]  (%p4034_p2), %s3836_s7, 2048, %s3833_s22, %s1709_s27, %s2847_s30, %s2847_s30, %s2848_s19  }
 0x56b   : > { %s2006_s18 = sshll.u32 %s4031_s2, 10  ;;  %s1743_s15 = sshll.u32 %s3283_s23, 4  ;;  %s3869_s15 = int_to_ptr.vmem [resolvable:$true] %s1743_s15 }
 0x56c   : > { %s4035_s5 = sld [smem:[#allocation39_spill]]  ;;  %s1714_s12 = scalar_lea.sflag [#allocation17], %s3253_s17 }
 0x56d   : > { %s2674_s26 = scalar_lea.vmem %s3869_s15, 1024  ;;  %s2849_s8 = smov [#allocation16]  }
 0x56e   : > { %p2675_p8 = scmp.ne.s32.totalorder %s3869_s15, %s2674_s26  ;;  %s2678_s22 = sshll.u32 %s2849_s8, 4  ;;  %s2679_s22 = int_to_ptr.vmem [resolvable:$false] %s2678_s22 }
 0x56f   : > { %s2680_s23 = scalar_lea.vmem %s2679_s22, 2048  ;;  %p2681_p13 = scmp.lt.s32.totalorder %s3869_s15, %s2679_s22 }
 0x570   : > { %p2676_p7 = pnand %p2675_p8, %p4034_p2  ;;  %p2682_p1 = scmp.lt.s32.totalorder %s2680_s23, %s2674_s26 }
 0x572   : > { %s3867_s13 = scalar_lea.hbm %s4035_s5, %s2006_s18  ;;  %p2677_p5 = pneg %p2676_p7 }
 0x573   : > { %p2683_p0 = por %p2682_p1, %p2681_p13 }
 0x575   : > { %p2684_p6 = pnand %p2683_p0, %p2677_p5 }
 0x577   : > { %2687 = shalt.err (!%p2684_p6)
}
 0x578   : > { %s2688_s2 = scalar_lea.hbm %s3867_s13, 1024  ;;  %s2692_s28 = scalar_lea.hbm %s4035_s5, 2048 }
 0x579   : > { %p2689_p12 = scmp.ne.s32.totalorder %s3867_s13, %s2688_s2  ;;  %p2693_p4 = scmp.lt.u32.totalorder %s3867_s13, %s4035_s5 }
 0x57a   : > { %p2694_p3 = scmp.lt.u32.totalorder %s2692_s28, %s2688_s2  ;;  %p2696_p8 = scmp.lt.u32.totalorder %s2688_s2, %s3867_s13 }
 0x57b   : > { %p2690_p11 = pnand %p2689_p12, %p4034_p2 }
 0x57c   : > { %p2695_p9 = por %p2694_p3, %p2693_p4 }
 0x57d   : > { %p2691_p10 = pneg %p2690_p11 }
 0x57e   : > { %p2697_p7 = por %p2696_p8, %p2695_p9 }
 0x580   : > { %p2698_p5 = pnand %p2697_p7, %p2691_p10 }
 0x582   : > { %2701 = shalt.err (!%p2698_p5)
}
 0x583   : > { %s2850_s19 = smov 64   ;;  %s2851_s18 = smov 4  }
 0x584   : > { %2237 = dma.vmem_to_hbm [thread:$0]  (%p4034_p2), %s3869_s15, 1024, %s3867_s13, %s1714_s12, %s2850_s19, %s2850_s19, %s2851_s18  }
 0x585 PF: > { %s4036_s21 = sld [smem:[#allocation25_spill]]  ;;  %s4037_s0 = sld [smem:[#allocation35_spill]] }
 0x586   : > { %p2261_p13 = scmp.ge.s32.totalorder %s2832_s11, 2 }
 0x58b   : > { %s1758_s26 = sand.u32 1, %s4036_s21   ;;  %p4038_p1 = scmp.ne.s32.totalorder %s4037_s0, 0 }
 0x58c   : > { %s1759_s8 = scalar_lea.sflag [#allocation9], %s1758_s26 }
 0x58d   : > { %p2254_p0 = pnand %p2261_p13, %p4038_p1 }
 0x58f   : > { %2771 = dma.done.wait (!%p2254_p0), %s1759_s8, 2048  }
 0x590   : > { %2773 = vsyncadd (!%p2254_p0), %s1759_s8, 4294965248  ;;  %s1768_s22 = scalar_lea.sflag [#allocation17], %s1758_s26 }
 0x591   : > { %2775 = dma.done.wait (!%p2254_p0), %s1768_s22, 1024  }
 0x592   : > { %2777 = vsyncadd (!%p2254_p0), %s1768_s22, 4294966272  ;;  %s33_s11 = sadd.s32 1, %s2832_s11   ;;  %s4040_s26 = sld [smem:[#allocation23_spill]] }
 0x593   : > { %p3900_p6 = scmp.ge.s32.totalorder %s33_s11, 6   ;;  %s4041_s27 = sld [smem:[#allocation24_spill]] }
 0x594   : > { %s4042_s0 = sld [smem:[#allocation31_spill]]  ;;  %s4043_s17 = sld [smem:[#allocation26_spill]] }
 0x595   : > { %s4044_s30 = sld [smem:[#allocation36_spill]]  ;;  %s4045_s15 = sld [smem:[#allocation29_spill]] }
 0x596   : > { %s4046_s13 = sld [smem:[#allocation33_spill]]  ;;  %s4047_s23 = smov %s2784_s24 }
 0x597   : > { %s4048_s24 = smov %s2788_s25  ;;  %s4049_s25 = smov %s3191_s14 }
 0x598   : > { %s4050_s28 = smov %s2808_s29  ;;  %s4052_s7 = smov %s2824_s9 }
 0x599   : > { %s4053_s8 = smov %s2828_s10  ;;  %32 = sbr.rel (!%p3900_p6) target bundleno = 21 (0x15), region = 147 }
 0x59a   : > { %s4051_s29 = smov %s4043_s17 }
 0x59b   : > { %s4054_s9 = smov %s4045_s15 }
 0x59c   : > { %s4055_s10 = smov %s4046_s13 }
 0x5a0   :  { %1773 = vsyncpa [#allocation8], 1 }
 0x5a1   :  { %1775 = vsyncpa [#allocation8 + $0x1], 1 }
 0x5a2   :  { %1776 = vsyncpa [#allocation11], 1 }
 0x5a3   :  { %1778 = vsyncpa [#allocation11 + $0x1], 1 }
 0x5a4   :  { %1779 = vsyncpa [#allocation14], 1 }
 0x5a5   :  { %1781 = vsyncpa [#allocation14 + $0x1], 1 }
 0x5a6   :  { %1782 = vsyncpa [#allocation9], 1 }
 0x5a7   :  { %1784 = vsyncpa [#allocation9 + $0x1], 1 }
 0x5a8   :  { %1785 = vsyncpa [#allocation17], 1 }
 0x5a9   :  { %1787 = vsyncpa [#allocation17 + $0x1], 1 }

</bundles_post_ra>
